<compile_context>
chip_gen: v5e
topology: v5e:2x2
jax: 0.10.0
libtpu: 0.0.40
codegen_flags: <defaults>
</compile_context>

<pallas_src>
import math

import jax
import jax.numpy as jnp
from jax.experimental import pallas as pl
from jax.experimental.pallas import tpu as pltpu

# ----------------------------- config ---------------------------------------
D_MODEL = 32
N_HEADS = 4
D_HEAD = D_MODEL // N_HEADS
D_FF = 64
N_LAYERS = 2
EPS = 1e-6


# ----------------------------- fused decoder kernel --------------------------
def _decoder_kernel(
    x_ref, mem_ref, lat_ref, tgt_m_ref, src_m_ref,
    aw_qkv_ref, ab_qkv_ref, aw_o_ref, ab_o_ref,     # attention params, stacked [L*3, ...]
    w1_ref, b1_ref, w2_ref, b2_ref,                 # FFN params, stacked [L, ...]
    lng_ref, lnb_ref,                               # per-sublayer LayerNorm, stacked [L*4, 1, D]
    fing_ref, finb_ref,                             # final LayerNorm
    o_ref,
):
    f32 = jnp.float32
    bf16 = jnp.bfloat16

    B_blk, S, D = x_ref.shape
    Sm = mem_ref.shape[1]
    Sl = lat_ref.shape[1]

    def layer_norm(v, g, b):
        # Annotated-Transformer LayerNorm: unbiased std, eps added to std.
        mean = jnp.mean(v, axis=-1, keepdims=True)
        var = jnp.sum((v - mean) ** 2, axis=-1, keepdims=True) / (v.shape[-1] - 1)
        std = jnp.sqrt(var)
        return g * (v - mean) / (std + EPS) + b

    def split_heads(t):  # [S_, D] -> [H, S_, Dh]  (lane slices stacked on new leading dim)
        return jnp.stack(
            [t[:, h * D_HEAD:(h + 1) * D_HEAD] for h in range(N_HEADS)], axis=0)

    # Hoisted once per grid step: additive mask biases (0 keep / -1e9 drop).
    tgt_bias = (tgt_m_ref[...] - 1.0) * 1e9          # [B_blk, S, S]
    src_bias = (src_m_ref[...] - 1.0) * 1e9          # [B_blk, 1, Sm]

    def mha(xq_flat, xkv_flat, Sq, Sk, bias, idx, fused_qkv):
        # xq_flat: [B_blk*Sq, D] f32; xkv_flat: [B_blk*Sk, D] f32 (unused if fused_qkv)
        # bias: [B_blk, Sq or 1, Sk] additive mask bias, or None.
        wqkv = aw_qkv_ref[idx]                       # [D, 3D] bf16 (scale folded into Wq)
        bqkv = ab_qkv_ref[idx]                       # [1, 3D] f32  (scale folded into bq)
        if fused_qkv:
            qkv = jnp.dot(xq_flat.astype(bf16), wqkv,
                          preferred_element_type=f32) + bqkv
            q = qkv[:, :D_MODEL]
            k = qkv[:, D_MODEL:2 * D_MODEL]
            v = qkv[:, 2 * D_MODEL:]
        else:
            q = jnp.dot(xq_flat.astype(bf16), wqkv[:, :D_MODEL],
                        preferred_element_type=f32) + bqkv[:, :D_MODEL]
            kv = jnp.dot(xkv_flat.astype(bf16), wqkv[:, D_MODEL:],
                         preferred_element_type=f32) + bqkv[:, D_MODEL:]
            k = kv[:, :D_MODEL]
            v = kv[:, D_MODEL:]
        q = q.astype(bf16)
        k = k.astype(bf16)
        v = v.astype(bf16)

        wo = aw_o_ref[idx]                           # [H, Dh, D] bf16
        bo = ab_o_ref[idx]                           # [1, D]     f32

        outs = []
        for b in range(B_blk):                       # attention stays per-batch in the block
            qh = split_heads(q[b * Sq:(b + 1) * Sq])             # [H, Sq, Dh]
            kh = split_heads(k[b * Sk:(b + 1) * Sk])             # [H, Sk, Dh]
            vh = split_heads(v[b * Sk:(b + 1) * Sk])             # [H, Sk, Dh]
            # head-batched scores (scale already folded into Wq/bq)
            s = jnp.einsum('hqd,hkd->hqk', qh, kh,
                           preferred_element_type=f32)            # [H, Sq, Sk] f32
            if bias is not None:
                s = s + bias[b][None]                             # broadcast over heads
            s = s - jnp.max(s, axis=-1, keepdims=True)
            p = jnp.exp(s)
            p = p * pl.reciprocal(jnp.sum(p, axis=-1, keepdims=True), approx=True)
            o = jnp.einsum('hqk,hkd->hqd', p.astype(bf16), vh,
                           preferred_element_type=f32)            # [H, Sq, Dh] f32
            # output projection folded per head, then summed — no lane concat
            ob = jnp.einsum('hqd,hdm->hqm', o.astype(bf16), wo,
                            preferred_element_type=f32).sum(axis=0)  # [Sq, D]
            outs.append(ob)
        out = outs[0] if B_blk == 1 else jnp.concatenate(outs, axis=0)
        return out + bo

    # Flatten the batch block: all projections / FFN / LayerNorms run on
    # [B_blk*S, D] rows (fewer, fatter matmuls than per-batch-element loops).
    xb = x_ref[...].reshape(B_blk * S, D)            # [B_blk*S,  D] f32
    memb = mem_ref[...].reshape(B_blk * Sm, D)       # [B_blk*Sm, D] f32
    latb = lat_ref[...].reshape(B_blk * Sl, D)       # [B_blk*Sl, D] f32

    for li in range(N_LAYERS):
        # sublayer 0: masked self-attention (fused QKV matmul)
        xn = layer_norm(xb, lng_ref[4 * li + 0], lnb_ref[4 * li + 0])
        xb = xb + mha(xn, None, S, S, tgt_bias, 3 * li + 0, fused_qkv=True)
        # sublayer 1: source attention over memory (fused KV matmul)
        xn = layer_norm(xb, lng_ref[4 * li + 1], lnb_ref[4 * li + 1])
        xb = xb + mha(xn, memb, S, Sm, src_bias, 3 * li + 1, fused_qkv=False)
        # sublayer 2: attention over latents (no mask)
        xn = layer_norm(xb, lng_ref[4 * li + 2], lnb_ref[4 * li + 2])
        xb = xb + mha(xn, latb, S, Sl, None, 3 * li + 2, fused_qkv=False)
        # sublayer 3: position-wise feed-forward
        xn = layer_norm(xb, lng_ref[4 * li + 3], lnb_ref[4 * li + 3])
        h = jnp.maximum(
            jnp.dot(xn.astype(bf16), w1_ref[li], preferred_element_type=f32)
            + b1_ref[li], 0.0)
        xb = xb + (jnp.dot(h.astype(bf16), w2_ref[li], preferred_element_type=f32)
                   + b2_ref[li])

    # final LayerNorm (Decoder.norm)
    o_ref[...] = layer_norm(xb, fing_ref[...], finb_ref[...]).reshape(B_blk, S, D)


# ----------------------------- wrapper ----------------------------------------
def decoder_forward(params, x, memory, latents, src_mask, tgt_mask):
    B, S, D = x.shape
    Sm = memory.shape[1]
    Sl = latents.shape[1]
    Skmax = max(S, Sm, Sl)

    # Batch tiling: for even B use 2 grid steps (one fat step per v7x TensorCore,
    # "parallel" so megacore shards them); otherwise a single step with the whole
    # batch (amortizes the ~0.35us/step overhead on single-TC v5e/v6e).
    num_blocks = 2 if (B >= 2 and B % 2 == 0) else 1
    B_blk = B // num_blocks

    def batch_spec(arr):
        nd = arr.ndim
        blk = (B_blk,) + arr.shape[1:]
        return pl.BlockSpec(blk, lambda b, _nd=nd: (b,) + (0,) * (_nd - 1))

    def full_spec(arr):
        nd = arr.ndim
        return pl.BlockSpec(arr.shape, lambda b, _nd=nd: (0,) * _nd)

    # Advisory cost estimate for the single fused custom call.
    per_layer_flops = (
        3 * (2 * S * D * 3 * D                       # qkv / q+kv projections
             + 4 * N_HEADS * S * Skmax * D_HEAD      # scores + p@v
             + 2 * S * D * D)                        # output projection
        + 2 * 2 * S * D * D_FF                       # FFN
    )
    flops = int(B * N_LAYERS * per_layer_flops)
    transcendentals = int(B * N_LAYERS * 3 * N_HEADS * S * Skmax
                          + B * (4 * N_LAYERS + 1) * S)
    bytes_accessed = int(4 * (x.size + memory.size + latents.size
                              + src_mask.size + tgt_mask.size + x.size)
                         + sum(p.size * p.dtype.itemsize for p in params.values()))
    ce = pl.CostEstimate(flops=flops, transcendentals=transcendentals,
                         bytes_accessed=bytes_accessed)

    return pl.pallas_call(
        _decoder_kernel,
        out_shape=jax.ShapeDtypeStruct((B, S, D), jnp.float32),
        grid=(num_blocks,),
        in_specs=[
            batch_spec(x), batch_spec(memory), batch_spec(latents),
            batch_spec(tgt_mask), batch_spec(src_mask),
            full_spec(params["aw_qkv"]), full_spec(params["ab_qkv"]),
            full_spec(params["aw_o"]), full_spec(params["ab_o"]),
            full_spec(params["w1"]), full_spec(params["b1"]),
            full_spec(params["w2"]), full_spec(params["b2"]),
            full_spec(params["ln_g"]), full_spec(params["ln_b"]),
            full_spec(params["fin_g"]), full_spec(params["fin_b"]),
        ],
        out_specs=pl.BlockSpec((B_blk, S, D), lambda b: (b, 0, 0)),
        compiler_params=pltpu.CompilerParams(dimension_semantics=("parallel",)),
        cost_estimate=ce,
    )(
        x, memory, latents, tgt_mask, src_mask,
        params["aw_qkv"], params["ab_qkv"], params["aw_o"], params["ab_o"],
        params["w1"], params["b1"], params["w2"], params["b2"],
        params["ln_g"], params["ln_b"], params["fin_g"], params["fin_b"],
    )


# ----------------------------- deterministic init -----------------------------
def _dense(key, fan_in, fan_out):
    k1, k2 = jax.random.split(key)
    w = jax.random.normal(k1, (fan_in, fan_out), jnp.float32) * 0.05
    b = jax.random.normal(k2, (fan_out,), jnp.float32) * 0.01
    return w, b


def init_params(key):
    scale = 1.0 / math.sqrt(D_HEAD)
    aw_qkv, ab_qkv, aw_o, ab_o = [], [], [], []
    w1s, b1s, w2s, b2s = [], [], [], []
    lngs, lnbs = [], []
    for li in range(N_LAYERS):
        lk = jax.random.fold_in(key, li)
        ks = jax.random.split(lk, 5)
        for ai in range(3):  # self-attn, src-attn, latent-attn
            aks = jax.random.split(ks[ai], 4)
            wq, bq = _dense(aks[0], D_MODEL, D_MODEL)
            wk, bk = _dense(aks[1], D_MODEL, D_MODEL)
            wv, bv = _dense(aks[2], D_MODEL, D_MODEL)
            wo, bo = _dense(aks[3], D_MODEL, D_MODEL)
            # fold 1/sqrt(d_k) into the query projection (weights AND bias)
            wq = wq * scale
            bq = bq * scale
            aw_qkv.append(jnp.concatenate([wq, wk, wv], axis=1))         # [D, 3D]
            ab_qkv.append(jnp.concatenate([bq, bk, bv])[None, :])        # [1, 3D]
            aw_o.append(wo.reshape(N_HEADS, D_HEAD, D_MODEL))            # [H, Dh, D]
            ab_o.append(bo[None, :])                                     # [1, D]
        w1, b1 = _dense(ks[3], D_MODEL, D_FF)
        w2, b2 = _dense(ks[4], D_FF, D_MODEL)
        w1s.append(w1); b1s.append(b1[None, :])
        w2s.append(w2); b2s.append(b2[None, :])
        for _ in range(4):
            lngs.append(jnp.ones((1, D_MODEL), jnp.float32))
            lnbs.append(jnp.zeros((1, D_MODEL), jnp.float32))
    bf16 = jnp.bfloat16
    return dict(
        # matmul weights in bf16 (MXU-native on v6e/v7x); biases / LN params in f32
        aw_qkv=jnp.stack(aw_qkv).astype(bf16), ab_qkv=jnp.stack(ab_qkv),
        aw_o=jnp.stack(aw_o).astype(bf16), ab_o=jnp.stack(ab_o),
        w1=jnp.stack(w1s).astype(bf16), b1=jnp.stack(b1s),
        w2=jnp.stack(w2s).astype(bf16), b2=jnp.stack(b2s),
        ln_g=jnp.stack(lngs), ln_b=jnp.stack(lnbs),
        fin_g=jnp.ones((1, D_MODEL), jnp.float32),
        fin_b=jnp.zeros((1, D_MODEL), jnp.float32),
    )


# ----------------------------- main -------------------------------------------
if __name__ == "__main__":
    B, S_TGT, S_SRC, N_LAT = 2, 8, 8, 4

    key = jax.random.PRNGKey(0)
    kx, km, kl, kp = jax.random.split(key, 4)
    x = jax.random.normal(kx, (B, S_TGT, D_MODEL), jnp.float32)
    memory = jax.random.normal(km, (B, S_SRC, D_MODEL), jnp.float32)
    latents = jax.random.normal(kl, (B, N_LAT, D_MODEL), jnp.float32)

    # src_mask: [B, 1, S_src] all ones; tgt_mask: [B, S_tgt, S_tgt] causal
    src_mask = jnp.ones((B, 1, S_SRC), jnp.float32)
    tgt_mask = jnp.broadcast_to(
        jnp.tril(jnp.ones((S_TGT, S_TGT), jnp.float32))[None], (B, S_TGT, S_TGT)
    )

    params = init_params(kp)

    fwd = jax.jit(decoder_forward)
    out = fwd(params, x, memory, latents, src_mask, tgt_mask)
    out = jax.block_until_ready(out)

    assert out.shape == (B, S_TGT, D_MODEL)
    assert bool(jnp.all(jnp.isfinite(out)))
    print("KERNEL_OK")
</pallas_src>

<mosaic_0001>
module attributes {stable_mosaic.version = 11 : i64} {
  func.func @_decoder_kernel(%arg0: i32, %arg1: memref<1x8x32xf32, #tpu.memory_space<vmem>>, %arg2: memref<1x8x32xf32, #tpu.memory_space<vmem>>, %arg3: memref<1x4x32xf32, #tpu.memory_space<vmem>>, %arg4: memref<1x8x8xf32, #tpu.memory_space<vmem>>, %arg5: memref<1x1x8xf32, #tpu.memory_space<vmem>>, %arg6: memref<6x32x96xbf16, #tpu.memory_space<vmem>>, %arg7: memref<6x1x96xf32, #tpu.memory_space<vmem>>, %arg8: memref<6x4x8x32xbf16, #tpu.memory_space<vmem>>, %arg9: memref<6x1x32xf32, #tpu.memory_space<vmem>>, %arg10: memref<2x32x64xbf16, #tpu.memory_space<vmem>>, %arg11: memref<2x1x64xf32, #tpu.memory_space<vmem>>, %arg12: memref<2x64x32xbf16, #tpu.memory_space<vmem>>, %arg13: memref<2x1x32xf32, #tpu.memory_space<vmem>>, %arg14: memref<8x1x32xf32, #tpu.memory_space<vmem>>, %arg15: memref<8x1x32xf32, #tpu.memory_space<vmem>>, %arg16: memref<1x32xf32, #tpu.memory_space<vmem>>, %arg17: memref<1x32xf32, #tpu.memory_space<vmem>>, %arg18: memref<1x8x32xf32, #tpu.memory_space<vmem>>) attributes {dimension_semantics = [#tpu.dimension_semantics<parallel>], iteration_bounds = array<i64: 2>, scalar_prefetch = 0 : i64, scratch_operands = 0 : i64, tpu.core_type = #tpu.core_type<tc>, window_params = [{transform_indices = @transform_0, window_bounds = array<i64: 1, 8, 32>}, {transform_indices = @transform_1, window_bounds = array<i64: 1, 8, 32>}, {transform_indices = @transform_2, window_bounds = array<i64: 1, 4, 32>}, {transform_indices = @transform_3, window_bounds = array<i64: 1, 8, 8>}, {transform_indices = @transform_4, window_bounds = array<i64: 1, 1, 8>}, {pipeline_mode = #tpu.pipeline_mode<synchronous>, transform_indices = @transform_5, window_bounds = array<i64: 6, 32, 96>}, {pipeline_mode = #tpu.pipeline_mode<synchronous>, transform_indices = @transform_6, window_bounds = array<i64: 6, 1, 96>}, {pipeline_mode = #tpu.pipeline_mode<synchronous>, transform_indices = @transform_7, window_bounds = array<i64: 6, 4, 8, 32>}, {pipeline_mode = #tpu.pipeline_mode<synchronous>, transform_indices = @transform_8, window_bounds = array<i64: 6, 1, 32>}, {pipeline_mode = #tpu.pipeline_mode<synchronous>, transform_indices = @transform_9, window_bounds = array<i64: 2, 32, 64>}, {pipeline_mode = #tpu.pipeline_mode<synchronous>, transform_indices = @transform_10, window_bounds = array<i64: 2, 1, 64>}, {pipeline_mode = #tpu.pipeline_mode<synchronous>, transform_indices = @transform_11, window_bounds = array<i64: 2, 64, 32>}, {pipeline_mode = #tpu.pipeline_mode<synchronous>, transform_indices = @transform_12, window_bounds = array<i64: 2, 1, 32>}, {pipeline_mode = #tpu.pipeline_mode<synchronous>, transform_indices = @transform_13, window_bounds = array<i64: 8, 1, 32>}, {pipeline_mode = #tpu.pipeline_mode<synchronous>, transform_indices = @transform_14, window_bounds = array<i64: 8, 1, 32>}, {pipeline_mode = #tpu.pipeline_mode<synchronous>, transform_indices = @transform_15, window_bounds = array<i64: 1, 32>}, {pipeline_mode = #tpu.pipeline_mode<synchronous>, transform_indices = @transform_16, window_bounds = array<i64: 1, 32>}, {transform_indices = @transform_17, window_bounds = array<i64: 1, 8, 32>}]} {
    %c0 = arith.constant 0 : index
    %c0_0 = arith.constant 0 : index
    %c0_1 = arith.constant 0 : index
    %0 = vector.load %arg4[%c0, %c0_0, %c0_1] : memref<1x8x8xf32, #tpu.memory_space<vmem>>, vector<1x8x8xf32>
    %cst = arith.constant 1.000000e+00 : f32
    %1 = vector.broadcast %cst : f32 to vector<1x8x8xf32>
    %2 = arith.subf %0, %1 : vector<1x8x8xf32>
    %cst_2 = arith.constant 1.000000e+09 : f32
    %3 = vector.broadcast %cst_2 : f32 to vector<1x8x8xf32>
    %4 = arith.mulf %2, %3 : vector<1x8x8xf32>
    %c0_3 = arith.constant 0 : index
    %c0_4 = arith.constant 0 : index
    %c0_5 = arith.constant 0 : index
    %5 = vector.load %arg5[%c0_3, %c0_4, %c0_5] : memref<1x1x8xf32, #tpu.memory_space<vmem>>, vector<1x1x8xf32>
    %cst_6 = arith.constant 1.000000e+00 : f32
    %6 = vector.broadcast %cst_6 : f32 to vector<1x1x8xf32>
    %7 = arith.subf %5, %6 : vector<1x1x8xf32>
    %cst_7 = arith.constant 1.000000e+09 : f32
    %8 = vector.broadcast %cst_7 : f32 to vector<1x1x8xf32>
    %9 = arith.mulf %7, %8 : vector<1x1x8xf32>
    %c0_8 = arith.constant 0 : index
    %c0_9 = arith.constant 0 : index
    %c0_10 = arith.constant 0 : index
    %10 = vector.load %arg1[%c0_8, %c0_9, %c0_10] : memref<1x8x32xf32, #tpu.memory_space<vmem>>, vector<1x8x32xf32>
    %11 = vector.shape_cast %10 : vector<1x8x32xf32> to vector<8x32xf32>
    %c0_11 = arith.constant 0 : index
    %c0_12 = arith.constant 0 : index
    %c0_13 = arith.constant 0 : index
    %12 = vector.load %arg2[%c0_11, %c0_12, %c0_13] : memref<1x8x32xf32, #tpu.memory_space<vmem>>, vector<1x8x32xf32>
    %13 = vector.shape_cast %12 : vector<1x8x32xf32> to vector<8x32xf32>
    %c0_14 = arith.constant 0 : index
    %c0_15 = arith.constant 0 : index
    %c0_16 = arith.constant 0 : index
    %14 = vector.load %arg3[%c0_14, %c0_15, %c0_16] : memref<1x4x32xf32, #tpu.memory_space<vmem>>, vector<1x4x32xf32>
    %15 = vector.shape_cast %14 : vector<1x4x32xf32> to vector<4x32xf32>
    %c0_17 = arith.constant 0 : index
    %c0_18 = arith.constant 0 : index
    %c0_19 = arith.constant 0 : index
    %16 = vector.load %arg14[%c0_17, %c0_18, %c0_19] : memref<8x1x32xf32, #tpu.memory_space<vmem>>, vector<1x1x32xf32>
    %17 = vector.shape_cast %16 : vector<1x1x32xf32> to vector<1x32xf32>
    %c0_20 = arith.constant 0 : index
    %c0_21 = arith.constant 0 : index
    %c0_22 = arith.constant 0 : index
    %18 = vector.load %arg15[%c0_20, %c0_21, %c0_22] : memref<8x1x32xf32, #tpu.memory_space<vmem>>, vector<1x1x32xf32>
    %19 = vector.shape_cast %18 : vector<1x1x32xf32> to vector<1x32xf32>
    %cst_23 = arith.constant dense<0.000000e+00> : vector<8xf32>
    %20 = vector.multi_reduction <add>, %11, %cst_23 [1] : vector<8x32xf32> to vector<8xf32>
    %21 = vector.shape_cast %20 : vector<8xf32> to vector<8x1xf32>
    %cst_24 = arith.constant 3.200000e+01 : f32
    %22 = vector.broadcast %cst_24 : f32 to vector<8x1xf32>
    %23 = arith.divf %21, %22 : vector<8x1xf32>
    %24 = vector.broadcast %23 : vector<8x1xf32> to vector<8x32xf32>
    %25 = arith.subf %11, %24 : vector<8x32xf32>
    %26 = arith.mulf %25, %25 : vector<8x32xf32>
    %cst_25 = arith.constant dense<0.000000e+00> : vector<8xf32>
    %27 = vector.multi_reduction <add>, %26, %cst_25 [1] : vector<8x32xf32> to vector<8xf32>
    %28 = vector.shape_cast %27 : vector<8xf32> to vector<8x1xf32>
    %cst_26 = arith.constant 3.100000e+01 : f32
    %29 = vector.broadcast %cst_26 : f32 to vector<8x1xf32>
    %30 = arith.divf %28, %29 : vector<8x1xf32>
    %31 = math.sqrt %30 : vector<8x1xf32>
    %32 = vector.broadcast %23 : vector<8x1xf32> to vector<8x32xf32>
    %33 = arith.subf %11, %32 : vector<8x32xf32>
    %34 = vector.broadcast %17 : vector<1x32xf32> to vector<8x32xf32>
    %35 = arith.mulf %34, %33 : vector<8x32xf32>
    %cst_27 = arith.constant 9.99999997E-7 : f32
    %36 = vector.broadcast %cst_27 : f32 to vector<8x1xf32>
    %37 = arith.addf %31, %36 : vector<8x1xf32>
    %38 = vector.broadcast %37 : vector<8x1xf32> to vector<8x32xf32>
    %39 = arith.divf %35, %38 : vector<8x32xf32>
    %40 = vector.broadcast %19 : vector<1x32xf32> to vector<8x32xf32>
    %41 = arith.addf %39, %40 : vector<8x32xf32>
    %c0_28 = arith.constant 0 : index
    %c0_29 = arith.constant 0 : index
    %c0_30 = arith.constant 0 : index
    %42 = vector.load %arg6[%c0_28, %c0_29, %c0_30] : memref<6x32x96xbf16, #tpu.memory_space<vmem>>, vector<1x32x96xbf16>
    %43 = vector.shape_cast %42 : vector<1x32x96xbf16> to vector<32x96xbf16>
    %c0_31 = arith.constant 0 : index
    %c0_32 = arith.constant 0 : index
    %c0_33 = arith.constant 0 : index
    %44 = vector.load %arg7[%c0_31, %c0_32, %c0_33] : memref<6x1x96xf32, #tpu.memory_space<vmem>>, vector<1x1x96xf32>
    %45 = vector.shape_cast %44 : vector<1x1x96xf32> to vector<1x96xf32>
    %46 = arith.truncf %41 : vector<8x32xf32> to vector<8x32xbf16>
    %cst_34 = arith.constant dense<0.000000e+00> : vector<8x96xf32>
    %47 = tpu.matmul %46, %43, %cst_34 {dimension_numbers = #tpu.dot_dimension_numbers<[1], [0], [0], [1], [0, 0, 1, 1], [], []>} : vector<8x32xbf16>, vector<32x96xbf16>, vector<8x96xf32> -> vector<8x96xf32>
    %48 = vector.broadcast %45 : vector<1x96xf32> to vector<8x96xf32>
    %49 = arith.addf %47, %48 : vector<8x96xf32>
    %50 = vector.extract_strided_slice %49 {offsets = [0, 0], sizes = [8, 32], strides = [1, 1]} : vector<8x96xf32> to vector<8x32xf32>
    %51 = vector.extract_strided_slice %49 {offsets = [0, 32], sizes = [8, 32], strides = [1, 1]} : vector<8x96xf32> to vector<8x32xf32>
    %52 = vector.extract_strided_slice %49 {offsets = [0, 64], sizes = [8, 32], strides = [1, 1]} : vector<8x96xf32> to vector<8x32xf32>
    %53 = arith.truncf %50 : vector<8x32xf32> to vector<8x32xbf16>
    %54 = arith.truncf %51 : vector<8x32xf32> to vector<8x32xbf16>
    %55 = arith.truncf %52 : vector<8x32xf32> to vector<8x32xbf16>
    %c0_35 = arith.constant 0 : index
    %c0_36 = arith.constant 0 : index
    %c0_37 = arith.constant 0 : index
    %c0_38 = arith.constant 0 : index
    %56 = vector.load %arg8[%c0_35, %c0_36, %c0_37, %c0_38] : memref<6x4x8x32xbf16, #tpu.memory_space<vmem>>, vector<1x4x8x32xbf16>
    %57 = vector.shape_cast %56 : vector<1x4x8x32xbf16> to vector<4x8x32xbf16>
    %c0_39 = arith.constant 0 : index
    %c0_40 = arith.constant 0 : index
    %c0_41 = arith.constant 0 : index
    %58 = vector.load %arg9[%c0_39, %c0_40, %c0_41] : memref<6x1x32xf32, #tpu.memory_space<vmem>>, vector<1x1x32xf32>
    %59 = vector.shape_cast %58 : vector<1x1x32xf32> to vector<1x32xf32>
    %60 = vector.extract_strided_slice %53 {offsets = [0, 0], sizes = [8, 8], strides = [1, 1]} : vector<8x32xbf16> to vector<8x8xbf16>
    %61 = vector.extract_strided_slice %53 {offsets = [0, 8], sizes = [8, 8], strides = [1, 1]} : vector<8x32xbf16> to vector<8x8xbf16>
    %62 = vector.extract_strided_slice %53 {offsets = [0, 16], sizes = [8, 8], strides = [1, 1]} : vector<8x32xbf16> to vector<8x8xbf16>
    %63 = vector.extract_strided_slice %53 {offsets = [0, 24], sizes = [8, 8], strides = [1, 1]} : vector<8x32xbf16> to vector<8x8xbf16>
    %64 = vector.shape_cast %60 : vector<8x8xbf16> to vector<1x8x8xbf16>
    %65 = vector.shape_cast %61 : vector<8x8xbf16> to vector<1x8x8xbf16>
    %66 = vector.shape_cast %62 : vector<8x8xbf16> to vector<1x8x8xbf16>
    %67 = vector.shape_cast %63 : vector<8x8xbf16> to vector<1x8x8xbf16>
    %68 = tpu.concatenate %64, %65, %66, %67 in 0 : vector<1x8x8xbf16>, vector<1x8x8xbf16>, vector<1x8x8xbf16>, vector<1x8x8xbf16> -> vector<4x8x8xbf16>
    %69 = vector.extract_strided_slice %54 {offsets = [0, 0], sizes = [8, 8], strides = [1, 1]} : vector<8x32xbf16> to vector<8x8xbf16>
    %70 = vector.extract_strided_slice %54 {offsets = [0, 8], sizes = [8, 8], strides = [1, 1]} : vector<8x32xbf16> to vector<8x8xbf16>
    %71 = vector.extract_strided_slice %54 {offsets = [0, 16], sizes = [8, 8], strides = [1, 1]} : vector<8x32xbf16> to vector<8x8xbf16>
    %72 = vector.extract_strided_slice %54 {offsets = [0, 24], sizes = [8, 8], strides = [1, 1]} : vector<8x32xbf16> to vector<8x8xbf16>
    %73 = vector.shape_cast %69 : vector<8x8xbf16> to vector<1x8x8xbf16>
    %74 = vector.shape_cast %70 : vector<8x8xbf16> to vector<1x8x8xbf16>
    %75 = vector.shape_cast %71 : vector<8x8xbf16> to vector<1x8x8xbf16>
    %76 = vector.shape_cast %72 : vector<8x8xbf16> to vector<1x8x8xbf16>
    %77 = tpu.concatenate %73, %74, %75, %76 in 0 : vector<1x8x8xbf16>, vector<1x8x8xbf16>, vector<1x8x8xbf16>, vector<1x8x8xbf16> -> vector<4x8x8xbf16>
    %78 = vector.extract_strided_slice %55 {offsets = [0, 0], sizes = [8, 8], strides = [1, 1]} : vector<8x32xbf16> to vector<8x8xbf16>
    %79 = vector.extract_strided_slice %55 {offsets = [0, 8], sizes = [8, 8], strides = [1, 1]} : vector<8x32xbf16> to vector<8x8xbf16>
    %80 = vector.extract_strided_slice %55 {offsets = [0, 16], sizes = [8, 8], strides = [1, 1]} : vector<8x32xbf16> to vector<8x8xbf16>
    %81 = vector.extract_strided_slice %55 {offsets = [0, 24], sizes = [8, 8], strides = [1, 1]} : vector<8x32xbf16> to vector<8x8xbf16>
    %82 = vector.shape_cast %78 : vector<8x8xbf16> to vector<1x8x8xbf16>
    %83 = vector.shape_cast %79 : vector<8x8xbf16> to vector<1x8x8xbf16>
    %84 = vector.shape_cast %80 : vector<8x8xbf16> to vector<1x8x8xbf16>
    %85 = vector.shape_cast %81 : vector<8x8xbf16> to vector<1x8x8xbf16>
    %86 = tpu.concatenate %82, %83, %84, %85 in 0 : vector<1x8x8xbf16>, vector<1x8x8xbf16>, vector<1x8x8xbf16>, vector<1x8x8xbf16> -> vector<4x8x8xbf16>
    "tpu.trace_start"() <{level = 10 : i32, message = "hqd,hkd->hqk"}> : () -> ()
    %cst_42 = arith.constant dense<0.000000e+00> : vector<4x8x8xf32>
    %87 = tpu.matmul %68, %77, %cst_42 {dimension_numbers = #tpu.dot_dimension_numbers<[2], [2], [1], [1], [0, 0, 0, 1, 1, 1], [0], [0]>} : vector<4x8x8xbf16>, vector<4x8x8xbf16>, vector<4x8x8xf32> -> vector<4x8x8xf32>
    "tpu.trace_stop"() : () -> ()
    %88 = vector.shape_cast %4 : vector<1x8x8xf32> to vector<8x8xf32>
    %89 = vector.shape_cast %88 : vector<8x8xf32> to vector<1x8x8xf32>
    %90 = vector.broadcast %89 : vector<1x8x8xf32> to vector<4x8x8xf32>
    %91 = arith.addf %87, %90 : vector<4x8x8xf32>
    %cst_43 = arith.constant dense<0xFF800000> : vector<4x8xf32>
    %92 = vector.multi_reduction <maximumf>, %91, %cst_43 [2] : vector<4x8x8xf32> to vector<4x8xf32>
    %93 = vector.shape_cast %92 : vector<4x8xf32> to vector<4x8x1xf32>
    %94 = vector.broadcast %93 : vector<4x8x1xf32> to vector<4x8x8xf32>
    %95 = arith.subf %91, %94 : vector<4x8x8xf32>
    %96 = math.exp %95 : vector<4x8x8xf32>
    %cst_44 = arith.constant dense<0.000000e+00> : vector<4x8xf32>
    %97 = vector.multi_reduction <add>, %96, %cst_44 [2] : vector<4x8x8xf32> to vector<4x8xf32>
    %98 = vector.shape_cast %97 : vector<4x8xf32> to vector<4x8x1xf32>
    %99 = tpu.reciprocal %98 {approx = true} : vector<4x8x1xf32> -> vector<4x8x1xf32>
    %100 = vector.broadcast %99 : vector<4x8x1xf32> to vector<4x8x8xf32>
    %101 = arith.mulf %96, %100 : vector<4x8x8xf32>
    %102 = arith.truncf %101 : vector<4x8x8xf32> to vector<4x8x8xbf16>
    "tpu.trace_start"() <{level = 10 : i32, message = "hqk,hkd->hqd"}> : () -> ()
    %cst_45 = arith.constant dense<0.000000e+00> : vector<4x8x8xf32>
    %103 = tpu.matmul %102, %86, %cst_45 {dimension_numbers = #tpu.dot_dimension_numbers<[2], [1], [1], [2], [0, 0, 0, 1, 1, 2], [0], [0]>} : vector<4x8x8xbf16>, vector<4x8x8xbf16>, vector<4x8x8xf32> -> vector<4x8x8xf32>
    "tpu.trace_stop"() : () -> ()
    %104 = arith.truncf %103 : vector<4x8x8xf32> to vector<4x8x8xbf16>
    "tpu.trace_start"() <{level = 10 : i32, message = "hqd,hdm->hqm"}> : () -> ()
    %cst_46 = arith.constant dense<0.000000e+00> : vector<4x8x32xf32>
    %105 = tpu.matmul %104, %57, %cst_46 {dimension_numbers = #tpu.dot_dimension_numbers<[2], [1], [1], [2], [0, 0, 0, 1, 1, 2], [0], [0]>} : vector<4x8x8xbf16>, vector<4x8x32xbf16>, vector<4x8x32xf32> -> vector<4x8x32xf32>
    "tpu.trace_stop"() : () -> ()
    %cst_47 = arith.constant dense<0.000000e+00> : vector<8x32xf32>
    %106 = vector.multi_reduction <add>, %105, %cst_47 [0] : vector<4x8x32xf32> to vector<8x32xf32>
    %107 = vector.broadcast %59 : vector<1x32xf32> to vector<8x32xf32>
    %108 = arith.addf %106, %107 : vector<8x32xf32>
    %109 = arith.addf %11, %108 : vector<8x32xf32>
    %c1 = arith.constant 1 : index
    %c0_48 = arith.constant 0 : index
    %c0_49 = arith.constant 0 : index
    %110 = vector.load %arg14[%c1, %c0_48, %c0_49] : memref<8x1x32xf32, #tpu.memory_space<vmem>>, vector<1x1x32xf32>
    %111 = vector.shape_cast %110 : vector<1x1x32xf32> to vector<1x32xf32>
    %c1_50 = arith.constant 1 : index
    %c0_51 = arith.constant 0 : index
    %c0_52 = arith.constant 0 : index
    %112 = vector.load %arg15[%c1_50, %c0_51, %c0_52] : memref<8x1x32xf32, #tpu.memory_space<vmem>>, vector<1x1x32xf32>
    %113 = vector.shape_cast %112 : vector<1x1x32xf32> to vector<1x32xf32>
    %cst_53 = arith.constant dense<0.000000e+00> : vector<8xf32>
    %114 = vector.multi_reduction <add>, %109, %cst_53 [1] : vector<8x32xf32> to vector<8xf32>
    %115 = vector.shape_cast %114 : vector<8xf32> to vector<8x1xf32>
    %cst_54 = arith.constant 3.200000e+01 : f32
    %116 = vector.broadcast %cst_54 : f32 to vector<8x1xf32>
    %117 = arith.divf %115, %116 : vector<8x1xf32>
    %118 = vector.broadcast %117 : vector<8x1xf32> to vector<8x32xf32>
    %119 = arith.subf %109, %118 : vector<8x32xf32>
    %120 = arith.mulf %119, %119 : vector<8x32xf32>
    %cst_55 = arith.constant dense<0.000000e+00> : vector<8xf32>
    %121 = vector.multi_reduction <add>, %120, %cst_55 [1] : vector<8x32xf32> to vector<8xf32>
    %122 = vector.shape_cast %121 : vector<8xf32> to vector<8x1xf32>
    %cst_56 = arith.constant 3.100000e+01 : f32
    %123 = vector.broadcast %cst_56 : f32 to vector<8x1xf32>
    %124 = arith.divf %122, %123 : vector<8x1xf32>
    %125 = math.sqrt %124 : vector<8x1xf32>
    %126 = vector.broadcast %117 : vector<8x1xf32> to vector<8x32xf32>
    %127 = arith.subf %109, %126 : vector<8x32xf32>
    %128 = vector.broadcast %111 : vector<1x32xf32> to vector<8x32xf32>
    %129 = arith.mulf %128, %127 : vector<8x32xf32>
    %cst_57 = arith.constant 9.99999997E-7 : f32
    %130 = vector.broadcast %cst_57 : f32 to vector<8x1xf32>
    %131 = arith.addf %125, %130 : vector<8x1xf32>
    %132 = vector.broadcast %131 : vector<8x1xf32> to vector<8x32xf32>
    %133 = arith.divf %129, %132 : vector<8x32xf32>
    %134 = vector.broadcast %113 : vector<1x32xf32> to vector<8x32xf32>
    %135 = arith.addf %133, %134 : vector<8x32xf32>
    %c1_58 = arith.constant 1 : index
    %c0_59 = arith.constant 0 : index
    %c0_60 = arith.constant 0 : index
    %136 = vector.load %arg6[%c1_58, %c0_59, %c0_60] : memref<6x32x96xbf16, #tpu.memory_space<vmem>>, vector<1x32x96xbf16>
    %137 = vector.shape_cast %136 : vector<1x32x96xbf16> to vector<32x96xbf16>
    %c1_61 = arith.constant 1 : index
    %c0_62 = arith.constant 0 : index
    %c0_63 = arith.constant 0 : index
    %138 = vector.load %arg7[%c1_61, %c0_62, %c0_63] : memref<6x1x96xf32, #tpu.memory_space<vmem>>, vector<1x1x96xf32>
    %139 = vector.shape_cast %138 : vector<1x1x96xf32> to vector<1x96xf32>
    %140 = arith.truncf %135 : vector<8x32xf32> to vector<8x32xbf16>
    %141 = vector.extract_strided_slice %137 {offsets = [0, 0], sizes = [32, 32], strides = [1, 1]} : vector<32x96xbf16> to vector<32x32xbf16>
    %cst_64 = arith.constant dense<0.000000e+00> : vector<8x32xf32>
    %142 = tpu.matmul %140, %141, %cst_64 {dimension_numbers = #tpu.dot_dimension_numbers<[1], [0], [0], [1], [0, 0, 1, 1], [], []>} : vector<8x32xbf16>, vector<32x32xbf16>, vector<8x32xf32> -> vector<8x32xf32>
    %143 = vector.extract_strided_slice %139 {offsets = [0, 0], sizes = [1, 32], strides = [1, 1]} : vector<1x96xf32> to vector<1x32xf32>
    %144 = vector.broadcast %143 : vector<1x32xf32> to vector<8x32xf32>
    %145 = arith.addf %142, %144 : vector<8x32xf32>
    %146 = arith.truncf %13 : vector<8x32xf32> to vector<8x32xbf16>
    %147 = vector.extract_strided_slice %137 {offsets = [0, 32], sizes = [32, 64], strides = [1, 1]} : vector<32x96xbf16> to vector<32x64xbf16>
    %cst_65 = arith.constant dense<0.000000e+00> : vector<8x64xf32>
    %148 = tpu.matmul %146, %147, %cst_65 {dimension_numbers = #tpu.dot_dimension_numbers<[1], [0], [0], [1], [0, 0, 1, 1], [], []>} : vector<8x32xbf16>, vector<32x64xbf16>, vector<8x64xf32> -> vector<8x64xf32>
    %149 = vector.extract_strided_slice %139 {offsets = [0, 32], sizes = [1, 64], strides = [1, 1]} : vector<1x96xf32> to vector<1x64xf32>
    %150 = vector.broadcast %149 : vector<1x64xf32> to vector<8x64xf32>
    %151 = arith.addf %148, %150 : vector<8x64xf32>
    %152 = vector.extract_strided_slice %151 {offsets = [0, 0], sizes = [8, 32], strides = [1, 1]} : vector<8x64xf32> to vector<8x32xf32>
    %153 = vector.extract_strided_slice %151 {offsets = [0, 32], sizes = [8, 32], strides = [1, 1]} : vector<8x64xf32> to vector<8x32xf32>
    %154 = arith.truncf %145 : vector<8x32xf32> to vector<8x32xbf16>
    %155 = arith.truncf %152 : vector<8x32xf32> to vector<8x32xbf16>
    %156 = arith.truncf %153 : vector<8x32xf32> to vector<8x32xbf16>
    %c1_66 = arith.constant 1 : index
    %c0_67 = arith.constant 0 : index
    %c0_68 = arith.constant 0 : index
    %c0_69 = arith.constant 0 : index
    %157 = vector.load %arg8[%c1_66, %c0_67, %c0_68, %c0_69] : memref<6x4x8x32xbf16, #tpu.memory_space<vmem>>, vector<1x4x8x32xbf16>
    %158 = vector.shape_cast %157 : vector<1x4x8x32xbf16> to vector<4x8x32xbf16>
    %c1_70 = arith.constant 1 : index
    %c0_71 = arith.constant 0 : index
    %c0_72 = arith.constant 0 : index
    %159 = vector.load %arg9[%c1_70, %c0_71, %c0_72] : memref<6x1x32xf32, #tpu.memory_space<vmem>>, vector<1x1x32xf32>
    %160 = vector.shape_cast %159 : vector<1x1x32xf32> to vector<1x32xf32>
    %161 = vector.extract_strided_slice %154 {offsets = [0, 0], sizes = [8, 8], strides = [1, 1]} : vector<8x32xbf16> to vector<8x8xbf16>
    %162 = vector.extract_strided_slice %154 {offsets = [0, 8], sizes = [8, 8], strides = [1, 1]} : vector<8x32xbf16> to vector<8x8xbf16>
    %163 = vector.extract_strided_slice %154 {offsets = [0, 16], sizes = [8, 8], strides = [1, 1]} : vector<8x32xbf16> to vector<8x8xbf16>
    %164 = vector.extract_strided_slice %154 {offsets = [0, 24], sizes = [8, 8], strides = [1, 1]} : vector<8x32xbf16> to vector<8x8xbf16>
    %165 = vector.shape_cast %161 : vector<8x8xbf16> to vector<1x8x8xbf16>
    %166 = vector.shape_cast %162 : vector<8x8xbf16> to vector<1x8x8xbf16>
    %167 = vector.shape_cast %163 : vector<8x8xbf16> to vector<1x8x8xbf16>
    %168 = vector.shape_cast %164 : vector<8x8xbf16> to vector<1x8x8xbf16>
    %169 = tpu.concatenate %165, %166, %167, %168 in 0 : vector<1x8x8xbf16>, vector<1x8x8xbf16>, vector<1x8x8xbf16>, vector<1x8x8xbf16> -> vector<4x8x8xbf16>
    %170 = vector.extract_strided_slice %155 {offsets = [0, 0], sizes = [8, 8], strides = [1, 1]} : vector<8x32xbf16> to vector<8x8xbf16>
    %171 = vector.extract_strided_slice %155 {offsets = [0, 8], sizes = [8, 8], strides = [1, 1]} : vector<8x32xbf16> to vector<8x8xbf16>
    %172 = vector.extract_strided_slice %155 {offsets = [0, 16], sizes = [8, 8], strides = [1, 1]} : vector<8x32xbf16> to vector<8x8xbf16>
    %173 = vector.extract_strided_slice %155 {offsets = [0, 24], sizes = [8, 8], strides = [1, 1]} : vector<8x32xbf16> to vector<8x8xbf16>
    %174 = vector.shape_cast %170 : vector<8x8xbf16> to vector<1x8x8xbf16>
    %175 = vector.shape_cast %171 : vector<8x8xbf16> to vector<1x8x8xbf16>
    %176 = vector.shape_cast %172 : vector<8x8xbf16> to vector<1x8x8xbf16>
    %177 = vector.shape_cast %173 : vector<8x8xbf16> to vector<1x8x8xbf16>
    %178 = tpu.concatenate %174, %175, %176, %177 in 0 : vector<1x8x8xbf16>, vector<1x8x8xbf16>, vector<1x8x8xbf16>, vector<1x8x8xbf16> -> vector<4x8x8xbf16>
    %179 = vector.extract_strided_slice %156 {offsets = [0, 0], sizes = [8, 8], strides = [1, 1]} : vector<8x32xbf16> to vector<8x8xbf16>
    %180 = vector.extract_strided_slice %156 {offsets = [0, 8], sizes = [8, 8], strides = [1, 1]} : vector<8x32xbf16> to vector<8x8xbf16>
    %181 = vector.extract_strided_slice %156 {offsets = [0, 16], sizes = [8, 8], strides = [1, 1]} : vector<8x32xbf16> to vector<8x8xbf16>
    %182 = vector.extract_strided_slice %156 {offsets = [0, 24], sizes = [8, 8], strides = [1, 1]} : vector<8x32xbf16> to vector<8x8xbf16>
    %183 = vector.shape_cast %179 : vector<8x8xbf16> to vector<1x8x8xbf16>
    %184 = vector.shape_cast %180 : vector<8x8xbf16> to vector<1x8x8xbf16>
    %185 = vector.shape_cast %181 : vector<8x8xbf16> to vector<1x8x8xbf16>
    %186 = vector.shape_cast %182 : vector<8x8xbf16> to vector<1x8x8xbf16>
    %187 = tpu.concatenate %183, %184, %185, %186 in 0 : vector<1x8x8xbf16>, vector<1x8x8xbf16>, vector<1x8x8xbf16>, vector<1x8x8xbf16> -> vector<4x8x8xbf16>
    "tpu.trace_start"() <{level = 10 : i32, message = "hqd,hkd->hqk"}> : () -> ()
    %cst_73 = arith.constant dense<0.000000e+00> : vector<4x8x8xf32>
    %188 = tpu.matmul %169, %178, %cst_73 {dimension_numbers = #tpu.dot_dimension_numbers<[2], [2], [1], [1], [0, 0, 0, 1, 1, 1], [0], [0]>} : vector<4x8x8xbf16>, vector<4x8x8xbf16>, vector<4x8x8xf32> -> vector<4x8x8xf32>
    "tpu.trace_stop"() : () -> ()
    %189 = vector.shape_cast %9 : vector<1x1x8xf32> to vector<1x8xf32>
    %190 = vector.shape_cast %189 : vector<1x8xf32> to vector<1x1x8xf32>
    %191 = vector.broadcast %190 : vector<1x1x8xf32> to vector<4x8x8xf32>
    %192 = arith.addf %188, %191 : vector<4x8x8xf32>
    %cst_74 = arith.constant dense<0xFF800000> : vector<4x8xf32>
    %193 = vector.multi_reduction <maximumf>, %192, %cst_74 [2] : vector<4x8x8xf32> to vector<4x8xf32>
    %194 = vector.shape_cast %193 : vector<4x8xf32> to vector<4x8x1xf32>
    %195 = vector.broadcast %194 : vector<4x8x1xf32> to vector<4x8x8xf32>
    %196 = arith.subf %192, %195 : vector<4x8x8xf32>
    %197 = math.exp %196 : vector<4x8x8xf32>
    %cst_75 = arith.constant dense<0.000000e+00> : vector<4x8xf32>
    %198 = vector.multi_reduction <add>, %197, %cst_75 [2] : vector<4x8x8xf32> to vector<4x8xf32>
    %199 = vector.shape_cast %198 : vector<4x8xf32> to vector<4x8x1xf32>
    %200 = tpu.reciprocal %199 {approx = true} : vector<4x8x1xf32> -> vector<4x8x1xf32>
    %201 = vector.broadcast %200 : vector<4x8x1xf32> to vector<4x8x8xf32>
    %202 = arith.mulf %197, %201 : vector<4x8x8xf32>
    %203 = arith.truncf %202 : vector<4x8x8xf32> to vector<4x8x8xbf16>
    "tpu.trace_start"() <{level = 10 : i32, message = "hqk,hkd->hqd"}> : () -> ()
    %cst_76 = arith.constant dense<0.000000e+00> : vector<4x8x8xf32>
    %204 = tpu.matmul %203, %187, %cst_76 {dimension_numbers = #tpu.dot_dimension_numbers<[2], [1], [1], [2], [0, 0, 0, 1, 1, 2], [0], [0]>} : vector<4x8x8xbf16>, vector<4x8x8xbf16>, vector<4x8x8xf32> -> vector<4x8x8xf32>
    "tpu.trace_stop"() : () -> ()
    %205 = arith.truncf %204 : vector<4x8x8xf32> to vector<4x8x8xbf16>
    "tpu.trace_start"() <{level = 10 : i32, message = "hqd,hdm->hqm"}> : () -> ()
    %cst_77 = arith.constant dense<0.000000e+00> : vector<4x8x32xf32>
    %206 = tpu.matmul %205, %158, %cst_77 {dimension_numbers = #tpu.dot_dimension_numbers<[2], [1], [1], [2], [0, 0, 0, 1, 1, 2], [0], [0]>} : vector<4x8x8xbf16>, vector<4x8x32xbf16>, vector<4x8x32xf32> -> vector<4x8x32xf32>
    "tpu.trace_stop"() : () -> ()
    %cst_78 = arith.constant dense<0.000000e+00> : vector<8x32xf32>
    %207 = vector.multi_reduction <add>, %206, %cst_78 [0] : vector<4x8x32xf32> to vector<8x32xf32>
    %208 = vector.broadcast %160 : vector<1x32xf32> to vector<8x32xf32>
    %209 = arith.addf %207, %208 : vector<8x32xf32>
    %210 = arith.addf %109, %209 : vector<8x32xf32>
    %c2 = arith.constant 2 : index
    %c0_79 = arith.constant 0 : index
    %c0_80 = arith.constant 0 : index
    %211 = vector.load %arg14[%c2, %c0_79, %c0_80] : memref<8x1x32xf32, #tpu.memory_space<vmem>>, vector<1x1x32xf32>
    %212 = vector.shape_cast %211 : vector<1x1x32xf32> to vector<1x32xf32>
    %c2_81 = arith.constant 2 : index
    %c0_82 = arith.constant 0 : index
    %c0_83 = arith.constant 0 : index
    %213 = vector.load %arg15[%c2_81, %c0_82, %c0_83] : memref<8x1x32xf32, #tpu.memory_space<vmem>>, vector<1x1x32xf32>
    %214 = vector.shape_cast %213 : vector<1x1x32xf32> to vector<1x32xf32>
    %cst_84 = arith.constant dense<0.000000e+00> : vector<8xf32>
    %215 = vector.multi_reduction <add>, %210, %cst_84 [1] : vector<8x32xf32> to vector<8xf32>
    %216 = vector.shape_cast %215 : vector<8xf32> to vector<8x1xf32>
    %cst_85 = arith.constant 3.200000e+01 : f32
    %217 = vector.broadcast %cst_85 : f32 to vector<8x1xf32>
    %218 = arith.divf %216, %217 : vector<8x1xf32>
    %219 = vector.broadcast %218 : vector<8x1xf32> to vector<8x32xf32>
    %220 = arith.subf %210, %219 : vector<8x32xf32>
    %221 = arith.mulf %220, %220 : vector<8x32xf32>
    %cst_86 = arith.constant dense<0.000000e+00> : vector<8xf32>
    %222 = vector.multi_reduction <add>, %221, %cst_86 [1] : vector<8x32xf32> to vector<8xf32>
    %223 = vector.shape_cast %222 : vector<8xf32> to vector<8x1xf32>
    %cst_87 = arith.constant 3.100000e+01 : f32
    %224 = vector.broadcast %cst_87 : f32 to vector<8x1xf32>
    %225 = arith.divf %223, %224 : vector<8x1xf32>
    %226 = math.sqrt %225 : vector<8x1xf32>
    %227 = vector.broadcast %218 : vector<8x1xf32> to vector<8x32xf32>
    %228 = arith.subf %210, %227 : vector<8x32xf32>
    %229 = vector.broadcast %212 : vector<1x32xf32> to vector<8x32xf32>
    %230 = arith.mulf %229, %228 : vector<8x32xf32>
    %cst_88 = arith.constant 9.99999997E-7 : f32
    %231 = vector.broadcast %cst_88 : f32 to vector<8x1xf32>
    %232 = arith.addf %226, %231 : vector<8x1xf32>
    %233 = vector.broadcast %232 : vector<8x1xf32> to vector<8x32xf32>
    %234 = arith.divf %230, %233 : vector<8x32xf32>
    %235 = vector.broadcast %214 : vector<1x32xf32> to vector<8x32xf32>
    %236 = arith.addf %234, %235 : vector<8x32xf32>
    %c2_89 = arith.constant 2 : index
    %c0_90 = arith.constant 0 : index
    %c0_91 = arith.constant 0 : index
    %237 = vector.load %arg6[%c2_89, %c0_90, %c0_91] : memref<6x32x96xbf16, #tpu.memory_space<vmem>>, vector<1x32x96xbf16>
    %238 = vector.shape_cast %237 : vector<1x32x96xbf16> to vector<32x96xbf16>
    %c2_92 = arith.constant 2 : index
    %c0_93 = arith.constant 0 : index
    %c0_94 = arith.constant 0 : index
    %239 = vector.load %arg7[%c2_92, %c0_93, %c0_94] : memref<6x1x96xf32, #tpu.memory_space<vmem>>, vector<1x1x96xf32>
    %240 = vector.shape_cast %239 : vector<1x1x96xf32> to vector<1x96xf32>
    %241 = arith.truncf %236 : vector<8x32xf32> to vector<8x32xbf16>
    %242 = vector.extract_strided_slice %238 {offsets = [0, 0], sizes = [32, 32], strides = [1, 1]} : vector<32x96xbf16> to vector<32x32xbf16>
    %cst_95 = arith.constant dense<0.000000e+00> : vector<8x32xf32>
    %243 = tpu.matmul %241, %242, %cst_95 {dimension_numbers = #tpu.dot_dimension_numbers<[1], [0], [0], [1], [0, 0, 1, 1], [], []>} : vector<8x32xbf16>, vector<32x32xbf16>, vector<8x32xf32> -> vector<8x32xf32>
    %244 = vector.extract_strided_slice %240 {offsets = [0, 0], sizes = [1, 32], strides = [1, 1]} : vector<1x96xf32> to vector<1x32xf32>
    %245 = vector.broadcast %244 : vector<1x32xf32> to vector<8x32xf32>
    %246 = arith.addf %243, %245 : vector<8x32xf32>
    %247 = arith.truncf %15 : vector<4x32xf32> to vector<4x32xbf16>
    %248 = vector.extract_strided_slice %238 {offsets = [0, 32], sizes = [32, 64], strides = [1, 1]} : vector<32x96xbf16> to vector<32x64xbf16>
    %cst_96 = arith.constant dense<0.000000e+00> : vector<4x64xf32>
    %249 = tpu.matmul %247, %248, %cst_96 {dimension_numbers = #tpu.dot_dimension_numbers<[1], [0], [0], [1], [0, 0, 1, 1], [], []>} : vector<4x32xbf16>, vector<32x64xbf16>, vector<4x64xf32> -> vector<4x64xf32>
    %250 = vector.extract_strided_slice %240 {offsets = [0, 32], sizes = [1, 64], strides = [1, 1]} : vector<1x96xf32> to vector<1x64xf32>
    %251 = vector.broadcast %250 : vector<1x64xf32> to vector<4x64xf32>
    %252 = arith.addf %249, %251 : vector<4x64xf32>
    %253 = vector.extract_strided_slice %252 {offsets = [0, 0], sizes = [4, 32], strides = [1, 1]} : vector<4x64xf32> to vector<4x32xf32>
    %254 = vector.extract_strided_slice %252 {offsets = [0, 32], sizes = [4, 32], strides = [1, 1]} : vector<4x64xf32> to vector<4x32xf32>
    %255 = arith.truncf %246 : vector<8x32xf32> to vector<8x32xbf16>
    %256 = arith.truncf %253 : vector<4x32xf32> to vector<4x32xbf16>
    %257 = arith.truncf %254 : vector<4x32xf32> to vector<4x32xbf16>
    %c2_97 = arith.constant 2 : index
    %c0_98 = arith.constant 0 : index
    %c0_99 = arith.constant 0 : index
    %c0_100 = arith.constant 0 : index
    %258 = vector.load %arg8[%c2_97, %c0_98, %c0_99, %c0_100] : memref<6x4x8x32xbf16, #tpu.memory_space<vmem>>, vector<1x4x8x32xbf16>
    %259 = vector.shape_cast %258 : vector<1x4x8x32xbf16> to vector<4x8x32xbf16>
    %c2_101 = arith.constant 2 : index
    %c0_102 = arith.constant 0 : index
    %c0_103 = arith.constant 0 : index
    %260 = vector.load %arg9[%c2_101, %c0_102, %c0_103] : memref<6x1x32xf32, #tpu.memory_space<vmem>>, vector<1x1x32xf32>
    %261 = vector.shape_cast %260 : vector<1x1x32xf32> to vector<1x32xf32>
    %262 = vector.extract_strided_slice %255 {offsets = [0, 0], sizes = [8, 8], strides = [1, 1]} : vector<8x32xbf16> to vector<8x8xbf16>
    %263 = vector.extract_strided_slice %255 {offsets = [0, 8], sizes = [8, 8], strides = [1, 1]} : vector<8x32xbf16> to vector<8x8xbf16>
    %264 = vector.extract_strided_slice %255 {offsets = [0, 16], sizes = [8, 8], strides = [1, 1]} : vector<8x32xbf16> to vector<8x8xbf16>
    %265 = vector.extract_strided_slice %255 {offsets = [0, 24], sizes = [8, 8], strides = [1, 1]} : vector<8x32xbf16> to vector<8x8xbf16>
    %266 = vector.shape_cast %262 : vector<8x8xbf16> to vector<1x8x8xbf16>
    %267 = vector.shape_cast %263 : vector<8x8xbf16> to vector<1x8x8xbf16>
    %268 = vector.shape_cast %264 : vector<8x8xbf16> to vector<1x8x8xbf16>
    %269 = vector.shape_cast %265 : vector<8x8xbf16> to vector<1x8x8xbf16>
    %270 = tpu.concatenate %266, %267, %268, %269 in 0 : vector<1x8x8xbf16>, vector<1x8x8xbf16>, vector<1x8x8xbf16>, vector<1x8x8xbf16> -> vector<4x8x8xbf16>
    %271 = vector.extract_strided_slice %256 {offsets = [0, 0], sizes = [4, 8], strides = [1, 1]} : vector<4x32xbf16> to vector<4x8xbf16>
    %272 = vector.extract_strided_slice %256 {offsets = [0, 8], sizes = [4, 8], strides = [1, 1]} : vector<4x32xbf16> to vector<4x8xbf16>
    %273 = vector.extract_strided_slice %256 {offsets = [0, 16], sizes = [4, 8], strides = [1, 1]} : vector<4x32xbf16> to vector<4x8xbf16>
    %274 = vector.extract_strided_slice %256 {offsets = [0, 24], sizes = [4, 8], strides = [1, 1]} : vector<4x32xbf16> to vector<4x8xbf16>
    %275 = vector.shape_cast %271 : vector<4x8xbf16> to vector<1x4x8xbf16>
    %276 = vector.shape_cast %272 : vector<4x8xbf16> to vector<1x4x8xbf16>
    %277 = vector.shape_cast %273 : vector<4x8xbf16> to vector<1x4x8xbf16>
    %278 = vector.shape_cast %274 : vector<4x8xbf16> to vector<1x4x8xbf16>
    %279 = tpu.concatenate %275, %276, %277, %278 in 0 : vector<1x4x8xbf16>, vector<1x4x8xbf16>, vector<1x4x8xbf16>, vector<1x4x8xbf16> -> vector<4x4x8xbf16>
    %280 = vector.extract_strided_slice %257 {offsets = [0, 0], sizes = [4, 8], strides = [1, 1]} : vector<4x32xbf16> to vector<4x8xbf16>
    %281 = vector.extract_strided_slice %257 {offsets = [0, 8], sizes = [4, 8], strides = [1, 1]} : vector<4x32xbf16> to vector<4x8xbf16>
    %282 = vector.extract_strided_slice %257 {offsets = [0, 16], sizes = [4, 8], strides = [1, 1]} : vector<4x32xbf16> to vector<4x8xbf16>
    %283 = vector.extract_strided_slice %257 {offsets = [0, 24], sizes = [4, 8], strides = [1, 1]} : vector<4x32xbf16> to vector<4x8xbf16>
    %284 = vector.shape_cast %280 : vector<4x8xbf16> to vector<1x4x8xbf16>
    %285 = vector.shape_cast %281 : vector<4x8xbf16> to vector<1x4x8xbf16>
    %286 = vector.shape_cast %282 : vector<4x8xbf16> to vector<1x4x8xbf16>
    %287 = vector.shape_cast %283 : vector<4x8xbf16> to vector<1x4x8xbf16>
    %288 = tpu.concatenate %284, %285, %286, %287 in 0 : vector<1x4x8xbf16>, vector<1x4x8xbf16>, vector<1x4x8xbf16>, vector<1x4x8xbf16> -> vector<4x4x8xbf16>
    "tpu.trace_start"() <{level = 10 : i32, message = "hqd,hkd->hqk"}> : () -> ()
    %cst_104 = arith.constant dense<0.000000e+00> : vector<4x8x4xf32>
    %289 = tpu.matmul %270, %279, %cst_104 {dimension_numbers = #tpu.dot_dimension_numbers<[2], [2], [1], [1], [0, 0, 0, 1, 1, 1], [0], [0]>} : vector<4x8x8xbf16>, vector<4x4x8xbf16>, vector<4x8x4xf32> -> vector<4x8x4xf32>
    "tpu.trace_stop"() : () -> ()
    %cst_105 = arith.constant dense<0xFF800000> : vector<4x8xf32>
    %290 = vector.multi_reduction <maximumf>, %289, %cst_105 [2] : vector<4x8x4xf32> to vector<4x8xf32>
    %291 = vector.shape_cast %290 : vector<4x8xf32> to vector<4x8x1xf32>
    %292 = vector.broadcast %291 : vector<4x8x1xf32> to vector<4x8x4xf32>
    %293 = arith.subf %289, %292 : vector<4x8x4xf32>
    %294 = math.exp %293 : vector<4x8x4xf32>
    %cst_106 = arith.constant dense<0.000000e+00> : vector<4x8xf32>
    %295 = vector.multi_reduction <add>, %294, %cst_106 [2] : vector<4x8x4xf32> to vector<4x8xf32>
    %296 = vector.shape_cast %295 : vector<4x8xf32> to vector<4x8x1xf32>
    %297 = tpu.reciprocal %296 {approx = true} : vector<4x8x1xf32> -> vector<4x8x1xf32>
    %298 = vector.broadcast %297 : vector<4x8x1xf32> to vector<4x8x4xf32>
    %299 = arith.mulf %294, %298 : vector<4x8x4xf32>
    %300 = arith.truncf %299 : vector<4x8x4xf32> to vector<4x8x4xbf16>
    "tpu.trace_start"() <{level = 10 : i32, message = "hqk,hkd->hqd"}> : () -> ()
    %cst_107 = arith.constant dense<0.000000e+00> : vector<4x8x8xf32>
    %301 = tpu.matmul %300, %288, %cst_107 {dimension_numbers = #tpu.dot_dimension_numbers<[2], [1], [1], [2], [0, 0, 0, 1, 1, 2], [0], [0]>} : vector<4x8x4xbf16>, vector<4x4x8xbf16>, vector<4x8x8xf32> -> vector<4x8x8xf32>
    "tpu.trace_stop"() : () -> ()
    %302 = arith.truncf %301 : vector<4x8x8xf32> to vector<4x8x8xbf16>
    "tpu.trace_start"() <{level = 10 : i32, message = "hqd,hdm->hqm"}> : () -> ()
    %cst_108 = arith.constant dense<0.000000e+00> : vector<4x8x32xf32>
    %303 = tpu.matmul %302, %259, %cst_108 {dimension_numbers = #tpu.dot_dimension_numbers<[2], [1], [1], [2], [0, 0, 0, 1, 1, 2], [0], [0]>} : vector<4x8x8xbf16>, vector<4x8x32xbf16>, vector<4x8x32xf32> -> vector<4x8x32xf32>
    "tpu.trace_stop"() : () -> ()
    %cst_109 = arith.constant dense<0.000000e+00> : vector<8x32xf32>
    %304 = vector.multi_reduction <add>, %303, %cst_109 [0] : vector<4x8x32xf32> to vector<8x32xf32>
    %305 = vector.broadcast %261 : vector<1x32xf32> to vector<8x32xf32>
    %306 = arith.addf %304, %305 : vector<8x32xf32>
    %307 = arith.addf %210, %306 : vector<8x32xf32>
    %c3 = arith.constant 3 : index
    %c0_110 = arith.constant 0 : index
    %c0_111 = arith.constant 0 : index
    %308 = vector.load %arg14[%c3, %c0_110, %c0_111] : memref<8x1x32xf32, #tpu.memory_space<vmem>>, vector<1x1x32xf32>
    %309 = vector.shape_cast %308 : vector<1x1x32xf32> to vector<1x32xf32>
    %c3_112 = arith.constant 3 : index
    %c0_113 = arith.constant 0 : index
    %c0_114 = arith.constant 0 : index
    %310 = vector.load %arg15[%c3_112, %c0_113, %c0_114] : memref<8x1x32xf32, #tpu.memory_space<vmem>>, vector<1x1x32xf32>
    %311 = vector.shape_cast %310 : vector<1x1x32xf32> to vector<1x32xf32>
    %cst_115 = arith.constant dense<0.000000e+00> : vector<8xf32>
    %312 = vector.multi_reduction <add>, %307, %cst_115 [1] : vector<8x32xf32> to vector<8xf32>
    %313 = vector.shape_cast %312 : vector<8xf32> to vector<8x1xf32>
    %cst_116 = arith.constant 3.200000e+01 : f32
    %314 = vector.broadcast %cst_116 : f32 to vector<8x1xf32>
    %315 = arith.divf %313, %314 : vector<8x1xf32>
    %316 = vector.broadcast %315 : vector<8x1xf32> to vector<8x32xf32>
    %317 = arith.subf %307, %316 : vector<8x32xf32>
    %318 = arith.mulf %317, %317 : vector<8x32xf32>
    %cst_117 = arith.constant dense<0.000000e+00> : vector<8xf32>
    %319 = vector.multi_reduction <add>, %318, %cst_117 [1] : vector<8x32xf32> to vector<8xf32>
    %320 = vector.shape_cast %319 : vector<8xf32> to vector<8x1xf32>
    %cst_118 = arith.constant 3.100000e+01 : f32
    %321 = vector.broadcast %cst_118 : f32 to vector<8x1xf32>
    %322 = arith.divf %320, %321 : vector<8x1xf32>
    %323 = math.sqrt %322 : vector<8x1xf32>
    %324 = vector.broadcast %315 : vector<8x1xf32> to vector<8x32xf32>
    %325 = arith.subf %307, %324 : vector<8x32xf32>
    %326 = vector.broadcast %309 : vector<1x32xf32> to vector<8x32xf32>
    %327 = arith.mulf %326, %325 : vector<8x32xf32>
    %cst_119 = arith.constant 9.99999997E-7 : f32
    %328 = vector.broadcast %cst_119 : f32 to vector<8x1xf32>
    %329 = arith.addf %323, %328 : vector<8x1xf32>
    %330 = vector.broadcast %329 : vector<8x1xf32> to vector<8x32xf32>
    %331 = arith.divf %327, %330 : vector<8x32xf32>
    %332 = vector.broadcast %311 : vector<1x32xf32> to vector<8x32xf32>
    %333 = arith.addf %331, %332 : vector<8x32xf32>
    %334 = arith.truncf %333 : vector<8x32xf32> to vector<8x32xbf16>
    %c0_120 = arith.constant 0 : index
    %c0_121 = arith.constant 0 : index
    %c0_122 = arith.constant 0 : index
    %335 = vector.load %arg10[%c0_120, %c0_121, %c0_122] : memref<2x32x64xbf16, #tpu.memory_space<vmem>>, vector<1x32x64xbf16>
    %336 = vector.shape_cast %335 : vector<1x32x64xbf16> to vector<32x64xbf16>
    %cst_123 = arith.constant dense<0.000000e+00> : vector<8x64xf32>
    %337 = tpu.matmul %334, %336, %cst_123 {dimension_numbers = #tpu.dot_dimension_numbers<[1], [0], [0], [1], [0, 0, 1, 1], [], []>} : vector<8x32xbf16>, vector<32x64xbf16>, vector<8x64xf32> -> vector<8x64xf32>
    %c0_124 = arith.constant 0 : index
    %c0_125 = arith.constant 0 : index
    %c0_126 = arith.constant 0 : index
    %338 = vector.load %arg11[%c0_124, %c0_125, %c0_126] : memref<2x1x64xf32, #tpu.memory_space<vmem>>, vector<1x1x64xf32>
    %339 = vector.shape_cast %338 : vector<1x1x64xf32> to vector<1x64xf32>
    %340 = vector.broadcast %339 : vector<1x64xf32> to vector<8x64xf32>
    %341 = arith.addf %337, %340 : vector<8x64xf32>
    %cst_127 = arith.constant 0.000000e+00 : f32
    %342 = vector.broadcast %cst_127 : f32 to vector<8x64xf32>
    %343 = arith.maximumf %341, %342 : vector<8x64xf32>
    %344 = arith.truncf %343 : vector<8x64xf32> to vector<8x64xbf16>
    %c0_128 = arith.constant 0 : index
    %c0_129 = arith.constant 0 : index
    %c0_130 = arith.constant 0 : index
    %345 = vector.load %arg12[%c0_128, %c0_129, %c0_130] : memref<2x64x32xbf16, #tpu.memory_space<vmem>>, vector<1x64x32xbf16>
    %346 = vector.shape_cast %345 : vector<1x64x32xbf16> to vector<64x32xbf16>
    %cst_131 = arith.constant dense<0.000000e+00> : vector<8x32xf32>
    %347 = tpu.matmul %344, %346, %cst_131 {dimension_numbers = #tpu.dot_dimension_numbers<[1], [0], [0], [1], [0, 0, 1, 1], [], []>} : vector<8x64xbf16>, vector<64x32xbf16>, vector<8x32xf32> -> vector<8x32xf32>
    %c0_132 = arith.constant 0 : index
    %c0_133 = arith.constant 0 : index
    %c0_134 = arith.constant 0 : index
    %348 = vector.load %arg13[%c0_132, %c0_133, %c0_134] : memref<2x1x32xf32, #tpu.memory_space<vmem>>, vector<1x1x32xf32>
    %349 = vector.shape_cast %348 : vector<1x1x32xf32> to vector<1x32xf32>
    %350 = vector.broadcast %349 : vector<1x32xf32> to vector<8x32xf32>
    %351 = arith.addf %347, %350 : vector<8x32xf32>
    %352 = arith.addf %307, %351 : vector<8x32xf32>
    %c4 = arith.constant 4 : index
    %c0_135 = arith.constant 0 : index
    %c0_136 = arith.constant 0 : index
    %353 = vector.load %arg14[%c4, %c0_135, %c0_136] : memref<8x1x32xf32, #tpu.memory_space<vmem>>, vector<1x1x32xf32>
    %354 = vector.shape_cast %353 : vector<1x1x32xf32> to vector<1x32xf32>
    %c4_137 = arith.constant 4 : index
    %c0_138 = arith.constant 0 : index
    %c0_139 = arith.constant 0 : index
    %355 = vector.load %arg15[%c4_137, %c0_138, %c0_139] : memref<8x1x32xf32, #tpu.memory_space<vmem>>, vector<1x1x32xf32>
    %356 = vector.shape_cast %355 : vector<1x1x32xf32> to vector<1x32xf32>
    %cst_140 = arith.constant dense<0.000000e+00> : vector<8xf32>
    %357 = vector.multi_reduction <add>, %352, %cst_140 [1] : vector<8x32xf32> to vector<8xf32>
    %358 = vector.shape_cast %357 : vector<8xf32> to vector<8x1xf32>
    %cst_141 = arith.constant 3.200000e+01 : f32
    %359 = vector.broadcast %cst_141 : f32 to vector<8x1xf32>
    %360 = arith.divf %358, %359 : vector<8x1xf32>
    %361 = vector.broadcast %360 : vector<8x1xf32> to vector<8x32xf32>
    %362 = arith.subf %352, %361 : vector<8x32xf32>
    %363 = arith.mulf %362, %362 : vector<8x32xf32>
    %cst_142 = arith.constant dense<0.000000e+00> : vector<8xf32>
    %364 = vector.multi_reduction <add>, %363, %cst_142 [1] : vector<8x32xf32> to vector<8xf32>
    %365 = vector.shape_cast %364 : vector<8xf32> to vector<8x1xf32>
    %cst_143 = arith.constant 3.100000e+01 : f32
    %366 = vector.broadcast %cst_143 : f32 to vector<8x1xf32>
    %367 = arith.divf %365, %366 : vector<8x1xf32>
    %368 = math.sqrt %367 : vector<8x1xf32>
    %369 = vector.broadcast %360 : vector<8x1xf32> to vector<8x32xf32>
    %370 = arith.subf %352, %369 : vector<8x32xf32>
    %371 = vector.broadcast %354 : vector<1x32xf32> to vector<8x32xf32>
    %372 = arith.mulf %371, %370 : vector<8x32xf32>
    %cst_144 = arith.constant 9.99999997E-7 : f32
    %373 = vector.broadcast %cst_144 : f32 to vector<8x1xf32>
    %374 = arith.addf %368, %373 : vector<8x1xf32>
    %375 = vector.broadcast %374 : vector<8x1xf32> to vector<8x32xf32>
    %376 = arith.divf %372, %375 : vector<8x32xf32>
    %377 = vector.broadcast %356 : vector<1x32xf32> to vector<8x32xf32>
    %378 = arith.addf %376, %377 : vector<8x32xf32>
    %c3_145 = arith.constant 3 : index
    %c0_146 = arith.constant 0 : index
    %c0_147 = arith.constant 0 : index
    %379 = vector.load %arg6[%c3_145, %c0_146, %c0_147] : memref<6x32x96xbf16, #tpu.memory_space<vmem>>, vector<1x32x96xbf16>
    %380 = vector.shape_cast %379 : vector<1x32x96xbf16> to vector<32x96xbf16>
    %c3_148 = arith.constant 3 : index
    %c0_149 = arith.constant 0 : index
    %c0_150 = arith.constant 0 : index
    %381 = vector.load %arg7[%c3_148, %c0_149, %c0_150] : memref<6x1x96xf32, #tpu.memory_space<vmem>>, vector<1x1x96xf32>
    %382 = vector.shape_cast %381 : vector<1x1x96xf32> to vector<1x96xf32>
    %383 = arith.truncf %378 : vector<8x32xf32> to vector<8x32xbf16>
    %cst_151 = arith.constant dense<0.000000e+00> : vector<8x96xf32>
    %384 = tpu.matmul %383, %380, %cst_151 {dimension_numbers = #tpu.dot_dimension_numbers<[1], [0], [0], [1], [0, 0, 1, 1], [], []>} : vector<8x32xbf16>, vector<32x96xbf16>, vector<8x96xf32> -> vector<8x96xf32>
    %385 = vector.broadcast %382 : vector<1x96xf32> to vector<8x96xf32>
    %386 = arith.addf %384, %385 : vector<8x96xf32>
    %387 = vector.extract_strided_slice %386 {offsets = [0, 0], sizes = [8, 32], strides = [1, 1]} : vector<8x96xf32> to vector<8x32xf32>
    %388 = vector.extract_strided_slice %386 {offsets = [0, 32], sizes = [8, 32], strides = [1, 1]} : vector<8x96xf32> to vector<8x32xf32>
    %389 = vector.extract_strided_slice %386 {offsets = [0, 64], sizes = [8, 32], strides = [1, 1]} : vector<8x96xf32> to vector<8x32xf32>
    %390 = arith.truncf %387 : vector<8x32xf32> to vector<8x32xbf16>
    %391 = arith.truncf %388 : vector<8x32xf32> to vector<8x32xbf16>
    %392 = arith.truncf %389 : vector<8x32xf32> to vector<8x32xbf16>
    %c3_152 = arith.constant 3 : index
    %c0_153 = arith.constant 0 : index
    %c0_154 = arith.constant 0 : index
    %c0_155 = arith.constant 0 : index
    %393 = vector.load %arg8[%c3_152, %c0_153, %c0_154, %c0_155] : memref<6x4x8x32xbf16, #tpu.memory_space<vmem>>, vector<1x4x8x32xbf16>
    %394 = vector.shape_cast %393 : vector<1x4x8x32xbf16> to vector<4x8x32xbf16>
    %c3_156 = arith.constant 3 : index
    %c0_157 = arith.constant 0 : index
    %c0_158 = arith.constant 0 : index
    %395 = vector.load %arg9[%c3_156, %c0_157, %c0_158] : memref<6x1x32xf32, #tpu.memory_space<vmem>>, vector<1x1x32xf32>
    %396 = vector.shape_cast %395 : vector<1x1x32xf32> to vector<1x32xf32>
    %397 = vector.extract_strided_slice %390 {offsets = [0, 0], sizes = [8, 8], strides = [1, 1]} : vector<8x32xbf16> to vector<8x8xbf16>
    %398 = vector.extract_strided_slice %390 {offsets = [0, 8], sizes = [8, 8], strides = [1, 1]} : vector<8x32xbf16> to vector<8x8xbf16>
    %399 = vector.extract_strided_slice %390 {offsets = [0, 16], sizes = [8, 8], strides = [1, 1]} : vector<8x32xbf16> to vector<8x8xbf16>
    %400 = vector.extract_strided_slice %390 {offsets = [0, 24], sizes = [8, 8], strides = [1, 1]} : vector<8x32xbf16> to vector<8x8xbf16>
    %401 = vector.shape_cast %397 : vector<8x8xbf16> to vector<1x8x8xbf16>
    %402 = vector.shape_cast %398 : vector<8x8xbf16> to vector<1x8x8xbf16>
    %403 = vector.shape_cast %399 : vector<8x8xbf16> to vector<1x8x8xbf16>
    %404 = vector.shape_cast %400 : vector<8x8xbf16> to vector<1x8x8xbf16>
    %405 = tpu.concatenate %401, %402, %403, %404 in 0 : vector<1x8x8xbf16>, vector<1x8x8xbf16>, vector<1x8x8xbf16>, vector<1x8x8xbf16> -> vector<4x8x8xbf16>
    %406 = vector.extract_strided_slice %391 {offsets = [0, 0], sizes = [8, 8], strides = [1, 1]} : vector<8x32xbf16> to vector<8x8xbf16>
    %407 = vector.extract_strided_slice %391 {offsets = [0, 8], sizes = [8, 8], strides = [1, 1]} : vector<8x32xbf16> to vector<8x8xbf16>
    %408 = vector.extract_strided_slice %391 {offsets = [0, 16], sizes = [8, 8], strides = [1, 1]} : vector<8x32xbf16> to vector<8x8xbf16>
    %409 = vector.extract_strided_slice %391 {offsets = [0, 24], sizes = [8, 8], strides = [1, 1]} : vector<8x32xbf16> to vector<8x8xbf16>
    %410 = vector.shape_cast %406 : vector<8x8xbf16> to vector<1x8x8xbf16>
    %411 = vector.shape_cast %407 : vector<8x8xbf16> to vector<1x8x8xbf16>
    %412 = vector.shape_cast %408 : vector<8x8xbf16> to vector<1x8x8xbf16>
    %413 = vector.shape_cast %409 : vector<8x8xbf16> to vector<1x8x8xbf16>
    %414 = tpu.concatenate %410, %411, %412, %413 in 0 : vector<1x8x8xbf16>, vector<1x8x8xbf16>, vector<1x8x8xbf16>, vector<1x8x8xbf16> -> vector<4x8x8xbf16>
    %415 = vector.extract_strided_slice %392 {offsets = [0, 0], sizes = [8, 8], strides = [1, 1]} : vector<8x32xbf16> to vector<8x8xbf16>
    %416 = vector.extract_strided_slice %392 {offsets = [0, 8], sizes = [8, 8], strides = [1, 1]} : vector<8x32xbf16> to vector<8x8xbf16>
    %417 = vector.extract_strided_slice %392 {offsets = [0, 16], sizes = [8, 8], strides = [1, 1]} : vector<8x32xbf16> to vector<8x8xbf16>
    %418 = vector.extract_strided_slice %392 {offsets = [0, 24], sizes = [8, 8], strides = [1, 1]} : vector<8x32xbf16> to vector<8x8xbf16>
    %419 = vector.shape_cast %415 : vector<8x8xbf16> to vector<1x8x8xbf16>
    %420 = vector.shape_cast %416 : vector<8x8xbf16> to vector<1x8x8xbf16>
    %421 = vector.shape_cast %417 : vector<8x8xbf16> to vector<1x8x8xbf16>
    %422 = vector.shape_cast %418 : vector<8x8xbf16> to vector<1x8x8xbf16>
    %423 = tpu.concatenate %419, %420, %421, %422 in 0 : vector<1x8x8xbf16>, vector<1x8x8xbf16>, vector<1x8x8xbf16>, vector<1x8x8xbf16> -> vector<4x8x8xbf16>
    "tpu.trace_start"() <{level = 10 : i32, message = "hqd,hkd->hqk"}> : () -> ()
    %cst_159 = arith.constant dense<0.000000e+00> : vector<4x8x8xf32>
    %424 = tpu.matmul %405, %414, %cst_159 {dimension_numbers = #tpu.dot_dimension_numbers<[2], [2], [1], [1], [0, 0, 0, 1, 1, 1], [0], [0]>} : vector<4x8x8xbf16>, vector<4x8x8xbf16>, vector<4x8x8xf32> -> vector<4x8x8xf32>
    "tpu.trace_stop"() : () -> ()
    %425 = vector.shape_cast %4 : vector<1x8x8xf32> to vector<8x8xf32>
    %426 = vector.shape_cast %425 : vector<8x8xf32> to vector<1x8x8xf32>
    %427 = vector.broadcast %426 : vector<1x8x8xf32> to vector<4x8x8xf32>
    %428 = arith.addf %424, %427 : vector<4x8x8xf32>
    %cst_160 = arith.constant dense<0xFF800000> : vector<4x8xf32>
    %429 = vector.multi_reduction <maximumf>, %428, %cst_160 [2] : vector<4x8x8xf32> to vector<4x8xf32>
    %430 = vector.shape_cast %429 : vector<4x8xf32> to vector<4x8x1xf32>
    %431 = vector.broadcast %430 : vector<4x8x1xf32> to vector<4x8x8xf32>
    %432 = arith.subf %428, %431 : vector<4x8x8xf32>
    %433 = math.exp %432 : vector<4x8x8xf32>
    %cst_161 = arith.constant dense<0.000000e+00> : vector<4x8xf32>
    %434 = vector.multi_reduction <add>, %433, %cst_161 [2] : vector<4x8x8xf32> to vector<4x8xf32>
    %435 = vector.shape_cast %434 : vector<4x8xf32> to vector<4x8x1xf32>
    %436 = tpu.reciprocal %435 {approx = true} : vector<4x8x1xf32> -> vector<4x8x1xf32>
    %437 = vector.broadcast %436 : vector<4x8x1xf32> to vector<4x8x8xf32>
    %438 = arith.mulf %433, %437 : vector<4x8x8xf32>
    %439 = arith.truncf %438 : vector<4x8x8xf32> to vector<4x8x8xbf16>
    "tpu.trace_start"() <{level = 10 : i32, message = "hqk,hkd->hqd"}> : () -> ()
    %cst_162 = arith.constant dense<0.000000e+00> : vector<4x8x8xf32>
    %440 = tpu.matmul %439, %423, %cst_162 {dimension_numbers = #tpu.dot_dimension_numbers<[2], [1], [1], [2], [0, 0, 0, 1, 1, 2], [0], [0]>} : vector<4x8x8xbf16>, vector<4x8x8xbf16>, vector<4x8x8xf32> -> vector<4x8x8xf32>
    "tpu.trace_stop"() : () -> ()
    %441 = arith.truncf %440 : vector<4x8x8xf32> to vector<4x8x8xbf16>
    "tpu.trace_start"() <{level = 10 : i32, message = "hqd,hdm->hqm"}> : () -> ()
    %cst_163 = arith.constant dense<0.000000e+00> : vector<4x8x32xf32>
    %442 = tpu.matmul %441, %394, %cst_163 {dimension_numbers = #tpu.dot_dimension_numbers<[2], [1], [1], [2], [0, 0, 0, 1, 1, 2], [0], [0]>} : vector<4x8x8xbf16>, vector<4x8x32xbf16>, vector<4x8x32xf32> -> vector<4x8x32xf32>
    "tpu.trace_stop"() : () -> ()
    %cst_164 = arith.constant dense<0.000000e+00> : vector<8x32xf32>
    %443 = vector.multi_reduction <add>, %442, %cst_164 [0] : vector<4x8x32xf32> to vector<8x32xf32>
    %444 = vector.broadcast %396 : vector<1x32xf32> to vector<8x32xf32>
    %445 = arith.addf %443, %444 : vector<8x32xf32>
    %446 = arith.addf %352, %445 : vector<8x32xf32>
    %c5 = arith.constant 5 : index
    %c0_165 = arith.constant 0 : index
    %c0_166 = arith.constant 0 : index
    %447 = vector.load %arg14[%c5, %c0_165, %c0_166] : memref<8x1x32xf32, #tpu.memory_space<vmem>>, vector<1x1x32xf32>
    %448 = vector.shape_cast %447 : vector<1x1x32xf32> to vector<1x32xf32>
    %c5_167 = arith.constant 5 : index
    %c0_168 = arith.constant 0 : index
    %c0_169 = arith.constant 0 : index
    %449 = vector.load %arg15[%c5_167, %c0_168, %c0_169] : memref<8x1x32xf32, #tpu.memory_space<vmem>>, vector<1x1x32xf32>
    %450 = vector.shape_cast %449 : vector<1x1x32xf32> to vector<1x32xf32>
    %cst_170 = arith.constant dense<0.000000e+00> : vector<8xf32>
    %451 = vector.multi_reduction <add>, %446, %cst_170 [1] : vector<8x32xf32> to vector<8xf32>
    %452 = vector.shape_cast %451 : vector<8xf32> to vector<8x1xf32>
    %cst_171 = arith.constant 3.200000e+01 : f32
    %453 = vector.broadcast %cst_171 : f32 to vector<8x1xf32>
    %454 = arith.divf %452, %453 : vector<8x1xf32>
    %455 = vector.broadcast %454 : vector<8x1xf32> to vector<8x32xf32>
    %456 = arith.subf %446, %455 : vector<8x32xf32>
    %457 = arith.mulf %456, %456 : vector<8x32xf32>
    %cst_172 = arith.constant dense<0.000000e+00> : vector<8xf32>
    %458 = vector.multi_reduction <add>, %457, %cst_172 [1] : vector<8x32xf32> to vector<8xf32>
    %459 = vector.shape_cast %458 : vector<8xf32> to vector<8x1xf32>
    %cst_173 = arith.constant 3.100000e+01 : f32
    %460 = vector.broadcast %cst_173 : f32 to vector<8x1xf32>
    %461 = arith.divf %459, %460 : vector<8x1xf32>
    %462 = math.sqrt %461 : vector<8x1xf32>
    %463 = vector.broadcast %454 : vector<8x1xf32> to vector<8x32xf32>
    %464 = arith.subf %446, %463 : vector<8x32xf32>
    %465 = vector.broadcast %448 : vector<1x32xf32> to vector<8x32xf32>
    %466 = arith.mulf %465, %464 : vector<8x32xf32>
    %cst_174 = arith.constant 9.99999997E-7 : f32
    %467 = vector.broadcast %cst_174 : f32 to vector<8x1xf32>
    %468 = arith.addf %462, %467 : vector<8x1xf32>
    %469 = vector.broadcast %468 : vector<8x1xf32> to vector<8x32xf32>
    %470 = arith.divf %466, %469 : vector<8x32xf32>
    %471 = vector.broadcast %450 : vector<1x32xf32> to vector<8x32xf32>
    %472 = arith.addf %470, %471 : vector<8x32xf32>
    %c4_175 = arith.constant 4 : index
    %c0_176 = arith.constant 0 : index
    %c0_177 = arith.constant 0 : index
    %473 = vector.load %arg6[%c4_175, %c0_176, %c0_177] : memref<6x32x96xbf16, #tpu.memory_space<vmem>>, vector<1x32x96xbf16>
    %474 = vector.shape_cast %473 : vector<1x32x96xbf16> to vector<32x96xbf16>
    %c4_178 = arith.constant 4 : index
    %c0_179 = arith.constant 0 : index
    %c0_180 = arith.constant 0 : index
    %475 = vector.load %arg7[%c4_178, %c0_179, %c0_180] : memref<6x1x96xf32, #tpu.memory_space<vmem>>, vector<1x1x96xf32>
    %476 = vector.shape_cast %475 : vector<1x1x96xf32> to vector<1x96xf32>
    %477 = arith.truncf %472 : vector<8x32xf32> to vector<8x32xbf16>
    %478 = vector.extract_strided_slice %474 {offsets = [0, 0], sizes = [32, 32], strides = [1, 1]} : vector<32x96xbf16> to vector<32x32xbf16>
    %cst_181 = arith.constant dense<0.000000e+00> : vector<8x32xf32>
    %479 = tpu.matmul %477, %478, %cst_181 {dimension_numbers = #tpu.dot_dimension_numbers<[1], [0], [0], [1], [0, 0, 1, 1], [], []>} : vector<8x32xbf16>, vector<32x32xbf16>, vector<8x32xf32> -> vector<8x32xf32>
    %480 = vector.extract_strided_slice %476 {offsets = [0, 0], sizes = [1, 32], strides = [1, 1]} : vector<1x96xf32> to vector<1x32xf32>
    %481 = vector.broadcast %480 : vector<1x32xf32> to vector<8x32xf32>
    %482 = arith.addf %479, %481 : vector<8x32xf32>
    %483 = arith.truncf %13 : vector<8x32xf32> to vector<8x32xbf16>
    %484 = vector.extract_strided_slice %474 {offsets = [0, 32], sizes = [32, 64], strides = [1, 1]} : vector<32x96xbf16> to vector<32x64xbf16>
    %cst_182 = arith.constant dense<0.000000e+00> : vector<8x64xf32>
    %485 = tpu.matmul %483, %484, %cst_182 {dimension_numbers = #tpu.dot_dimension_numbers<[1], [0], [0], [1], [0, 0, 1, 1], [], []>} : vector<8x32xbf16>, vector<32x64xbf16>, vector<8x64xf32> -> vector<8x64xf32>
    %486 = vector.extract_strided_slice %476 {offsets = [0, 32], sizes = [1, 64], strides = [1, 1]} : vector<1x96xf32> to vector<1x64xf32>
    %487 = vector.broadcast %486 : vector<1x64xf32> to vector<8x64xf32>
    %488 = arith.addf %485, %487 : vector<8x64xf32>
    %489 = vector.extract_strided_slice %488 {offsets = [0, 0], sizes = [8, 32], strides = [1, 1]} : vector<8x64xf32> to vector<8x32xf32>
    %490 = vector.extract_strided_slice %488 {offsets = [0, 32], sizes = [8, 32], strides = [1, 1]} : vector<8x64xf32> to vector<8x32xf32>
    %491 = arith.truncf %482 : vector<8x32xf32> to vector<8x32xbf16>
    %492 = arith.truncf %489 : vector<8x32xf32> to vector<8x32xbf16>
    %493 = arith.truncf %490 : vector<8x32xf32> to vector<8x32xbf16>
    %c4_183 = arith.constant 4 : index
    %c0_184 = arith.constant 0 : index
    %c0_185 = arith.constant 0 : index
    %c0_186 = arith.constant 0 : index
    %494 = vector.load %arg8[%c4_183, %c0_184, %c0_185, %c0_186] : memref<6x4x8x32xbf16, #tpu.memory_space<vmem>>, vector<1x4x8x32xbf16>
    %495 = vector.shape_cast %494 : vector<1x4x8x32xbf16> to vector<4x8x32xbf16>
    %c4_187 = arith.constant 4 : index
    %c0_188 = arith.constant 0 : index
    %c0_189 = arith.constant 0 : index
    %496 = vector.load %arg9[%c4_187, %c0_188, %c0_189] : memref<6x1x32xf32, #tpu.memory_space<vmem>>, vector<1x1x32xf32>
    %497 = vector.shape_cast %496 : vector<1x1x32xf32> to vector<1x32xf32>
    %498 = vector.extract_strided_slice %491 {offsets = [0, 0], sizes = [8, 8], strides = [1, 1]} : vector<8x32xbf16> to vector<8x8xbf16>
    %499 = vector.extract_strided_slice %491 {offsets = [0, 8], sizes = [8, 8], strides = [1, 1]} : vector<8x32xbf16> to vector<8x8xbf16>
    %500 = vector.extract_strided_slice %491 {offsets = [0, 16], sizes = [8, 8], strides = [1, 1]} : vector<8x32xbf16> to vector<8x8xbf16>
    %501 = vector.extract_strided_slice %491 {offsets = [0, 24], sizes = [8, 8], strides = [1, 1]} : vector<8x32xbf16> to vector<8x8xbf16>
    %502 = vector.shape_cast %498 : vector<8x8xbf16> to vector<1x8x8xbf16>
    %503 = vector.shape_cast %499 : vector<8x8xbf16> to vector<1x8x8xbf16>
    %504 = vector.shape_cast %500 : vector<8x8xbf16> to vector<1x8x8xbf16>
    %505 = vector.shape_cast %501 : vector<8x8xbf16> to vector<1x8x8xbf16>
    %506 = tpu.concatenate %502, %503, %504, %505 in 0 : vector<1x8x8xbf16>, vector<1x8x8xbf16>, vector<1x8x8xbf16>, vector<1x8x8xbf16> -> vector<4x8x8xbf16>
    %507 = vector.extract_strided_slice %492 {offsets = [0, 0], sizes = [8, 8], strides = [1, 1]} : vector<8x32xbf16> to vector<8x8xbf16>
    %508 = vector.extract_strided_slice %492 {offsets = [0, 8], sizes = [8, 8], strides = [1, 1]} : vector<8x32xbf16> to vector<8x8xbf16>
    %509 = vector.extract_strided_slice %492 {offsets = [0, 16], sizes = [8, 8], strides = [1, 1]} : vector<8x32xbf16> to vector<8x8xbf16>
    %510 = vector.extract_strided_slice %492 {offsets = [0, 24], sizes = [8, 8], strides = [1, 1]} : vector<8x32xbf16> to vector<8x8xbf16>
    %511 = vector.shape_cast %507 : vector<8x8xbf16> to vector<1x8x8xbf16>
    %512 = vector.shape_cast %508 : vector<8x8xbf16> to vector<1x8x8xbf16>
    %513 = vector.shape_cast %509 : vector<8x8xbf16> to vector<1x8x8xbf16>
    %514 = vector.shape_cast %510 : vector<8x8xbf16> to vector<1x8x8xbf16>
    %515 = tpu.concatenate %511, %512, %513, %514 in 0 : vector<1x8x8xbf16>, vector<1x8x8xbf16>, vector<1x8x8xbf16>, vector<1x8x8xbf16> -> vector<4x8x8xbf16>
    %516 = vector.extract_strided_slice %493 {offsets = [0, 0], sizes = [8, 8], strides = [1, 1]} : vector<8x32xbf16> to vector<8x8xbf16>
    %517 = vector.extract_strided_slice %493 {offsets = [0, 8], sizes = [8, 8], strides = [1, 1]} : vector<8x32xbf16> to vector<8x8xbf16>
    %518 = vector.extract_strided_slice %493 {offsets = [0, 16], sizes = [8, 8], strides = [1, 1]} : vector<8x32xbf16> to vector<8x8xbf16>
    %519 = vector.extract_strided_slice %493 {offsets = [0, 24], sizes = [8, 8], strides = [1, 1]} : vector<8x32xbf16> to vector<8x8xbf16>
    %520 = vector.shape_cast %516 : vector<8x8xbf16> to vector<1x8x8xbf16>
    %521 = vector.shape_cast %517 : vector<8x8xbf16> to vector<1x8x8xbf16>
    %522 = vector.shape_cast %518 : vector<8x8xbf16> to vector<1x8x8xbf16>
    %523 = vector.shape_cast %519 : vector<8x8xbf16> to vector<1x8x8xbf16>
    %524 = tpu.concatenate %520, %521, %522, %523 in 0 : vector<1x8x8xbf16>, vector<1x8x8xbf16>, vector<1x8x8xbf16>, vector<1x8x8xbf16> -> vector<4x8x8xbf16>
    "tpu.trace_start"() <{level = 10 : i32, message = "hqd,hkd->hqk"}> : () -> ()
    %cst_190 = arith.constant dense<0.000000e+00> : vector<4x8x8xf32>
    %525 = tpu.matmul %506, %515, %cst_190 {dimension_numbers = #tpu.dot_dimension_numbers<[2], [2], [1], [1], [0, 0, 0, 1, 1, 1], [0], [0]>} : vector<4x8x8xbf16>, vector<4x8x8xbf16>, vector<4x8x8xf32> -> vector<4x8x8xf32>
    "tpu.trace_stop"() : () -> ()
    %526 = vector.shape_cast %9 : vector<1x1x8xf32> to vector<1x8xf32>
    %527 = vector.shape_cast %526 : vector<1x8xf32> to vector<1x1x8xf32>
    %528 = vector.broadcast %527 : vector<1x1x8xf32> to vector<4x8x8xf32>
    %529 = arith.addf %525, %528 : vector<4x8x8xf32>
    %cst_191 = arith.constant dense<0xFF800000> : vector<4x8xf32>
    %530 = vector.multi_reduction <maximumf>, %529, %cst_191 [2] : vector<4x8x8xf32> to vector<4x8xf32>
    %531 = vector.shape_cast %530 : vector<4x8xf32> to vector<4x8x1xf32>
    %532 = vector.broadcast %531 : vector<4x8x1xf32> to vector<4x8x8xf32>
    %533 = arith.subf %529, %532 : vector<4x8x8xf32>
    %534 = math.exp %533 : vector<4x8x8xf32>
    %cst_192 = arith.constant dense<0.000000e+00> : vector<4x8xf32>
    %535 = vector.multi_reduction <add>, %534, %cst_192 [2] : vector<4x8x8xf32> to vector<4x8xf32>
    %536 = vector.shape_cast %535 : vector<4x8xf32> to vector<4x8x1xf32>
    %537 = tpu.reciprocal %536 {approx = true} : vector<4x8x1xf32> -> vector<4x8x1xf32>
    %538 = vector.broadcast %537 : vector<4x8x1xf32> to vector<4x8x8xf32>
    %539 = arith.mulf %534, %538 : vector<4x8x8xf32>
    %540 = arith.truncf %539 : vector<4x8x8xf32> to vector<4x8x8xbf16>
    "tpu.trace_start"() <{level = 10 : i32, message = "hqk,hkd->hqd"}> : () -> ()
    %cst_193 = arith.constant dense<0.000000e+00> : vector<4x8x8xf32>
    %541 = tpu.matmul %540, %524, %cst_193 {dimension_numbers = #tpu.dot_dimension_numbers<[2], [1], [1], [2], [0, 0, 0, 1, 1, 2], [0], [0]>} : vector<4x8x8xbf16>, vector<4x8x8xbf16>, vector<4x8x8xf32> -> vector<4x8x8xf32>
    "tpu.trace_stop"() : () -> ()
    %542 = arith.truncf %541 : vector<4x8x8xf32> to vector<4x8x8xbf16>
    "tpu.trace_start"() <{level = 10 : i32, message = "hqd,hdm->hqm"}> : () -> ()
    %cst_194 = arith.constant dense<0.000000e+00> : vector<4x8x32xf32>
    %543 = tpu.matmul %542, %495, %cst_194 {dimension_numbers = #tpu.dot_dimension_numbers<[2], [1], [1], [2], [0, 0, 0, 1, 1, 2], [0], [0]>} : vector<4x8x8xbf16>, vector<4x8x32xbf16>, vector<4x8x32xf32> -> vector<4x8x32xf32>
    "tpu.trace_stop"() : () -> ()
    %cst_195 = arith.constant dense<0.000000e+00> : vector<8x32xf32>
    %544 = vector.multi_reduction <add>, %543, %cst_195 [0] : vector<4x8x32xf32> to vector<8x32xf32>
    %545 = vector.broadcast %497 : vector<1x32xf32> to vector<8x32xf32>
    %546 = arith.addf %544, %545 : vector<8x32xf32>
    %547 = arith.addf %446, %546 : vector<8x32xf32>
    %c6 = arith.constant 6 : index
    %c0_196 = arith.constant 0 : index
    %c0_197 = arith.constant 0 : index
    %548 = vector.load %arg14[%c6, %c0_196, %c0_197] : memref<8x1x32xf32, #tpu.memory_space<vmem>>, vector<1x1x32xf32>
    %549 = vector.shape_cast %548 : vector<1x1x32xf32> to vector<1x32xf32>
    %c6_198 = arith.constant 6 : index
    %c0_199 = arith.constant 0 : index
    %c0_200 = arith.constant 0 : index
    %550 = vector.load %arg15[%c6_198, %c0_199, %c0_200] : memref<8x1x32xf32, #tpu.memory_space<vmem>>, vector<1x1x32xf32>
    %551 = vector.shape_cast %550 : vector<1x1x32xf32> to vector<1x32xf32>
    %cst_201 = arith.constant dense<0.000000e+00> : vector<8xf32>
    %552 = vector.multi_reduction <add>, %547, %cst_201 [1] : vector<8x32xf32> to vector<8xf32>
    %553 = vector.shape_cast %552 : vector<8xf32> to vector<8x1xf32>
    %cst_202 = arith.constant 3.200000e+01 : f32
    %554 = vector.broadcast %cst_202 : f32 to vector<8x1xf32>
    %555 = arith.divf %553, %554 : vector<8x1xf32>
    %556 = vector.broadcast %555 : vector<8x1xf32> to vector<8x32xf32>
    %557 = arith.subf %547, %556 : vector<8x32xf32>
    %558 = arith.mulf %557, %557 : vector<8x32xf32>
    %cst_203 = arith.constant dense<0.000000e+00> : vector<8xf32>
    %559 = vector.multi_reduction <add>, %558, %cst_203 [1] : vector<8x32xf32> to vector<8xf32>
    %560 = vector.shape_cast %559 : vector<8xf32> to vector<8x1xf32>
    %cst_204 = arith.constant 3.100000e+01 : f32
    %561 = vector.broadcast %cst_204 : f32 to vector<8x1xf32>
    %562 = arith.divf %560, %561 : vector<8x1xf32>
    %563 = math.sqrt %562 : vector<8x1xf32>
    %564 = vector.broadcast %555 : vector<8x1xf32> to vector<8x32xf32>
    %565 = arith.subf %547, %564 : vector<8x32xf32>
    %566 = vector.broadcast %549 : vector<1x32xf32> to vector<8x32xf32>
    %567 = arith.mulf %566, %565 : vector<8x32xf32>
    %cst_205 = arith.constant 9.99999997E-7 : f32
    %568 = vector.broadcast %cst_205 : f32 to vector<8x1xf32>
    %569 = arith.addf %563, %568 : vector<8x1xf32>
    %570 = vector.broadcast %569 : vector<8x1xf32> to vector<8x32xf32>
    %571 = arith.divf %567, %570 : vector<8x32xf32>
    %572 = vector.broadcast %551 : vector<1x32xf32> to vector<8x32xf32>
    %573 = arith.addf %571, %572 : vector<8x32xf32>
    %c5_206 = arith.constant 5 : index
    %c0_207 = arith.constant 0 : index
    %c0_208 = arith.constant 0 : index
    %574 = vector.load %arg6[%c5_206, %c0_207, %c0_208] : memref<6x32x96xbf16, #tpu.memory_space<vmem>>, vector<1x32x96xbf16>
    %575 = vector.shape_cast %574 : vector<1x32x96xbf16> to vector<32x96xbf16>
    %c5_209 = arith.constant 5 : index
    %c0_210 = arith.constant 0 : index
    %c0_211 = arith.constant 0 : index
    %576 = vector.load %arg7[%c5_209, %c0_210, %c0_211] : memref<6x1x96xf32, #tpu.memory_space<vmem>>, vector<1x1x96xf32>
    %577 = vector.shape_cast %576 : vector<1x1x96xf32> to vector<1x96xf32>
    %578 = arith.truncf %573 : vector<8x32xf32> to vector<8x32xbf16>
    %579 = vector.extract_strided_slice %575 {offsets = [0, 0], sizes = [32, 32], strides = [1, 1]} : vector<32x96xbf16> to vector<32x32xbf16>
    %cst_212 = arith.constant dense<0.000000e+00> : vector<8x32xf32>
    %580 = tpu.matmul %578, %579, %cst_212 {dimension_numbers = #tpu.dot_dimension_numbers<[1], [0], [0], [1], [0, 0, 1, 1], [], []>} : vector<8x32xbf16>, vector<32x32xbf16>, vector<8x32xf32> -> vector<8x32xf32>
    %581 = vector.extract_strided_slice %577 {offsets = [0, 0], sizes = [1, 32], strides = [1, 1]} : vector<1x96xf32> to vector<1x32xf32>
    %582 = vector.broadcast %581 : vector<1x32xf32> to vector<8x32xf32>
    %583 = arith.addf %580, %582 : vector<8x32xf32>
    %584 = arith.truncf %15 : vector<4x32xf32> to vector<4x32xbf16>
    %585 = vector.extract_strided_slice %575 {offsets = [0, 32], sizes = [32, 64], strides = [1, 1]} : vector<32x96xbf16> to vector<32x64xbf16>
    %cst_213 = arith.constant dense<0.000000e+00> : vector<4x64xf32>
    %586 = tpu.matmul %584, %585, %cst_213 {dimension_numbers = #tpu.dot_dimension_numbers<[1], [0], [0], [1], [0, 0, 1, 1], [], []>} : vector<4x32xbf16>, vector<32x64xbf16>, vector<4x64xf32> -> vector<4x64xf32>
    %587 = vector.extract_strided_slice %577 {offsets = [0, 32], sizes = [1, 64], strides = [1, 1]} : vector<1x96xf32> to vector<1x64xf32>
    %588 = vector.broadcast %587 : vector<1x64xf32> to vector<4x64xf32>
    %589 = arith.addf %586, %588 : vector<4x64xf32>
    %590 = vector.extract_strided_slice %589 {offsets = [0, 0], sizes = [4, 32], strides = [1, 1]} : vector<4x64xf32> to vector<4x32xf32>
    %591 = vector.extract_strided_slice %589 {offsets = [0, 32], sizes = [4, 32], strides = [1, 1]} : vector<4x64xf32> to vector<4x32xf32>
    %592 = arith.truncf %583 : vector<8x32xf32> to vector<8x32xbf16>
    %593 = arith.truncf %590 : vector<4x32xf32> to vector<4x32xbf16>
    %594 = arith.truncf %591 : vector<4x32xf32> to vector<4x32xbf16>
    %c5_214 = arith.constant 5 : index
    %c0_215 = arith.constant 0 : index
    %c0_216 = arith.constant 0 : index
    %c0_217 = arith.constant 0 : index
    %595 = vector.load %arg8[%c5_214, %c0_215, %c0_216, %c0_217] : memref<6x4x8x32xbf16, #tpu.memory_space<vmem>>, vector<1x4x8x32xbf16>
    %596 = vector.shape_cast %595 : vector<1x4x8x32xbf16> to vector<4x8x32xbf16>
    %c5_218 = arith.constant 5 : index
    %c0_219 = arith.constant 0 : index
    %c0_220 = arith.constant 0 : index
    %597 = vector.load %arg9[%c5_218, %c0_219, %c0_220] : memref<6x1x32xf32, #tpu.memory_space<vmem>>, vector<1x1x32xf32>
    %598 = vector.shape_cast %597 : vector<1x1x32xf32> to vector<1x32xf32>
    %599 = vector.extract_strided_slice %592 {offsets = [0, 0], sizes = [8, 8], strides = [1, 1]} : vector<8x32xbf16> to vector<8x8xbf16>
    %600 = vector.extract_strided_slice %592 {offsets = [0, 8], sizes = [8, 8], strides = [1, 1]} : vector<8x32xbf16> to vector<8x8xbf16>
    %601 = vector.extract_strided_slice %592 {offsets = [0, 16], sizes = [8, 8], strides = [1, 1]} : vector<8x32xbf16> to vector<8x8xbf16>
    %602 = vector.extract_strided_slice %592 {offsets = [0, 24], sizes = [8, 8], strides = [1, 1]} : vector<8x32xbf16> to vector<8x8xbf16>
    %603 = vector.shape_cast %599 : vector<8x8xbf16> to vector<1x8x8xbf16>
    %604 = vector.shape_cast %600 : vector<8x8xbf16> to vector<1x8x8xbf16>
    %605 = vector.shape_cast %601 : vector<8x8xbf16> to vector<1x8x8xbf16>
    %606 = vector.shape_cast %602 : vector<8x8xbf16> to vector<1x8x8xbf16>
    %607 = tpu.concatenate %603, %604, %605, %606 in 0 : vector<1x8x8xbf16>, vector<1x8x8xbf16>, vector<1x8x8xbf16>, vector<1x8x8xbf16> -> vector<4x8x8xbf16>
    %608 = vector.extract_strided_slice %593 {offsets = [0, 0], sizes = [4, 8], strides = [1, 1]} : vector<4x32xbf16> to vector<4x8xbf16>
    %609 = vector.extract_strided_slice %593 {offsets = [0, 8], sizes = [4, 8], strides = [1, 1]} : vector<4x32xbf16> to vector<4x8xbf16>
    %610 = vector.extract_strided_slice %593 {offsets = [0, 16], sizes = [4, 8], strides = [1, 1]} : vector<4x32xbf16> to vector<4x8xbf16>
    %611 = vector.extract_strided_slice %593 {offsets = [0, 24], sizes = [4, 8], strides = [1, 1]} : vector<4x32xbf16> to vector<4x8xbf16>
    %612 = vector.shape_cast %608 : vector<4x8xbf16> to vector<1x4x8xbf16>
    %613 = vector.shape_cast %609 : vector<4x8xbf16> to vector<1x4x8xbf16>
    %614 = vector.shape_cast %610 : vector<4x8xbf16> to vector<1x4x8xbf16>
    %615 = vector.shape_cast %611 : vector<4x8xbf16> to vector<1x4x8xbf16>
    %616 = tpu.concatenate %612, %613, %614, %615 in 0 : vector<1x4x8xbf16>, vector<1x4x8xbf16>, vector<1x4x8xbf16>, vector<1x4x8xbf16> -> vector<4x4x8xbf16>
    %617 = vector.extract_strided_slice %594 {offsets = [0, 0], sizes = [4, 8], strides = [1, 1]} : vector<4x32xbf16> to vector<4x8xbf16>
    %618 = vector.extract_strided_slice %594 {offsets = [0, 8], sizes = [4, 8], strides = [1, 1]} : vector<4x32xbf16> to vector<4x8xbf16>
    %619 = vector.extract_strided_slice %594 {offsets = [0, 16], sizes = [4, 8], strides = [1, 1]} : vector<4x32xbf16> to vector<4x8xbf16>
    %620 = vector.extract_strided_slice %594 {offsets = [0, 24], sizes = [4, 8], strides = [1, 1]} : vector<4x32xbf16> to vector<4x8xbf16>
    %621 = vector.shape_cast %617 : vector<4x8xbf16> to vector<1x4x8xbf16>
    %622 = vector.shape_cast %618 : vector<4x8xbf16> to vector<1x4x8xbf16>
    %623 = vector.shape_cast %619 : vector<4x8xbf16> to vector<1x4x8xbf16>
    %624 = vector.shape_cast %620 : vector<4x8xbf16> to vector<1x4x8xbf16>
    %625 = tpu.concatenate %621, %622, %623, %624 in 0 : vector<1x4x8xbf16>, vector<1x4x8xbf16>, vector<1x4x8xbf16>, vector<1x4x8xbf16> -> vector<4x4x8xbf16>
    "tpu.trace_start"() <{level = 10 : i32, message = "hqd,hkd->hqk"}> : () -> ()
    %cst_221 = arith.constant dense<0.000000e+00> : vector<4x8x4xf32>
    %626 = tpu.matmul %607, %616, %cst_221 {dimension_numbers = #tpu.dot_dimension_numbers<[2], [2], [1], [1], [0, 0, 0, 1, 1, 1], [0], [0]>} : vector<4x8x8xbf16>, vector<4x4x8xbf16>, vector<4x8x4xf32> -> vector<4x8x4xf32>
    "tpu.trace_stop"() : () -> ()
    %cst_222 = arith.constant dense<0xFF800000> : vector<4x8xf32>
    %627 = vector.multi_reduction <maximumf>, %626, %cst_222 [2] : vector<4x8x4xf32> to vector<4x8xf32>
    %628 = vector.shape_cast %627 : vector<4x8xf32> to vector<4x8x1xf32>
    %629 = vector.broadcast %628 : vector<4x8x1xf32> to vector<4x8x4xf32>
    %630 = arith.subf %626, %629 : vector<4x8x4xf32>
    %631 = math.exp %630 : vector<4x8x4xf32>
    %cst_223 = arith.constant dense<0.000000e+00> : vector<4x8xf32>
    %632 = vector.multi_reduction <add>, %631, %cst_223 [2] : vector<4x8x4xf32> to vector<4x8xf32>
    %633 = vector.shape_cast %632 : vector<4x8xf32> to vector<4x8x1xf32>
    %634 = tpu.reciprocal %633 {approx = true} : vector<4x8x1xf32> -> vector<4x8x1xf32>
    %635 = vector.broadcast %634 : vector<4x8x1xf32> to vector<4x8x4xf32>
    %636 = arith.mulf %631, %635 : vector<4x8x4xf32>
    %637 = arith.truncf %636 : vector<4x8x4xf32> to vector<4x8x4xbf16>
    "tpu.trace_start"() <{level = 10 : i32, message = "hqk,hkd->hqd"}> : () -> ()
    %cst_224 = arith.constant dense<0.000000e+00> : vector<4x8x8xf32>
    %638 = tpu.matmul %637, %625, %cst_224 {dimension_numbers = #tpu.dot_dimension_numbers<[2], [1], [1], [2], [0, 0, 0, 1, 1, 2], [0], [0]>} : vector<4x8x4xbf16>, vector<4x4x8xbf16>, vector<4x8x8xf32> -> vector<4x8x8xf32>
    "tpu.trace_stop"() : () -> ()
    %639 = arith.truncf %638 : vector<4x8x8xf32> to vector<4x8x8xbf16>
    "tpu.trace_start"() <{level = 10 : i32, message = "hqd,hdm->hqm"}> : () -> ()
    %cst_225 = arith.constant dense<0.000000e+00> : vector<4x8x32xf32>
    %640 = tpu.matmul %639, %596, %cst_225 {dimension_numbers = #tpu.dot_dimension_numbers<[2], [1], [1], [2], [0, 0, 0, 1, 1, 2], [0], [0]>} : vector<4x8x8xbf16>, vector<4x8x32xbf16>, vector<4x8x32xf32> -> vector<4x8x32xf32>
    "tpu.trace_stop"() : () -> ()
    %cst_226 = arith.constant dense<0.000000e+00> : vector<8x32xf32>
    %641 = vector.multi_reduction <add>, %640, %cst_226 [0] : vector<4x8x32xf32> to vector<8x32xf32>
    %642 = vector.broadcast %598 : vector<1x32xf32> to vector<8x32xf32>
    %643 = arith.addf %641, %642 : vector<8x32xf32>
    %644 = arith.addf %547, %643 : vector<8x32xf32>
    %c7 = arith.constant 7 : index
    %c0_227 = arith.constant 0 : index
    %c0_228 = arith.constant 0 : index
    %645 = vector.load %arg14[%c7, %c0_227, %c0_228] : memref<8x1x32xf32, #tpu.memory_space<vmem>>, vector<1x1x32xf32>
    %646 = vector.shape_cast %645 : vector<1x1x32xf32> to vector<1x32xf32>
    %c7_229 = arith.constant 7 : index
    %c0_230 = arith.constant 0 : index
    %c0_231 = arith.constant 0 : index
    %647 = vector.load %arg15[%c7_229, %c0_230, %c0_231] : memref<8x1x32xf32, #tpu.memory_space<vmem>>, vector<1x1x32xf32>
    %648 = vector.shape_cast %647 : vector<1x1x32xf32> to vector<1x32xf32>
    %cst_232 = arith.constant dense<0.000000e+00> : vector<8xf32>
    %649 = vector.multi_reduction <add>, %644, %cst_232 [1] : vector<8x32xf32> to vector<8xf32>
    %650 = vector.shape_cast %649 : vector<8xf32> to vector<8x1xf32>
    %cst_233 = arith.constant 3.200000e+01 : f32
    %651 = vector.broadcast %cst_233 : f32 to vector<8x1xf32>
    %652 = arith.divf %650, %651 : vector<8x1xf32>
    %653 = vector.broadcast %652 : vector<8x1xf32> to vector<8x32xf32>
    %654 = arith.subf %644, %653 : vector<8x32xf32>
    %655 = arith.mulf %654, %654 : vector<8x32xf32>
    %cst_234 = arith.constant dense<0.000000e+00> : vector<8xf32>
    %656 = vector.multi_reduction <add>, %655, %cst_234 [1] : vector<8x32xf32> to vector<8xf32>
    %657 = vector.shape_cast %656 : vector<8xf32> to vector<8x1xf32>
    %cst_235 = arith.constant 3.100000e+01 : f32
    %658 = vector.broadcast %cst_235 : f32 to vector<8x1xf32>
    %659 = arith.divf %657, %658 : vector<8x1xf32>
    %660 = math.sqrt %659 : vector<8x1xf32>
    %661 = vector.broadcast %652 : vector<8x1xf32> to vector<8x32xf32>
    %662 = arith.subf %644, %661 : vector<8x32xf32>
    %663 = vector.broadcast %646 : vector<1x32xf32> to vector<8x32xf32>
    %664 = arith.mulf %663, %662 : vector<8x32xf32>
    %cst_236 = arith.constant 9.99999997E-7 : f32
    %665 = vector.broadcast %cst_236 : f32 to vector<8x1xf32>
    %666 = arith.addf %660, %665 : vector<8x1xf32>
    %667 = vector.broadcast %666 : vector<8x1xf32> to vector<8x32xf32>
    %668 = arith.divf %664, %667 : vector<8x32xf32>
    %669 = vector.broadcast %648 : vector<1x32xf32> to vector<8x32xf32>
    %670 = arith.addf %668, %669 : vector<8x32xf32>
    %671 = arith.truncf %670 : vector<8x32xf32> to vector<8x32xbf16>
    %c1_237 = arith.constant 1 : index
    %c0_238 = arith.constant 0 : index
    %c0_239 = arith.constant 0 : index
    %672 = vector.load %arg10[%c1_237, %c0_238, %c0_239] : memref<2x32x64xbf16, #tpu.memory_space<vmem>>, vector<1x32x64xbf16>
    %673 = vector.shape_cast %672 : vector<1x32x64xbf16> to vector<32x64xbf16>
    %cst_240 = arith.constant dense<0.000000e+00> : vector<8x64xf32>
    %674 = tpu.matmul %671, %673, %cst_240 {dimension_numbers = #tpu.dot_dimension_numbers<[1], [0], [0], [1], [0, 0, 1, 1], [], []>} : vector<8x32xbf16>, vector<32x64xbf16>, vector<8x64xf32> -> vector<8x64xf32>
    %c1_241 = arith.constant 1 : index
    %c0_242 = arith.constant 0 : index
    %c0_243 = arith.constant 0 : index
    %675 = vector.load %arg11[%c1_241, %c0_242, %c0_243] : memref<2x1x64xf32, #tpu.memory_space<vmem>>, vector<1x1x64xf32>
    %676 = vector.shape_cast %675 : vector<1x1x64xf32> to vector<1x64xf32>
    %677 = vector.broadcast %676 : vector<1x64xf32> to vector<8x64xf32>
    %678 = arith.addf %674, %677 : vector<8x64xf32>
    %cst_244 = arith.constant 0.000000e+00 : f32
    %679 = vector.broadcast %cst_244 : f32 to vector<8x64xf32>
    %680 = arith.maximumf %678, %679 : vector<8x64xf32>
    %681 = arith.truncf %680 : vector<8x64xf32> to vector<8x64xbf16>
    %c1_245 = arith.constant 1 : index
    %c0_246 = arith.constant 0 : index
    %c0_247 = arith.constant 0 : index
    %682 = vector.load %arg12[%c1_245, %c0_246, %c0_247] : memref<2x64x32xbf16, #tpu.memory_space<vmem>>, vector<1x64x32xbf16>
    %683 = vector.shape_cast %682 : vector<1x64x32xbf16> to vector<64x32xbf16>
    %cst_248 = arith.constant dense<0.000000e+00> : vector<8x32xf32>
    %684 = tpu.matmul %681, %683, %cst_248 {dimension_numbers = #tpu.dot_dimension_numbers<[1], [0], [0], [1], [0, 0, 1, 1], [], []>} : vector<8x64xbf16>, vector<64x32xbf16>, vector<8x32xf32> -> vector<8x32xf32>
    %c1_249 = arith.constant 1 : index
    %c0_250 = arith.constant 0 : index
    %c0_251 = arith.constant 0 : index
    %685 = vector.load %arg13[%c1_249, %c0_250, %c0_251] : memref<2x1x32xf32, #tpu.memory_space<vmem>>, vector<1x1x32xf32>
    %686 = vector.shape_cast %685 : vector<1x1x32xf32> to vector<1x32xf32>
    %687 = vector.broadcast %686 : vector<1x32xf32> to vector<8x32xf32>
    %688 = arith.addf %684, %687 : vector<8x32xf32>
    %689 = arith.addf %644, %688 : vector<8x32xf32>
    %c0_252 = arith.constant 0 : index
    %c0_253 = arith.constant 0 : index
    %690 = vector.load %arg16[%c0_252, %c0_253] : memref<1x32xf32, #tpu.memory_space<vmem>>, vector<1x32xf32>
    %c0_254 = arith.constant 0 : index
    %c0_255 = arith.constant 0 : index
    %691 = vector.load %arg17[%c0_254, %c0_255] : memref<1x32xf32, #tpu.memory_space<vmem>>, vector<1x32xf32>
    %cst_256 = arith.constant dense<0.000000e+00> : vector<8xf32>
    %692 = vector.multi_reduction <add>, %689, %cst_256 [1] : vector<8x32xf32> to vector<8xf32>
    %693 = vector.shape_cast %692 : vector<8xf32> to vector<8x1xf32>
    %cst_257 = arith.constant 3.200000e+01 : f32
    %694 = vector.broadcast %cst_257 : f32 to vector<8x1xf32>
    %695 = arith.divf %693, %694 : vector<8x1xf32>
    %696 = vector.broadcast %695 : vector<8x1xf32> to vector<8x32xf32>
    %697 = arith.subf %689, %696 : vector<8x32xf32>
    %698 = arith.mulf %697, %697 : vector<8x32xf32>
    %cst_258 = arith.constant dense<0.000000e+00> : vector<8xf32>
    %699 = vector.multi_reduction <add>, %698, %cst_258 [1] : vector<8x32xf32> to vector<8xf32>
    %700 = vector.shape_cast %699 : vector<8xf32> to vector<8x1xf32>
    %cst_259 = arith.constant 3.100000e+01 : f32
    %701 = vector.broadcast %cst_259 : f32 to vector<8x1xf32>
    %702 = arith.divf %700, %701 : vector<8x1xf32>
    %703 = math.sqrt %702 : vector<8x1xf32>
    %704 = vector.broadcast %695 : vector<8x1xf32> to vector<8x32xf32>
    %705 = arith.subf %689, %704 : vector<8x32xf32>
    %706 = vector.broadcast %690 : vector<1x32xf32> to vector<8x32xf32>
    %707 = arith.mulf %706, %705 : vector<8x32xf32>
    %cst_260 = arith.constant 9.99999997E-7 : f32
    %708 = vector.broadcast %cst_260 : f32 to vector<8x1xf32>
    %709 = arith.addf %703, %708 : vector<8x1xf32>
    %710 = vector.broadcast %709 : vector<8x1xf32> to vector<8x32xf32>
    %711 = arith.divf %707, %710 : vector<8x32xf32>
    %712 = vector.broadcast %691 : vector<1x32xf32> to vector<8x32xf32>
    %713 = arith.addf %711, %712 : vector<8x32xf32>
    %714 = vector.shape_cast %713 : vector<8x32xf32> to vector<1x8x32xf32>
    %c0_261 = arith.constant 0 : index
    %c0_262 = arith.constant 0 : index
    %c0_263 = arith.constant 0 : index
    %715 = vector.load %arg18[%c0_261, %c0_262, %c0_263] : memref<1x8x32xf32, #tpu.memory_space<vmem>>, vector<1x8x32xf32>
    tpu.vector_store %arg18[%c0_261, %c0_262, %c0_263], %714 {strides = array<i32>} : memref<1x8x32xf32, #tpu.memory_space<vmem>>, vector<1x8x32xf32>,
    return
  }
  func.func @transform_0(%arg0: i32) -> (i32, i32, i32) {
    %c0_i32 = arith.constant 0 : i32
    %c0_i32_0 = arith.constant 0 : i32
    %c0_i32_1 = arith.constant 0 : i32
    return %arg0, %c0_i32, %c0_i32_0 : i32, i32, i32
  }
  func.func @transform_1(%arg0: i32) -> (i32, i32, i32) {
    %c0_i32 = arith.constant 0 : i32
    %c0_i32_0 = arith.constant 0 : i32
    %c0_i32_1 = arith.constant 0 : i32
    return %arg0, %c0_i32, %c0_i32_0 : i32, i32, i32
  }
  func.func @transform_2(%arg0: i32) -> (i32, i32, i32) {
    %c0_i32 = arith.constant 0 : i32
    %c0_i32_0 = arith.constant 0 : i32
    %c0_i32_1 = arith.constant 0 : i32
    return %arg0, %c0_i32, %c0_i32_0 : i32, i32, i32
  }
  func.func @transform_3(%arg0: i32) -> (i32, i32, i32) {
    %c0_i32 = arith.constant 0 : i32
    %c0_i32_0 = arith.constant 0 : i32
    %c0_i32_1 = arith.constant 0 : i32
    return %arg0, %c0_i32, %c0_i32_0 : i32, i32, i32
  }
  func.func @transform_4(%arg0: i32) -> (i32, i32, i32) {
    %c0_i32 = arith.constant 0 : i32
    %c0_i32_0 = arith.constant 0 : i32
    %c0_i32_1 = arith.constant 0 : i32
    return %arg0, %c0_i32, %c0_i32_0 : i32, i32, i32
  }
  func.func @transform_5(%arg0: i32) -> (i32, i32, i32) {
    %c0_i32 = arith.constant 0 : i32
    %c0_i32_0 = arith.constant 0 : i32
    %c0_i32_1 = arith.constant 0 : i32
    %c0_i32_2 = arith.constant 0 : i32
    return %c0_i32, %c0_i32_0, %c0_i32_1 : i32, i32, i32
  }
  func.func @transform_6(%arg0: i32) -> (i32, i32, i32) {
    %c0_i32 = arith.constant 0 : i32
    %c0_i32_0 = arith.constant 0 : i32
    %c0_i32_1 = arith.constant 0 : i32
    %c0_i32_2 = arith.constant 0 : i32
    return %c0_i32, %c0_i32_0, %c0_i32_1 : i32, i32, i32
  }
  func.func @transform_7(%arg0: i32) -> (i32, i32, i32, i32) {
    %c0_i32 = arith.constant 0 : i32
    %c0_i32_0 = arith.constant 0 : i32
    %c0_i32_1 = arith.constant 0 : i32
    %c0_i32_2 = arith.constant 0 : i32
    %c0_i32_3 = arith.constant 0 : i32
    return %c0_i32, %c0_i32_0, %c0_i32_1, %c0_i32_2 : i32, i32, i32, i32
  }
  func.func @transform_8(%arg0: i32) -> (i32, i32, i32) {
    %c0_i32 = arith.constant 0 : i32
    %c0_i32_0 = arith.constant 0 : i32
    %c0_i32_1 = arith.constant 0 : i32
    %c0_i32_2 = arith.constant 0 : i32
    return %c0_i32, %c0_i32_0, %c0_i32_1 : i32, i32, i32
  }
  func.func @transform_9(%arg0: i32) -> (i32, i32, i32) {
    %c0_i32 = arith.constant 0 : i32
    %c0_i32_0 = arith.constant 0 : i32
    %c0_i32_1 = arith.constant 0 : i32
    %c0_i32_2 = arith.constant 0 : i32
    return %c0_i32, %c0_i32_0, %c0_i32_1 : i32, i32, i32
  }
  func.func @transform_10(%arg0: i32) -> (i32, i32, i32) {
    %c0_i32 = arith.constant 0 : i32
    %c0_i32_0 = arith.constant 0 : i32
    %c0_i32_1 = arith.constant 0 : i32
    %c0_i32_2 = arith.constant 0 : i32
    return %c0_i32, %c0_i32_0, %c0_i32_1 : i32, i32, i32
  }
  func.func @transform_11(%arg0: i32) -> (i32, i32, i32) {
    %c0_i32 = arith.constant 0 : i32
    %c0_i32_0 = arith.constant 0 : i32
    %c0_i32_1 = arith.constant 0 : i32
    %c0_i32_2 = arith.constant 0 : i32
    return %c0_i32, %c0_i32_0, %c0_i32_1 : i32, i32, i32
  }
  func.func @transform_12(%arg0: i32) -> (i32, i32, i32) {
    %c0_i32 = arith.constant 0 : i32
    %c0_i32_0 = arith.constant 0 : i32
    %c0_i32_1 = arith.constant 0 : i32
    %c0_i32_2 = arith.constant 0 : i32
    return %c0_i32, %c0_i32_0, %c0_i32_1 : i32, i32, i32
  }
  func.func @transform_13(%arg0: i32) -> (i32, i32, i32) {
    %c0_i32 = arith.constant 0 : i32
    %c0_i32_0 = arith.constant 0 : i32
    %c0_i32_1 = arith.constant 0 : i32
    %c0_i32_2 = arith.constant 0 : i32
    return %c0_i32, %c0_i32_0, %c0_i32_1 : i32, i32, i32
  }
  func.func @transform_14(%arg0: i32) -> (i32, i32, i32) {
    %c0_i32 = arith.constant 0 : i32
    %c0_i32_0 = arith.constant 0 : i32
    %c0_i32_1 = arith.constant 0 : i32
    %c0_i32_2 = arith.constant 0 : i32
    return %c0_i32, %c0_i32_0, %c0_i32_1 : i32, i32, i32
  }
  func.func @transform_15(%arg0: i32) -> (i32, i32) {
    %c0_i32 = arith.constant 0 : i32
    %c0_i32_0 = arith.constant 0 : i32
    %c0_i32_1 = arith.constant 0 : i32
    return %c0_i32, %c0_i32_0 : i32, i32
  }
  func.func @transform_16(%arg0: i32) -> (i32, i32) {
    %c0_i32 = arith.constant 0 : i32
    %c0_i32_0 = arith.constant 0 : i32
    %c0_i32_1 = arith.constant 0 : i32
    return %c0_i32, %c0_i32_0 : i32, i32
  }
  func.func @transform_17(%arg0: i32) -> (i32, i32, i32) {
    %c0_i32 = arith.constant 0 : i32
    %c0_i32_0 = arith.constant 0 : i32
    %c0_i32_1 = arith.constant 0 : i32
    return %arg0, %c0_i32, %c0_i32_0 : i32, i32, i32
  }
}

</mosaic_0001>

<bundles_post_ra>
// kernel: decoder_forward.1
= control target key start
LH: loop header
LB: loop body
LE: loop exit
PB: predicated region body
PF: predicated region fallthrough
CT: control target
= control target key end

     0   :  { %s6028_s0 = inlined_call_operand.hbm [shape: f32[2,8,32], index: 0, kind: input, shape index: {}]   ;;  %s6029_s1 = inlined_call_operand.hbm [shape: f32[2,8,32], index: 1, kind: input, shape index: {}]   ;;  %s6030_s2 = inlined_call_operand.vmem [shape: f32[2,4,32], index: 2, kind: input, shape index: {}]   ;;  %s6031_s3 = inlined_call_operand.hbm [shape: f32[2,8,8], index: 3, kind: input, shape index: {}]   ;;  %s6032_s4 = inlined_call_operand.vmem [shape: f32[2,1,8], index: 4, kind: input, shape index: {}]   ;;  %s6033_s5 = inlined_call_operand.vmem [shape: bf16[6,32,96], index: 5, kind: input, shape index: {}]   ;;  %s6034_s6 = inlined_call_operand.hbm [shape: f32[6,1,96], index: 6, kind: input, shape index: {}]   ;;  %s6035_s7 = inlined_call_operand.hbm [shape: bf16[6,4,8,32], index: 7, kind: input, shape index: {}]   ;;  %s6036_s8 = inlined_call_operand.hbm [shape: f32[6,1,32], index: 8, kind: input, shape index: {}]   ;;  %s6037_s9 = inlined_call_operand.hbm [shape: bf16[2,32,64], index: 9, kind: input, shape index: {}]   ;;  %s6038_s10 = inlined_call_operand.hbm [shape: f32[2,1,64], index: 10, kind: input, shape index: {}]   ;;  %s6039_s11 = inlined_call_operand.vmem [shape: bf16[2,64,32], index: 11, kind: input, shape index: {}]   ;;  %s6040_s12 = inlined_call_operand.hbm [shape: f32[2,1,32], index: 12, kind: input, shape index: {}]   ;;  %s6041_s13 = inlined_call_operand.hbm [shape: f32[8,1,32], index: 13, kind: input, shape index: {}]   ;;  %s6042_s14 = inlined_call_operand.hbm [shape: f32[8,1,32], index: 14, kind: input, shape index: {}]   ;;  %s6043_s15 = inlined_call_operand.vmem [shape: f32[1,32], index: 15, kind: input, shape index: {}]   ;;  %s6044_s16 = inlined_call_operand.hbm [shape: f32[1,32], index: 16, kind: input, shape index: {}]   ;;  %s6045_s17 = inlined_call_operand.hbm [shape: f32[2,8,32], index: 17, kind: output, shape index: {}]  }
   0x1   :  { %6064 = sst [smem:[#allocation37_spill]] %s6028_s0 }
   0x2   :  { %6065 = sst [smem:[#allocation38_spill]] %s6029_s1 }
   0x3   :  { %6066 = sst [smem:[#allocation39_spill]] %s6030_s2 }
   0x4   :  { %6067 = sst [smem:[#allocation40_spill]] %s6034_s6 }
   0x5   :  { %6068 = sst [smem:[#allocation41_spill]] %s6035_s7 }
   0x6   :  { %6069 = sst [smem:[#allocation42_spill]] %s6036_s8 }
   0x7   :  { %6070 = sst [smem:[#allocation43_spill]] %s6037_s9 }
   0x8   :  { %6071 = sst [smem:[#allocation44_spill]] %s6038_s10 }
   0x9   :  { %6072 = sst [smem:[#allocation45_spill]] %s6039_s11 }
   0xa   :  { %6073 = sst [smem:[#allocation46_spill]] %s6040_s12 }
   0xb   :  { %6074 = sst [smem:[#allocation47_spill]] %s6041_s13 }
   0xc   :  { %6075 = sst [smem:[#allocation48_spill]] %s6042_s14 }
   0xd   :  { %6076 = sst [smem:[#allocation49_spill]] %s6043_s15 }
   0xe   :  { %6077 = sst [smem:[#allocation50_spill]] %s6045_s17 }
   0xf   :  { %22 = vsyncpa [#allocation3], 0 }
  0x10   :  { %24 = vsyncpa [#allocation3 + $0x1], 0 }
  0x11   :  { %25 = vsyncpa [#allocation6], 0 }
  0x12   :  { %27 = vsyncpa [#allocation6 + $0x1], 0 }
  0x13   :  { %28 = vsyncpa [#allocation9], 0 }
  0x14   :  { %29 = vsyncpa [#allocation12], 0 }
  0x15   :  { %30 = vsyncpa [#allocation15], 0 }
  0x16   :  { %31 = vsyncpa [#allocation18], 0 }
  0x17   :  { %32 = vsyncpa [#allocation21], 0 }
  0x18   :  { %33 = vsyncpa [#allocation4], 0 }
  0x19   :  { %35 = vsyncpa [#allocation4 + $0x1], 0  ;;  %s5198_s24 = smov 0   ;;  %s5200_s25 = smov 0  }
  0x1a   :  { %s5202_s26 = smov 0   ;;  %s5204_s27 = smov 0  }
  0x1b LB: > { %6078 = sst [smem:[#allocation31_spill]] %s5074_s24  ;;  %s5222_s30 = sadd.s32 4294967295, %s5086_s27   ;;  %s5086_s27 = sphi %s5204_s27, %s6122_s27   ;;  %s5082_s26 = sphi %s5202_s26, %s6126_s26   ;;  %s5078_s25 = sphi %s5200_s25, %s6125_s25   ;;  %s5074_s24 = sphi %s5198_s24, %s6124_s24  }
  0x1c   : > { %6079 = sst [smem:[#allocation32_spill]] %s5086_s27  ;;  %p4036_p0 = scmp.ge.s32.totalorder %s5086_s27, 1 }
  0x1d   : > { %s6080_s6 = sld [smem:[#allocation40_spill]]  ;;  %p6061_p1 = scmp.eq.s32.totalorder %s5222_s30, 0 }
  0x1e   : > { %p454_p2 = scmp.lt.s32.totalorder %s5086_s27, 3  ;;  %s5088_s19 = smov [#allocation8]  }
  0x1f   : > { %s470_s1 = sshll.u32 %s5088_s19, 4  ;;  %s6082_s8 = sld [smem:[#allocation42_spill]]  ;;  %s471_s1 = int_to_ptr.vmem [resolvable:$true] %s470_s1 }
  0x20   : > { %p5227_p3 = pnand %p4036_p0, %p454_p2  ;;  %s6084_s10 = sld [smem:[#allocation44_spill]] }
  0x21   : > { %s6049_s15 = smov 16   ;;  %s6051_s20 = smov 1  }
  0x22   : > { %p4352_p4 = pneg %p5227_p3  ;;  %s6085_s13 = sld [smem:[#allocation47_spill]] }
  0x23   : > { %s468_s0 = sshll.u32 %s6080_s6, 4  ;;  %s5089_s6 = smov [#allocation11]   ;;  %s469_s0 = int_to_ptr.hbm [resolvable:$true] %s468_s0 }
  0x24   : > { %p5239_p6 = pnand %p4352_p4, %p6061_p1  ;;  %s498_s17 = sshll.u32 %s5089_s6, 4  ;;  %s499_s17 = int_to_ptr.vmem [resolvable:$true] %s498_s17 }
  0x25   : > { %s496_s22 = sshll.u32 %s6082_s8, 4  ;;  %s5092_s29 = smov [#allocation14]   ;;  %s497_s22 = int_to_ptr.hbm [resolvable:$true] %s496_s22 }
  0x26   : > { %s524_s19 = sshll.u32 %s6084_s10, 4  ;;  %s5271_s6 = sadd.s32 1, %s5086_s27   ;;  %s525_s19 = int_to_ptr.hbm [resolvable:$true] %s524_s19 }
  0x27   : > { %4355 = dma.hbm_to_vmem [thread:$0]  (!%p5239_p6), %s469_s0, 96, %s471_s1, [#allocation9], %s6049_s15, %s6049_s15, %s6051_s20  }
  0x28   : > { %4361 = dma.hbm_to_vmem [thread:$0]  (!%p5239_p6), %s497_s22, 96, %s499_s17, [#allocation12], %s6049_s15, %s6049_s15, %s6051_s20  }
  0x29   : > { %s555_s28 = sshll.u32 %s6085_s13, 4  ;;  %s526_s0 = sshll.u32 %s5092_s29, 4  ;;  %s556_s28 = int_to_ptr.hbm [resolvable:$true] %s555_s28  ;;  %s527_s0 = int_to_ptr.vmem [resolvable:$true] %s526_s0 }
  0x2a   : > { %4367 = dma.hbm_to_vmem [thread:$0]  (!%p5239_p6), %s525_s19, 32, %s527_s0, [#allocation15], %s6049_s15, %s6049_s15, %s6051_s20  }
  0x2b   : > { %s5093_s17 = smov [#allocation17]   ;;  %s4035_s22 = sadd.s32 4294967294, %s5086_s27  }
  0x2c   : > { %s557_s1 = sshll.u32 %s5093_s17, 4  ;;  %6086 = sst [smem:[#allocation33_spill]] %s5271_s6  ;;  %s558_s1 = int_to_ptr.vmem [resolvable:$true] %s557_s1 }
  0x2d   : > { %4373 = dma.hbm_to_vmem [thread:$0]  (!%p5239_p6), %s556_s28, 128, %s558_s1, [#allocation18], %s6049_s15, %s6049_s15, %s6051_s20  }
  0x2e   : > { %s45_s21 = ssub.s32 %s5086_s27, %s5271_s6  ;;  %s48_s29 = sadd.s32 1, %s5082_s26 }
  0x2f   : > { %p46_p7 = scmp.eq.s32.totalorder %s45_s21, 0  ;;  %p55_p8 = scmp.ne.s32.totalorder %s5082_s26, %s5078_s25 }
  0x30   : > { %p56_p9 = scmp.eq.s32.totalorder %s5086_s27, 0  ;;  %p61_p10 = scmp.ne.s32.totalorder %s5078_s25, %s5074_s24 }
  0x31   : > { %s5282_s19 = scalar_select %p46_p7, %s5082_s26, %s48_s29  }
  0x32   : > { %p57_p11 = por %p56_p9, %p55_p8  ;;  %p5286_p12 = por %p6061_p1, %p61_p10 }
  0x33   : > { %6087 = sst [smem:[#allocation34_spill]] %s5282_s19  ;;  %p441_p13 = scmp.eq.s32.totalorder %s5222_s30, 1 }
  0x34   : > { %p447_p0 = scmp.eq.s32.totalorder %s4035_s22, 1  ;;  %p4403_p2 = scmp.lt.s32.totalorder %s5086_s27, 2 }
  0x35   : > { %s6056_s28 = sand.u32 1, %s5082_s26   ;;  %p5293_p4 = por %p441_p13, %p55_p8 }
  0x36   : > { %p5297_p5 = por %p447_p0, %p61_p10  ;;  %s5303_s21 = sshll.u32 %s6056_s28, 3 }
  0x37   : > { %s6089_s17 = scalar_select %p5293_p4, 1, 0 }
  0x38   : > { %s6091_s1 = scalar_select %p5297_p5, 1, 0 }
  0x39   : > { %6090 = sst [smem:[#allocation35_spill]] %s6089_s17  ;;  %s5306_s29 = sshll.u32 %s5086_s27, 3 }
  0x3a   : > { %6092 = sst [smem:[#allocation36_spill]] %s6091_s1  ;;  %p5308_p7 = pnand %p4403_p2, %p57_p11 }
  0x3b   : > { %s619_s22 = sand.u32 1, %s5086_s27   ;;  %s6094_s10 = sld [smem:[#allocation38_spill]] }
  0x3c   : > { %s623_s6 = scalar_lea.vmem [#allocation5], %s5303_s21  ;;  %s5318_s28 = scalar_lea.sflag [#allocation6], %s619_s22 }
  0x3d   : > { %s631_s1 = sshll.u32 %s623_s6, 4  ;;  %p4760_p9 = pneg %p5308_p7  ;;  %s632_s1 = int_to_ptr.vmem [resolvable:$true] %s631_s1 }
  0x41   : > { %s627_s13 = scalar_lea.hbm %s6094_s10, %s5306_s29 }
  0x42   : > { %s629_s19 = sshll.u32 %s627_s13, 4  ;;  %s4763_s13 = scalar_lea.hbm %s6094_s10, 16  ;;  %s630_s19 = int_to_ptr.hbm [resolvable:$true] %s629_s19 }
  0x43   : > { %s4756_s24 = sshra.s32 %s630_s19, 4  ;;  %s4757_s24 = int_to_ptr.hbm [resolvable:$true] %s4756_s24 }
  0x44   : > { %s4758_s17 = scalar_lea.hbm %s4757_s24, 8  ;;  %p4764_p13 = scmp.lt.s32.totalorder %s4757_s24, %s6094_s10 }
  0x45   : > { %p4759_p8 = scmp.ne.s32.totalorder %s4757_s24, %s4758_s17  ;;  %p4765_p0 = scmp.lt.s32.totalorder %s4763_s13, %s4758_s17 }
  0x47   : > { %p4761_p10 = pnand %p4760_p9, %p4759_p8  ;;  %p4766_p2 = por %p4765_p0, %p4764_p13 }
  0x49   : > { %p4762_p11 = pneg %p4761_p10 }
  0x4b   : > { %p4767_p1 = pnand %p4766_p2, %p4762_p11 }
  0x4d   : > { %4770 = shalt.err (!%p4767_p1)
}
  0x4e   : > { %4386 = dma.hbm_to_vmem [thread:$0]  (!%p5308_p7), %s630_s19, 128, %s632_s1, %s5318_s28  }
  0x4f   : > { %s6095_s7 = sld [smem:[#allocation41_spill]]  ;;  %s5094_s27 = smov [#allocation10]  }
  0x50   : > { %s484_s8 = sshll.u32 %s5094_s27, 4  ;;  %s6096_s9 = sld [smem:[#allocation43_spill]]  ;;  %s485_s8 = int_to_ptr.vmem [resolvable:$true] %s484_s8 }
  0x51   : > { %s5095_s13 = smov 64   ;;  %s5096_s6 = smov 4  }
  0x52   : > { %s5097_s19 = smov [#allocation13]   ;;  %s6097_s12 = sld [smem:[#allocation46_spill]] }
  0x53   : > { %s512_s1 = sshll.u32 %s5097_s19, 4  ;;  %s6098_s14 = sld [smem:[#allocation48_spill]]  ;;  %s513_s1 = int_to_ptr.vmem [resolvable:$true] %s512_s1 }
  0x54   : > { %s6100_s10 = smov 16   ;;  %s5099_s19 = smov [#allocation19]  }
  0x55   : > { %s482_s2 = sshll.u32 %s6095_s7, 4  ;;  %s5098_s7 = smov [#allocation16]   ;;  %s483_s2 = int_to_ptr.hbm [resolvable:$true] %s482_s2 }
  0x56   : > { %s510_s17 = sshll.u32 %s6096_s9, 4  ;;  %s571_s11 = sshll.u32 %s5099_s19, 4  ;;  %s511_s17 = int_to_ptr.hbm [resolvable:$true] %s510_s17  ;;  %s572_s11 = int_to_ptr.vmem [resolvable:$true] %s571_s11 }
  0x57   : > { %4358 = dma.hbm_to_vmem [thread:$0]  (!%p5239_p6), %s483_s2, 1536, %s485_s8, [#allocation9], %s5095_s13, %s5095_s13, %s5096_s6  }
  0x58   : > { %s541_s22 = sshll.u32 %s6097_s12, 4  ;;  %s543_s2 = sshll.u32 %s5098_s7, 4  ;;  %s542_s22 = int_to_ptr.hbm [resolvable:$true] %s541_s22  ;;  %s544_s2 = int_to_ptr.vmem [resolvable:$true] %s543_s2 }
  0x59   : > { %4364 = dma.hbm_to_vmem [thread:$0]  (!%p5239_p6), %s511_s17, 512, %s513_s1, [#allocation12], %s5095_s13, %s5095_s13, %s5096_s6  }
  0x5a   : > { %s569_s24 = sshll.u32 %s6098_s14, 4  ;;  %s6099_s8 = smov 1   ;;  %s570_s24 = int_to_ptr.hbm [resolvable:$true] %s569_s24 }
  0x5b   : > { %4370 = dma.hbm_to_vmem [thread:$0]  (!%p5239_p6), %s542_s22, 32, %s544_s2, [#allocation15], %s6100_s10, %s6100_s10, %s6099_s8  }
  0x5c   : > { %s587_s6 = sshll.u32 %s6044_s16, 4  ;;  %s5100_s7 = smov [#allocation20]   ;;  %s588_s6 = int_to_ptr.hbm [resolvable:$true] %s587_s6 }
  0x5d   : > { %4376 = dma.hbm_to_vmem [thread:$0]  (!%p5239_p6), %s570_s24, 128, %s572_s11, [#allocation18], %s6100_s10, %s6100_s10, %s6099_s8  }
  0x5e   : > { %s589_s1 = sshll.u32 %s5100_s7, 4  ;;  %s6101_s20 = sld [smem:[#allocation37_spill]]  ;;  %s590_s1 = int_to_ptr.vmem [resolvable:$true] %s589_s1 }
  0x5f   : > { %4379 = dma.hbm_to_vmem [thread:$0]  (!%p5239_p6), %s588_s6, 16, %s590_s1, [#allocation21]  }
  0x60   : > { %s604_s17 = scalar_lea.vmem [#allocation2], %s5303_s21  ;;  %s6102_s9 = sand.u32 1, %s5082_s26  }
  0x61   : > { %s612_s13 = sshll.u32 %s604_s17, 4  ;;  %s601_s12 = scalar_lea.sflag [#allocation3], %s6102_s9  ;;  %s613_s13 = int_to_ptr.vmem [resolvable:$true] %s612_s13 }
  0x64   : > { %s608_s2 = scalar_lea.hbm %s6101_s20, %s5306_s29  ;;  %s4943_s23 = scalar_lea.hbm %s6101_s20, 16 }
  0x65   : > { %s610_s19 = sshll.u32 %s608_s2, 4  ;;  %s611_s19 = int_to_ptr.hbm [resolvable:$true] %s610_s19 }
  0x66   : > { %s4936_s14 = sshra.s32 %s611_s19, 4  ;;  %s4937_s14 = int_to_ptr.hbm [resolvable:$true] %s4936_s14 }
  0x67   : > { %s4938_s24 = scalar_lea.hbm %s4937_s14, 8  ;;  %p4944_p6 = scmp.lt.s32.totalorder %s4937_s14, %s6101_s20 }
  0x68   : > { %p4939_p1 = scmp.ne.s32.totalorder %s4937_s14, %s4938_s24  ;;  %p4945_p11 = scmp.lt.s32.totalorder %s4943_s23, %s4938_s24 }
  0x6a   : > { %p4941_p8 = pnand %p4939_p1, %p4760_p9  ;;  %p4946_p13 = por %p4945_p11, %p4944_p6 }
  0x6c   : > { %p4942_p10 = pneg %p4941_p8 }
  0x6e   : > { %p4947_p0 = pnand %p4946_p13, %p4942_p10 }
  0x70   : > { %4950 = shalt.err (!%p4947_p0)
}
  0x71   : > { %4383 = dma.hbm_to_vmem [thread:$0]  (!%p5308_p7), %s611_s19, 128, %s613_s13, %s601_s12  }
  0x72   : > { %s653_s1 = scalar_lea.hbm %s6031_s3, %s5306_s29  ;;  %s649_s22 = scalar_lea.vmem [#allocation7], %s5303_s21 }
  0x73   : > { %s655_s27 = sshll.u32 %s653_s1, 4  ;;  %s657_s2 = sshll.u32 %s649_s22, 4  ;;  %s656_s27 = int_to_ptr.hbm [resolvable:$true] %s655_s27  ;;  %s658_s2 = int_to_ptr.vmem [resolvable:$true] %s657_s2 }
  0x74   : > { %s4966_s14 = sshra.s32 %s656_s27, 4  ;;  %s4973_s12 = scalar_lea.hbm %s6031_s3, 16  ;;  %s4967_s14 = int_to_ptr.hbm [resolvable:$true] %s4966_s14 }
  0x75   : > { %s4968_s17 = scalar_lea.hbm %s4967_s14, 8  ;;  %p4974_p10 = scmp.lt.s32.totalorder %s4967_s14, %s6031_s3 }
  0x76   : > { %p4969_p2 = scmp.ne.s32.totalorder %s4967_s14, %s4968_s17  ;;  %p4975_p6 = scmp.lt.s32.totalorder %s4973_s12, %s4968_s17 }
  0x78   : > { %p4971_p1 = pnand %p4969_p2, %p4760_p9  ;;  %p4976_p11 = por %p4975_p6, %p4974_p10 }
  0x7a   : > { %p4972_p8 = pneg %p4971_p1 }
  0x7c   : > { %p4977_p13 = pnand %p4976_p11, %p4972_p8 }
  0x7e   : > { %4980 = shalt.err (!%p4977_p13)
}
  0x7f   : > { %4389 = dma.hbm_to_vmem [thread:$0]  (!%p5308_p7), %s656_s27, 128, %s658_s2, %s5318_s28  }
  0x80   : > { %672 = sbr.rel (%p5227_p3) target bundleno = 9081 (0x2379), region = 88  ;;  %s5403_s21 = sand.u32 (!%p5227_p3), 1, %s5078_s25  }
  0x81   : > { %s5406_s29 = sshll.u32 (!%p5227_p3), %s5403_s21, 3  ;;  %s675_s10 = scalar_lea.sflag (!%p5227_p3), [#allocation3], %s5403_s21 }
  0x82   : > { %s678_s23 = scalar_lea.vmem (!%p5227_p3), [#allocation2], %s5406_s29 }
  0x85   : > { %5041 = dma.done.wait (%p5286_p12), %s675_s10, 128  }
  0x86   : > { %5043 = vsyncadd (%p5286_p12), %s675_s10, 4294967168  ;;  %s684_s15 = sand.u32 1, %s5222_s30   ;;  %s688_s28 = scalar_lea.vmem [#allocation5], %s5406_s29 }
  0x87   : > { %s685_s18 = scalar_lea.sflag [#allocation6], %s684_s15 }
  0x88   : > { %5045 = dma.done.wait (%p5286_p12), %s685_s18, 256  }
  0x89   : > { %5047 = vsyncadd (%p5286_p12), %s685_s18, 4294967040  ;;  %s698_s11 = scalar_lea.vmem [#allocation7], %s5406_s29  ;;  %p6103_p3 = scmp.eq.s32.totalorder %s5222_s30, 0 }
  0x8b   : > { %5049 = dma.done.wait (%p6103_p3), [#allocation9], 1632   ;;  %p6104_p7 = pmov %p6103_p3 }
  0x8c   : > { %p6105_p9 = pmov %p6103_p3 }
  0x8d   : > { %5051 = vsyncadd (%p6104_p7), [#allocation9], 4294965664 }
  0x8e   : > { %5053 = dma.done.wait (%p6105_p9), [#allocation12], 608   ;;  %p6106_p0 = pmov %p6103_p3 }
  0x90   : > { %5055 = vsyncadd (%p6106_p0), [#allocation12], 4294966688  ;;  %p6107_p2 = pmov %p6106_p0 }
  0x91   : > { %p6108_p1 = pmov %p6106_p0 }
  0x92   : > { %5057 = dma.done.wait (%p6107_p2), [#allocation15], 64  }
  0x93   : > { %5059 = vsyncadd (%p6108_p1), [#allocation15], 4294967232  ;;  %p6109_p12 = pmov %p6106_p0 }
  0x94   : > { %p6110_p8 = pmov %p6106_p0 }
  0x95   : > { %5061 = dma.done.wait (%p6109_p12), [#allocation18], 256  }
  0x96   : > { %5063 = vsyncadd (%p6110_p8), [#allocation18], 4294967040  ;;  %p6111_p10 = pmov %p6106_p0 }
  0x97   : > { %p6112_p6 = pmov %p6106_p0 }
  0x98   : > { %5065 = dma.done.wait (%p6111_p10), [#allocation21], 16  }
  0x99   : > { %5067 = vsyncadd (%p6112_p6), [#allocation21], 4294967280  ;;  %vm831_vm0 = vcmask 261120   ;;  %v5441_v0 = vld [vmem:[%s678_s23] sm:$0xff]  ;;  %v5101_v2 = vmov 32.0   ;;  %v5102_v14 = vmov 31.0  }
  0x9a   : > { %v832_v1 = vsel %vm831_vm0, %v5441_v0, 0.0  ;;  %4500 = vrcp.f32 %v5101_v2  ;;  %v4285_v19 = vld [vmem:[%s6033_s5 + $0x8] sm:$0xff]  ;;  %v4284_v20 = vld [vmem:[%s6033_s5] sm:$0xff]  ;;  %v4468_v52 = vld [vmem:[#allocation8] ss:$0 sm:$0xff]  ;;  %s5103_s1 = smov 104  }
  0x9b   : > { %833 = vadd.xlane.f32.xlu0 %v832_v1  ;;  %4502 = vrcp.f32 %v5102_v14  ;;  %922 = vmatpush.bf16.msra.mxu0 %v4285_v19  ;;  %v4466_v40 = vld [vmem:[#allocation17] ss:$0 sm:$0xff]  ;;  %v4467_v47 = vld [vmem:[#allocation19] ss:$0 sm:$0xff]  ;;  %s5104_s27 = smov 120   ;;  %s5105_s22 = smov 112  }
  0x9c   : > { %s5106_s2 = smov 96   ;;  %vm946_vm9 = vcmask 64512   ;;  %v820_v14 = vld [vmem:[%s698_s11] sm:$0xff]  ;;  %s5107_s14 = smov 64   ;;  %vm1088_vm10 = vcmask 1043456  }
  0x9d   : > { %p812_p11 = scmp.lt.s32.totalorder %s5222_s30, 1  ;;  %s6113_s7 = sld [smem:[#allocation39_spill]] }
  0x9e   : > { %s6114_s12 = sld [smem:[#allocation45_spill]]  ;;  %s811_s24 = scalar_lea.vmem [#allocation22], %s5406_s29 }
  0x9f   : > { %923 = vmatpush.bf16.msra.mxu0 %v4284_v20  ;;  %s5575_s19 = scalar_select %p812_p11, %s5222_s30, 1 }
  0xa0   : > { %v4501_v3 = vpop.eup %4500  ;;  %s6115_s6 = sld [smem:[#allocation49_spill]]  ;;  %s3812_s8 = sshll.u32 %s811_s24, 4  ;;  %s3813_s8 = int_to_ptr.vmem [resolvable:$true] %s3812_s8 }
  0xa1   : > { %v836_v4 = vmul.f32 32.0, %v4501_v3  ;;  %vm840_vm1 = vweird.f32 %v4501_v3  ;;  %v4503_v15 = vpop.eup %4502  ;;  %s818_s23 = scalar_lea.vmem %s6032_s4, %s5575_s19  ;;  %s4067_s0 = sshll.u32 %s5575_s19, 2 }
  0xa2   : > { %v849_v16 = vmul.f32 31.0, %v4503_v15  ;;  %vm853_vm2 = vweird.f32 %v4503_v15  ;;  %s3800_s13 = scalar_lea.sflag [#allocation4], %s5403_s21 }
  0xa3   : > { %v837_v5 = vsub.f32 1.0, %v836_v4  ;;  %s815_s17 = scalar_lea.vmem %s6113_s7, %s4067_s0  ;;  %s6116_s7 = sld [smem:[#allocation50_spill]] }
  0xa4   : > { %v850_v17 = vsub.f32 1.0, %v849_v16 }
  0xa5   : > { %v838_v6 = vmul.f32 %v4501_v3, %v837_v5 }
  0xa6   : > { %v851_v18 = vmul.f32 %v4503_v15, %v850_v17 }
  0xa7   : > { %v839_v7 = vadd.f32 %v4501_v3, %v838_v6 }
  0xa8   : > { %v852_v21 = vadd.f32 %v4503_v15, %v851_v18 }
  0xa9   : > { %v5445_v8 = vsel %vm840_vm1, %v4501_v3, %v839_v7  ;;  %s5016_s29 = scalar_lea.hbm %s6116_s7, 16 }
  0xaa   : > { %v5456_v22 = vsel %vm853_vm2, %v4503_v15, %v852_v21  ;;  %v4068_v15 = vadd.f32 -1.0, %v820_v14 }
  0xac   : > { %v5483_v16 = vmul.f32 1e+09, %v4068_v15 }
 0x10e   : > { %v834_v9 = vpop.xlane.xlu0 %833 }
 0x10f   : > { %v842_v10 = vmul.f32 %v5445_v8, %v834_v9 }
 0x111   : > { %v843_v11 = vsub.f32 %v5441_v0, %v842_v10 }
 0x113   : > { %v844_v12 = vmul.f32 %v843_v11, %v843_v11  ;;  %v871_v45 = vmul.f32 %v4466_v40, %v843_v11 }
 0x115   : > { %v845_v13 = vsel %vm831_vm0, %v844_v12, 0.0 }
 0x116   : > { %846 = vadd.xlane.f32.xlu0 %v845_v13 }
 0x189   : > { %v847_v23 = vpop.xlane.xlu0 %846 }
 0x18a   : > { %v855_v24 = vmul.f32 %v5456_v22, %v847_v23 }
 0x18c   : > { %4504 = vrsqrt.f32 %v855_v24  ;;  %vm863_vm3 = vcmp.eq.f32.partialorder %v855_v24, inf  ;;  %v866_v32 = vand.u32 2147483648, %v855_v24  ;;  %vm865_vm4 = vcmp.eq.f32.partialorder %v855_v24, 0.0 }
 0x192   : > { %v4505_v25 = vpop.eup %4504 }
 0x193   : > { %v857_v26 = vmul.f32 %v4505_v25, %v855_v24 }
 0x195   : > { %v858_v27 = vmul.f32 %v4505_v25, %v857_v26 }
 0x197   : > { %v859_v28 = vmul.f32 0.5, %v858_v27 }
 0x199   : > { %v860_v29 = vsub.f32 1.5, %v859_v28 }
 0x19b   : > { %v861_v30 = vmul.f32 %v4505_v25, %v860_v29 }
 0x19d   : > { %v862_v31 = vmul.f32 %v861_v30, %v855_v24 }
 0x19f   : > { %v864_v33 = vsel %vm863_vm3, %v855_v24, %v862_v31 }
 0x1a0   : > { %v867_v34 = vsel %vm865_vm4, %v866_v32, %v864_v33 }
 0x1a1   : > { %v872_v35 = vadd.f32 1e-06, %v867_v34 }
 0x1a3   : > { %4506 = vrcp.f32 %v872_v35  ;;  %v884_v39 = vand.u32 2147483648, %v872_v35  ;;  %v882_v42 = vand.u32 2147483647, %v872_v35  ;;  %vm878_vm6 = vweird.f32 %v872_v35 }
 0x1a5   : > { %v885_v44 = vor.u32 1.1754944e-38, %v884_v39  ;;  %vm883_vm8 = vcmp.eq.f32.partialorder %v882_v42, 8.507059e+37 }
 0x1a9   : > { %v4507_v36 = vpop.eup %4506 }
 0x1aa   : > { %v874_v37 = vmul.f32 %v4507_v36, %v872_v35  ;;  %vm879_vm5 = vweird.f32 %v4507_v36 }
 0x1ab   : > { %vm880_vm7 = vmor %vm878_vm6, %vm879_vm5 }
 0x1ac   : > { %v875_v38 = vsub.f32 1.0, %v874_v37 }
 0x1ae   : > { %v876_v41 = vmul.f32 %v4507_v36, %v875_v38 }
 0x1b0   : > { %v877_v43 = vadd.f32 %v4507_v36, %v876_v41 }
 0x1b2   : > { %v881_v46 = vsel %vm880_vm7, %v4507_v36, %v877_v43 }
 0x1b3   : > { %v886_v48 = vsel %vm883_vm8, %v885_v44, %v881_v46  ;;  %vm1923_vm8 = vcmask 31744  }
 0x1b4   : > { %v887_v49 = vmul.f32 %v886_v48, %v871_v45 }
 0x1b6   : > { %v891_v50 = vadd.f32 %v4467_v47, %v887_v49 }
 0x1b8   : > { %v897_v51 = vpack.c.bf16 %v891_v50, %v891_v50 }
 0x1ba   : > { %4078 = vmatmul.msk.bf16.vlgmr.msra.gmra.mxu0 %vm831_vm0, %v897_v51 }
 0x237   : > { %v925_v53 = vpop.f32.mrf.mxu0 }
 0x238   : > { %v926_v54 = vadd.f32 %v4468_v52, %v925_v53 }
 0x23a   : > { %v929_v55 = vpack.c.bf16 %v926_v54, %v926_v54 }
 0x23c   : > { %940 = vrot.lane.b32.xlu2 %v929_v55, %s5103_s1  ;;  %936 = vrot.lane.b32.xlu1 %v929_v55, %s5104_s27  ;;  %v942_v57 = vunpack.c.l.b16 %v929_v55 }
 0x23e   : > { %v5463_v58 = vpack.c.b16 %v942_v57, %v942_v57 }
 0x23f   : > { %v927_v56 = vpop.f32.mrf.mxu0 }
 0x244   : > { %938 = vrot.lane.b32.xlu1 %v929_v55, %s5105_s22 }
 0x24c   : > { %944 = vrot.lane.b32.xlu1 %v5463_v58, %s5106_s2 }
 0x296   : > { %v941_v62 = vpop.permute.xlu2 %940 }
 0x297   : > { %v1012_v63 = vunpack.c.l.b16 %v941_v62 }
 0x299   : > { %v1013_v4 = vpack.c.b16 %v1012_v63, %v1012_v63 }
 0x2ae   : > { %v937_v59 = vpop.permute.xlu1 %936 }
 0x2af   : > { %v966_v60 = vunpack.c.l.b16 %v937_v59 }
 0x2b1   : > { %v5467_v61 = vpack.c.b16 %v966_v60, %v966_v60 }
 0x2b3   : > { %968 = vrot.lane.b32.xlu2 %v5467_v61, %s5106_s2 }
 0x2b6   : > { %v939_v1 = vpop.permute.xlu1 %938 }
 0x2b7   : > { %v989_v2 = vunpack.c.l.b16 %v939_v1 }
 0x2b9   : > { %v990_v3 = vpack.c.b16 %v989_v2, %v989_v2 }
 0x2bb   : > { %1014 = vrot.lane.b32.xlu2 %v1013_v4, %s5106_s2  ;;  %991 = vrot.lane.b32.xlu0 %v990_v3, %s5106_s2 }
 0x2be   : > { %v945_v5 = vpop.permute.xlu1 %944 }
 0x2bf   : > { %v951_v6 = vsel %vm946_vm9, %v945_v5, 0 }
 0x2c0   : > { %960 = vmatpush.bf16.xpose.msra.mxu1 %v951_v6 }
 0x2c7   : > { %4079 = vmatmul.msk.bf16.vlgmr.msra.gmra.mxu1 %vm946_vm9, %v929_v55 }
 0x30d   : > { %v969_v7 = vpop.permute.xlu2 %968 }
 0x30e   : > { %v974_v9 = vsel %vm946_vm9, %v969_v7, 0 }
 0x30f   : > { %983 = vmatpush.bf16.xpose.msra.mxu2 %v974_v9 }
 0x315   : > { %v1015_v10 = vpop.permute.xlu2 %1014 }
 0x316   : > { %4080 = vmatmul.msk.bf16.vlgmr.msra.gmra.mxu2 %vm946_vm9, %v937_v59  ;;  %v1020_v11 = vsel %vm946_vm9, %v1015_v10, 0 }
 0x317   : > { %1029 = vmatpush.bf16.xpose.msrb.mxu0 %v1020_v11 }
 0x31e   : > { %4082 = vmatmul.msk.bf16.vlgmr.msrb.gmra.mxu0 %vm946_vm9, %v941_v62 }
 0x32d   : > { %v992_v12 = vpop.permute.xlu0 %991 }
 0x32e   : > { %v997_v13 = vsel %vm946_vm9, %v992_v12, 0 }
 0x32f   : > { %1006 = vmatpush.bf16.xpose.msra.mxu3 %v997_v13 }
 0x336   : > { %4081 = vmatmul.msk.bf16.vlgmr.msra.gmra.mxu3 %vm946_vm9, %v939_v1 }
 0x344   : > { %v962_v17 = vpop.f32.mrf.mxu1 }
 0x345   : > { %v963_v18 = vadd.f32 %v962_v17, %v5483_v16  ;;  %v931_v17 = vld [vmem:[#allocation10 + $0x4] sm:$0xf] }
 0x347   : > { %v1035_v19 = vsel %vm946_vm9, %v963_v18, -inf }
 0x348   : > { %1036 = vmax.xlane.f32.xlu0 %v1035_v19  ;;  %v933_v19 = vld [vmem:[#allocation10 + $0xc] sm:$0xf] }
 0x34c   : > { %v964_v20 = vpop.f32.mrf.mxu1 }
 0x34d   : > { %v1233_v20 = vsel %vm1088_vm10, %v933_v19, 0 }
 0x35c   : > { %1126 = vrot.lane.b32.xlu0 %v990_v3, %s5107_s14 }
 0x364   : > { %1147 = vrot.lane.b32.xlu0 %v1013_v4, %s5107_s14 }
 0x399   : > { %v985_v21 = vpop.f32.mrf.mxu2 }
 0x39a   : > { %v986_v23 = vadd.f32 %v985_v21, %v5483_v16  ;;  %v930_v21 = vld [vmem:[#allocation10] sm:$0xf] }
 0x39b   : > { %v1031_v24 = vpop.f32.mrf.mxu0 }
 0x39c   : > { %v1038_v25 = vsel %vm946_vm9, %v986_v23, -inf  ;;  %v1032_v34 = vadd.f32 %v1031_v24, %v5483_v16  ;;  %v932_v24 = vld [vmem:[#allocation10 + $0x8] sm:$0xf] }
 0x39d   : > { %1039 = vmax.xlane.f32.xlu1 %v1038_v25  ;;  %v1214_v25 = vsel %vm1088_vm10, %v932_v24, 0 }
 0x39e   : > { %v1044_v36 = vsel %vm946_vm9, %v1032_v34, -inf }
 0x3a1   : > { %v987_v26 = vpop.f32.mrf.mxu2 }
 0x3a3   : > { %v1033_v27 = vpop.f32.mrf.mxu0 }
 0x3b9   : > { %v1008_v28 = vpop.f32.mrf.mxu3 }
 0x3ba   : > { %v1009_v29 = vadd.f32 %v1008_v28, %v5483_v16 }
 0x3bb   : > { %v1037_v30 = vpop.xlane.xlu0 %1036 }
 0x3bc   : > { %v1047_v31 = vsub.f32 %v963_v18, %v1037_v30  ;;  %v1041_v32 = vsel %vm946_vm9, %v1009_v29, -inf  ;;  %v1195_v18 = vsel %vm1088_vm10, %v931_v17, 0 }
 0x3bd   : > { %1042 = vmax.xlane.f32.xlu2 %v1041_v32 }
 0x3be   : > { %v1051_v33 = vmul.f32 1.442695, %v1047_v31 }
 0x3c0   : > { %4508 = vpow2.f32 %v1051_v33 }
 0x3c1   : > { %v1010_v35 = vpop.f32.mrf.mxu3 }
 0x3c5   : > { %1045 = vmax.xlane.f32.xlu2 %v1044_v36 }
 0x3c6   : > { %v4509_v37 = vpop.eup %4508 }
 0x3c7   : > { %v1059_v38 = vsel %vm946_vm9, %v4509_v37, 0.0 }
 0x3cd   : > { %1060 = vadd.xlane.f32.xlu2 %v1059_v38 }
 0x3ce   : > { %v1127_v39 = vpop.permute.xlu0 %1126 }
 0x3cf   : > { %v1132_v40 = vsel %vm1088_vm10, %v1127_v39, 0 }
 0x3d0   : > { %1141 = vmatpush.bf16.msrb.mxu3 %v1132_v40 }
 0x3d4   : > { %1223 = vmatpush.bf16.msra.mxu3 %v1214_v25  ;;  %v4470_v25 = vld [vmem:[#allocation17 + $0x1] ss:$0 sm:$0xff] }
 0x3d6   : > { %v1148_v41 = vpop.permute.xlu0 %1147 }
 0x3d7   : > { %v1153_v42 = vsel %vm1088_vm10, %v1148_v41, 0 }
 0x3d8   : > { %1162 = vmatpush.bf16.msra.mxu0 %v1153_v42 }
 0x3dc   : > { %1242 = vmatpush.bf16.msrb.mxu0 %v1233_v20 }
 0x410   : > { %v1040_v43 = vpop.xlane.xlu1 %1039 }
 0x411   : > { %v1048_v44 = vsub.f32 %v986_v23, %v1040_v43  ;;  %v1176_v23 = vsel %vm1088_vm10, %v930_v21, 0 }
 0x413   : > { %v1053_v45 = vmul.f32 1.442695, %v1048_v44 }
 0x415   : > { %4510 = vpow2.f32 %v1053_v45 }
 0x41b   : > { %v4511_v46 = vpop.eup %4510 }
 0x41c   : > { %v1062_v47 = vsel %vm946_vm9, %v4511_v46, 0.0 }
 0x41d   : > { %1063 = vadd.xlane.f32.xlu1 %v1062_v47 }
 0x430   : > { %v1043_v48 = vpop.xlane.xlu2 %1042 }
 0x431   : > { %v1049_v51 = vsub.f32 %v1009_v29, %v1043_v48 }
 0x433   : > { %v1055_v53 = vmul.f32 1.442695, %v1049_v51 }
 0x436   : > { %1105 = vrot.lane.b32.xlu1 %v5467_v61, %s5107_s14 }
 0x438   : > { %v1046_v49 = vpop.xlane.xlu2 %1045 }
 0x439   : > { %v1050_v50 = vsub.f32 %v1032_v34, %v1046_v49 }
 0x43b   : > { %v1057_v52 = vmul.f32 1.442695, %v1050_v50  ;;  %v4469_v50 = vld [vmem:[#allocation11] ss:$0 sm:$0xff] }
 0x43d   : > { %4512 = vpow2.f32 %v1057_v52 }
 0x43e   : > { %4514 = vpow2.f32 %v1055_v53 }
 0x440   : > { %v1061_v2 = vpop.xlane.xlu2 %1060 }
 0x443   : > { %v4513_v54 = vpop.eup %4512 }
 0x444   : > { %v1068_v55 = vsel %vm946_vm9, %v4513_v54, 0.0  ;;  %v4515_v56 = vpop.eup %4514 }
 0x445   : > { %1069 = vadd.xlane.f32.xlu2 %v1068_v55  ;;  %v1065_v57 = vsel %vm946_vm9, %v4515_v56, 0.0 }
 0x44d   : > { %1066 = vadd.xlane.f32.xlu2 %v1065_v57  ;;  %v4287_v57 = vld [vmem:[%s6033_s5 + $0x18] sm:$0xff] }
 0x465   : > { %1083 = vrot.lane.b32.xlu2 %v5463_v58, %s5107_s14 }
 0x46d   : > { %1352 = vrot.lane.b32.xlu2 %v4287_v57, %s5106_s2 }
 0x490   : > { %v1064_v59 = vpop.xlane.xlu1 %1063 }
 0x491   : > { %4516 = vrcp.f32 %v1064_v59  ;;  %v4286_v59 = vld [vmem:[%s6033_s5 + $0x10] sm:$0xff] }
 0x492   : > { %1350 = vrot.lane.b32.xlu2 %v4286_v59, %s5106_s2 }
 0x497   : > { %v4517_v60 = vpop.eup %4516 }
 0x498   : > { %v1076_v61 = vmul.f32 %v4517_v60, %v4511_v46 }
 0x49a   : > { %v1080_v1 = vpack.c.bf16 %v1076_v61, %v1076_v61 }
 0x4a8   : > { %v1106_v62 = vpop.permute.xlu1 %1105 }
 0x4a9   : > { %v1111_v63 = vsel %vm1088_vm10, %v1106_v62, 0 }
 0x4aa   : > { %1120 = vmatpush.bf16.msrb.mxu2 %v1111_v63 }
 0x4ad   : > { %4084 = vmatmul.msk.bf16.vlgmr.msrb.gmra.mxu2 %vm946_vm9, %v1080_v1 }
 0x4ae   : > { %1204 = vmatpush.bf16.msra.mxu2 %v1195_v18 }
 0x4b8   : > { %v1070_v3 = vpop.xlane.xlu2 %1069 }
 0x4b9   : > { %4518 = vrcp.f32 %v1070_v3  ;;  %v827_v3 = vld [vmem:[%s688_s28] sm:$0xff]  ;;  %s4281_s28 = sshll.u32 %s5222_s30, 3 }
 0x4ba   : > { %4520 = vrcp.f32 %v1061_v2 }
 0x4bf   : > { %v4519_v4 = vpop.eup %4518 }
 0x4c0   : > { %v1078_v5 = vmul.f32 %v4519_v4, %v4513_v54  ;;  %v1067_v6 = vpop.xlane.xlu2 %1066  ;;  %v4521_v7 = vpop.eup %4520  ;;  %v5541_v4 = vpack.c.bf16 %v827_v3, %v827_v3 }
 0x4c1   : > { %4522 = vrcp.f32 %v1067_v6  ;;  %v1075_v10 = vmul.f32 %v4521_v7, %v4509_v37 }
 0x4c2   : > { %v1082_v58 = vpack.c.bf16 %v1078_v5, %v1078_v5 }
 0x4c3   : > { %v1079_v15 = vpack.c.bf16 %v1075_v10, %v1075_v10 }
 0x4c4   : > { %4086 = vmatmul.msk.bf16.vlgmr.msra.gmra.mxu0 %vm946_vm9, %v1082_v58 }
 0x4c7   : > { %v4523_v9 = vpop.eup %4522 }
 0x4c8   : > { %v1084_v11 = vpop.permute.xlu2 %1083  ;;  %v1077_v12 = vmul.f32 %v4523_v9, %v4515_v56 }
 0x4c9   : > { %v1090_v13 = vsel %vm1088_vm10, %v1084_v11, 0 }
 0x4ca   : > { %1099 = vmatpush.bf16.msrb.mxu1 %v1090_v13  ;;  %v1081_v14 = vpack.c.bf16 %v1077_v12, %v1077_v12  ;;  %v4472_v12 = vld [vmem:[#allocation8 + $0x1] ss:$0 sm:$0xff] }
 0x4cb   : > { %1356 = vrot.lane.b32.xlu2 %v4472_v12, %s5106_s2 }
 0x4cc   : > { %4085 = vmatmul.msk.bf16.vlgmr.msrb.gmra.mxu3 %vm946_vm9, %v1081_v14 }
 0x4cd   : > { %4083 = vmatmul.msk.bf16.vlgmr.msrb.gmra.mxu1 %vm946_vm9, %v1079_v15 }
 0x4ce   : > { %1185 = vmatpush.bf16.msra.mxu1 %v1176_v23 }
 0x4d0   : > { %v1353_v1 = vpop.permute.xlu2 %1352 }
 0x4d1   : > { %1368 = vmatpush.bf16.msrb.mxu2 %v1353_v1 }
 0x4d2   : > { %1342 = vmatpush.bf16.msrb.mxu1 %v4287_v57  ;;  %v823_v57 = vld [vmem:[%s818_s23] sm:$0x1] }
 0x4d6   : > { %1343 = vmatpush.bf16.msrb.mxu1 %v4286_v59  ;;  %v4069_v59 = vadd.f32 -1.0, %v823_v57 }
 0x4ec   : > { %v1351_v2 = vpop.permute.xlu2 %1350 }
 0x4ed   : > { %1369 = vmatpush.bf16.msrb.mxu2 %v1351_v2 }
 0x530   : > { %v1122_v26 = vpop.f32.mrf.mxu2 }
 0x531   : > { %v1169_v27 = vpack.c.bf16 %v1122_v26, %v1122_v26 }
 0x533   : > { %4088 = vmatmul.msk.bf16.vlgmr.msra.gmra.mxu2 %vm946_vm9, %v1169_v27 }
 0x538   : > { %v1124_v28 = vpop.f32.mrf.mxu2 }
 0x541   : > { %v1164_v29 = vpop.f32.mrf.mxu0 }
 0x542   : > { %v1171_v30 = vpack.c.bf16 %v1164_v29, %v1164_v29 }
 0x543   : > { %4104 = vmatmul.msk.bf16.vlgmr.msrb.gmra.mxu2 %vm831_vm0, %v5541_v4 }
 0x544   : > { %4090 = vmatmul.msk.bf16.vlgmr.msrb.gmra.mxu0 %vm946_vm9, %v1171_v30 }
 0x549   : > { %v1166_v31 = vpop.f32.mrf.mxu0 }
 0x54a   : > { %v1101_v32 = vpop.f32.mrf.mxu1 }
 0x54b   : > { %v1168_v33 = vpack.c.bf16 %v1101_v32, %v1101_v32  ;;  %v4471_v32 = vld [vmem:[#allocation19 + $0x1] ss:$0 sm:$0xff] }
 0x54d   : > { %4087 = vmatmul.msk.bf16.vlgmr.msra.gmra.mxu1 %vm946_vm9, %v1168_v33 }
 0x54f   : > { %v1143_v34 = vpop.f32.mrf.mxu3 }
 0x550   : > { %v1170_v35 = vpack.c.bf16 %v1143_v34, %v1143_v34 }
 0x552   : > { %v1103_v36 = vpop.f32.mrf.mxu1  ;;  %4089 = vmatmul.msk.bf16.vlgmr.msra.gmra.mxu3 %vm946_vm9, %v1170_v35 }
 0x557   : > { %v1145_v37 = vpop.f32.mrf.mxu3 }
 0x5b6   : > { %v1206_v38 = vpop.f32.mrf.mxu2 }
 0x5b7   : > { %v1249_v45 = vsel %vm831_vm0, %v1206_v38, 0.0  ;;  %v1357_v38 = vpop.permute.xlu2 %1356 }
 0x5be   : > { %v1208_v39 = vpop.f32.mrf.mxu2 }
 0x5c1   : > { %v1244_v40 = vpop.f32.mrf.mxu0 }
 0x5c2   : > { %v1253_v51 = vsel %vm831_vm0, %v1244_v40, 0.0 }
 0x5c6   : > { %v1371_v37 = vpop.f32.mrf.mxu2 }
 0x5c7   : > { %v1372_v40 = vadd.f32 %v1371_v37, %v1357_v38 }
 0x5c9   : > { %v1246_v41 = vpop.f32.mrf.mxu0 }
 0x5ca   : > { %v1187_v42 = vpop.f32.mrf.mxu1  ;;  %v5548_v41 = vpack.c.bf16 %v1372_v40, %v1372_v40 }
 0x5cb   : > { %v1248_v43 = vsel %vm831_vm0, %v1187_v42, 0.0 }
 0x5cc   : > { %v1250_v46 = vadd.f32 %v1249_v45, %v1248_v43  ;;  %v1405_v42 = vsel %vm946_vm9, %v5548_v41, 0 }
 0x5cd   : > { %1414 = vmatpush.bf16.xpose.msrb.mxu3 %v1405_v42 }
 0x5ce   : > { %v1373_v39 = vpop.f32.mrf.mxu2 }
 0x5d2   : > { %v1189_v44 = vpop.f32.mrf.mxu1 }
 0x5d5   : > { %v1225_v47 = vpop.f32.mrf.mxu3 }
 0x5d6   : > { %v1251_v48 = vsel %vm831_vm0, %v1225_v47, 0.0 }
 0x5d7   : > { %v1252_v49 = vadd.f32 %v1251_v48, %v1250_v46 }
 0x5d9   : > { %v1254_v52 = vadd.f32 %v1253_v51, %v1252_v49 }
 0x5db   : > { %v1258_v53 = vadd.f32 %v4469_v50, %v1254_v52 }
 0x5dd   : > { %v1227_v54 = vpop.f32.mrf.mxu3  ;;  %v5524_v55 = vadd.f32 %v1258_v53, %v5441_v0 }
 0x5df   : > { %v1264_v56 = vsel %vm831_vm0, %v5524_v55, 0.0 }
 0x5e0   : > { %1265 = vadd.xlane.f32.xlu1 %v1264_v56 }
 0x5f9   : > { %1396 = vrot.lane.b32.xlu1 %v5548_v41, %s5103_s1 }
 0x653   : > { %v1266_v0 = vpop.xlane.xlu1 %1265 }
 0x654   : > { %v1267_v60 = vmul.f32 %v1266_v0, %v5445_v8  ;;  %v825_v0 = vmul.f32 1e+09, %v4069_v59  ;;  %v1378_v59 = vld [vmem:[#allocation10 + $0x10] sm:$0xf] }
 0x656   : > { %v1268_v61 = vsub.f32 %v5524_v55, %v1267_v60  ;;  %v5582_v60 = vperm.slane %v825_v0, 0 }
 0x658   : > { %v1269_v62 = vmul.f32 %v1268_v61, %v1268_v61  ;;  %v1289_v30 = vmul.f32 %v4470_v25, %v1268_v61 }
 0x65a   : > { %v1270_v63 = vsel %vm831_vm0, %v1269_v62, 0.0 }
 0x65b   : > { %1271 = vadd.xlane.f32.xlu0 %v1270_v63 }
 0x66b   : > { %v5564_v48 = vpop.permute.xlu1 %1396 }
 0x66c   : > { %v1462_v50 = vsel %vm946_vm9, %v5564_v48, 0 }
 0x66d   : > { %1471 = vmatpush.bf16.xpose.msra.mxu2 %v1462_v50 }
 0x66f   : > { %1392 = vrot.lane.b32.xlu0 %v5548_v41, %s5104_s27 }
 0x6ce   : > { %v1272_v5 = vpop.xlane.xlu0 %1271 }
 0x6cf   : > { %v1273_v6 = vmul.f32 %v1272_v5, %v5456_v22 }
 0x6d1   : > { %4524 = vrsqrt.f32 %v1273_v6  ;;  %vm1281_vm11 = vcmp.eq.f32.partialorder %v1273_v6, inf  ;;  %v1284_v15 = vand.u32 2147483648, %v1273_v6  ;;  %vm1283_vm12 = vcmp.eq.f32.partialorder %v1273_v6, 0.0 }
 0x6d7   : > { %v4525_v58 = vpop.eup %4524 }
 0x6d8   : > { %v1275_v7 = vmul.f32 %v4525_v58, %v1273_v6 }
 0x6da   : > { %v1276_v9 = vmul.f32 %v4525_v58, %v1275_v7 }
 0x6dc   : > { %v1277_v10 = vmul.f32 0.5, %v1276_v9 }
 0x6de   : > { %v1278_v11 = vsub.f32 1.5, %v1277_v10 }
 0x6e0   : > { %v1279_v13 = vmul.f32 %v4525_v58, %v1278_v11 }
 0x6e1   : > { %v5562_v47 = vpop.permute.xlu0 %1392 }
 0x6e2   : > { %v1280_v14 = vmul.f32 %v1279_v13, %v1273_v6  ;;  %v1424_v49 = vsel %vm946_vm9, %v5562_v47, 0 }
 0x6e3   : > { %1433 = vmatpush.bf16.xpose.msra.mxu0 %v1424_v49 }
 0x6e4   : > { %v1282_v17 = vsel %vm1281_vm11, %v1273_v6, %v1280_v14  ;;  %vm1979_vm11 = vcmask 1041408  }
 0x6e5   : > { %v1285_v18 = vsel %vm1283_vm12, %v1284_v15, %v1282_v17 }
 0x6e6   : > { %v1290_v19 = vadd.f32 1e-06, %v1285_v18 }
 0x6e8   : > { %4526 = vrcp.f32 %v1290_v19  ;;  %v1302_v24 = vand.u32 2147483648, %v1290_v19  ;;  %v1300_v27 = vand.u32 2147483647, %v1290_v19  ;;  %vm1296_vm14 = vweird.f32 %v1290_v19 }
 0x6ea   : > { %v1303_v29 = vor.u32 1.1754944e-38, %v1302_v24  ;;  %vm1301_vm1 = vcmp.eq.f32.partialorder %v1300_v27, 8.507059e+37 }
 0x6ee   : > { %v4527_v20 = vpop.eup %4526 }
 0x6ef   : > { %v1292_v21 = vmul.f32 %v4527_v20, %v1290_v19  ;;  %vm1297_vm13 = vweird.f32 %v4527_v20  ;;  %v1525_v19 = vunpack.c.l.b16 %v5548_v41 }
 0x6f0   : > { %vm1298_vm15 = vmor %vm1296_vm14, %vm1297_vm13 }
 0x6f1   : > { %v1293_v23 = vsub.f32 1.0, %v1292_v21  ;;  %v1526_v21 = vpack.c.b16 %v1525_v19, %v1525_v19  ;;  %v1381_v19 = vld [vmem:[#allocation10 + $0x1c] sm:$0xf] }
 0x6f3   : > { %v1294_v26 = vmul.f32 %v4527_v20, %v1293_v23 }
 0x6f5   : > { %v1295_v28 = vadd.f32 %v4527_v20, %v1294_v26 }
 0x6f7   : > { %v1299_v31 = vsel %vm1298_vm15, %v4527_v20, %v1295_v28 }
 0x6f8   : > { %v1304_v33 = vsel %vm1301_vm1, %v1303_v29, %v1299_v31 }
 0x6f9   : > { %v1305_v34 = vmul.f32 %v1304_v33, %v1289_v30 }
 0x6fb   : > { %v1309_v35 = vadd.f32 %v4471_v32, %v1305_v34 }
 0x6fd   : > { %v1317_v36 = vpack.c.bf16 %v1309_v35, %v1309_v35 }
 0x6ff   : > { %4103 = vmatmul.msk.bf16.vlgmr.msrb.gmra.mxu1 %vm831_vm0, %v1317_v36 }
 0x77c   : > { %v1345_v43 = vpop.f32.mrf.mxu1 }
 0x77d   : > { %v1346_v44 = vadd.f32 %v4472_v12, %v1345_v43 }
 0x77f   : > { %v1375_v45 = vpack.c.bf16 %v1346_v44, %v1346_v44 }
 0x781   : > { %1387 = vrot.lane.b32.xlu1 %v1375_v45, %s5105_s22  ;;  %1389 = vrot.lane.b32.xlu2 %v1375_v45, %s5103_s1 }
 0x782   : > { %4105 = vmatmul.msk.bf16.vlgmr.msrb.gmra.mxu3 %vm946_vm9, %v1375_v45 }
 0x784   : > { %v1347_v46 = vpop.f32.mrf.mxu1 }
 0x789   : > { %1394 = vrot.lane.b32.xlu2 %v5548_v41, %s5105_s22  ;;  %v1594_v41 = vunpack.c.l.b16 %v5564_v48 }
 0x78b   : > { %v1595_v42 = vpack.c.b16 %v1594_v41, %v1594_v41 }
 0x791   : > { %1385 = vrot.lane.b32.xlu2 %v1375_v45, %s5104_s27 }
 0x7db   : > { %v1390_v51 = vpop.permute.xlu2 %1389 }
 0x7dc   : > { %4108 = vmatmul.msk.bf16.vlgmr.msra.gmra.mxu2 %vm946_vm9, %v1390_v51 }
 0x7e3   : > { %v1395_v52 = vpop.permute.xlu2 %1394 }
 0x7e4   : > { %v1443_v53 = vsel %vm946_vm9, %v1395_v52, 0  ;;  %v1571_v24 = vunpack.c.l.b16 %v1395_v52 }
 0x7e5   : > { %1452 = vmatpush.bf16.xpose.msra.mxu1 %v1443_v53  ;;  %v1548_v53 = vunpack.c.l.b16 %v5562_v47 }
 0x7e6   : > { %v1572_v25 = vpack.c.b16 %v1571_v24, %v1571_v24 }
 0x7e7   : > { %v1549_v48 = vpack.c.b16 %v1548_v53, %v1548_v53  ;;  %v4288_v53 = vld [vmem:[%s6033_s5 + $0x20] sm:$0xff] }
 0x7eb   : > { %v1386_v54 = vpop.permute.xlu2 %1385 }
 0x7ec   : > { %4106 = vmatmul.msk.bf16.vlgmr.msra.gmra.mxu0 %vm946_vm9, %v1386_v54 }
 0x7f3   : > { %v1388_v56 = vpop.permute.xlu1 %1387 }
 0x7f4   : > { %4107 = vmatmul.msk.bf16.vlgmr.msra.gmra.mxu1 %vm946_vm9, %v1388_v56 }
 0x805   : > { %v1416_v61 = vpop.f32.mrf.mxu3 }
 0x806   : > { %v1417_v62 = vadd.f32 %v1416_v61, %v5582_v60  ;;  %v1625_v61 = vsel %vm1088_vm10, %v1378_v59, 0 }
 0x808   : > { %v1477_v63 = vsel %vm946_vm9, %v1417_v62, -inf }
 0x809   : > { %1478 = vmax.xlane.f32.xlu0 %v1477_v63 }
 0x80d   : > { %v1418_v1 = vpop.f32.mrf.mxu3 }
 0x85f   : > { %v1473_v2 = vpop.f32.mrf.mxu2 }
 0x860   : > { %v1474_v3 = vadd.f32 %v1473_v2, %v5582_v60 }
 0x862   : > { %v1486_v5 = vsel %vm946_vm9, %v1474_v3, -inf }
 0x863   : > { %1487 = vmax.xlane.f32.xlu2 %v1486_v5 }
 0x867   : > { %v1475_v6 = vpop.f32.mrf.mxu2 }
 0x869   : > { %v1435_v58 = vpop.f32.mrf.mxu0 }
 0x86a   : > { %v1436_v7 = vadd.f32 %v1435_v58, %v5582_v60 }
 0x86c   : > { %v1480_v9 = vsel %vm946_vm9, %v1436_v7, -inf }
 0x86d   : > { %1481 = vmax.xlane.f32.xlu1 %v1480_v9 }
 0x871   : > { %v1437_v10 = vpop.f32.mrf.mxu0  ;;  %v1454_v11 = vpop.f32.mrf.mxu1 }
 0x872   : > { %v1455_v12 = vadd.f32 %v1454_v11, %v5582_v60 }
 0x874   : > { %v1483_v13 = vsel %vm946_vm9, %v1455_v12, -inf }
 0x875   : > { %1484 = vmax.xlane.f32.xlu0 %v1483_v13 }
 0x879   : > { %v1456_v14 = vpop.f32.mrf.mxu1 }
 0x87a   : > { %v1380_v14 = vld [vmem:[#allocation10 + $0x18] sm:$0xf] }
 0x87c   : > { %v1479_v15 = vpop.xlane.xlu0 %1478 }
 0x87d   : > { %v1489_v17 = vsub.f32 %v1417_v62, %v1479_v15  ;;  %v1663_v15 = vsel %vm1088_vm10, %v1380_v14, 0 }
 0x87f   : > { %v1493_v18 = vmul.f32 1.442695, %v1489_v17  ;;  %v1379_v17 = vld [vmem:[#allocation10 + $0x14] sm:$0xf] }
 0x881   : > { %4528 = vpow2.f32 %v1493_v18  ;;  %v1644_v18 = vsel %vm1088_vm10, %v1379_v17, 0 }
 0x887   : > { %v4529_v20 = vpop.eup %4528 }
 0x888   : > { %v1501_v23 = vsel %vm946_vm9, %v4529_v20, 0.0 }
 0x889   : > { %1502 = vadd.xlane.f32.xlu2 %v1501_v23  ;;  %1527 = vrot.lane.b32.xlu0 %v1526_v21, %s5106_s2 }
 0x891   : > { %1573 = vrot.lane.b32.xlu0 %v1572_v25, %s5106_s2 }
 0x8d6   : > { %v1488_v26 = vpop.xlane.xlu2 %1487 }
 0x8d7   : > { %v1492_v27 = vsub.f32 %v1474_v3, %v1488_v26 }
 0x8d9   : > { %v1499_v28 = vmul.f32 1.442695, %v1492_v27 }
 0x8db   : > { %4530 = vpow2.f32 %v1499_v28 }
 0x8e0   : > { %v1482_v29 = vpop.xlane.xlu1 %1481 }
 0x8e1   : > { %v4531_v30 = vpop.eup %4530  ;;  %v1490_v31 = vsub.f32 %v1436_v7, %v1482_v29 }
 0x8e2   : > { %v1510_v32 = vsel %vm946_vm9, %v4531_v30, 0.0 }
 0x8e3   : > { %v1495_v33 = vmul.f32 1.442695, %v1490_v31  ;;  %1511 = vadd.xlane.f32.xlu1 %v1510_v32 }
 0x8e5   : > { %4532 = vpow2.f32 %v1495_v33 }
 0x8e8   : > { %v1485_v34 = vpop.xlane.xlu0 %1484 }
 0x8e9   : > { %v1491_v35 = vsub.f32 %v1455_v12, %v1485_v34 }
 0x8eb   : > { %v4533_v36 = vpop.eup %4532  ;;  %v1497_v37 = vmul.f32 1.442695, %v1491_v35 }
 0x8ec   : > { %v1504_v38 = vsel %vm946_vm9, %v4533_v36, 0.0 }
 0x8ed   : > { %4534 = vpow2.f32 %v1497_v37  ;;  %1505 = vadd.xlane.f32.xlu2 %v1504_v38 }
 0x8f3   : > { %v4535_v39 = vpop.eup %4534 }
 0x8f4   : > { %v1507_v40 = vsel %vm946_vm9, %v4535_v39, 0.0 }
 0x8f5   : > { %1508 = vadd.xlane.f32.xlu2 %v1507_v40 }
 0x8fb   : > { %v1528_v43 = vpop.permute.xlu0 %1527 }
 0x8fc   : > { %v1503_v44 = vpop.xlane.xlu2 %1502  ;;  %v1533_v45 = vsel %vm1088_vm10, %v1528_v43, 0  ;;  %1596 = vrot.lane.b32.xlu1 %v1595_v42, %s5106_s2  ;;  %v4473_v43 = vld [vmem:[#allocation11 + $0x1] ss:$0 sm:$0xff] }
 0x8fd   : > { %4536 = vrcp.f32 %v1503_v44  ;;  %1542 = vmatpush.bf16.msra.mxu3 %v1533_v45 }
 0x901   : > { %1634 = vmatpush.bf16.msrb.mxu3 %v1625_v61 }
 0x903   : > { %v4537_v46 = vpop.eup %4536  ;;  %v1574_v49 = vpop.permute.xlu0 %1573 }
 0x904   : > { %v1517_v50 = vmul.f32 %v4537_v46, %v4529_v20  ;;  %v1579_v51 = vsel %vm1088_vm10, %v1574_v49, 0  ;;  %v1682_v20 = vsel %vm1088_vm10, %v1381_v19, 0  ;;  %v4474_v19 = vld [vmem:[#allocation17 + $0x2] ss:$0 sm:$0xff] }
 0x905   : > { %1588 = vmatpush.bf16.msrb.mxu1 %v1579_v51 }
 0x906   : > { %v1521_v52 = vpack.c.bf16 %v1517_v50, %v1517_v50 }
 0x908   : > { %4109 = vmatmul.msk.bf16.vlgmr.msra.gmra.mxu3 %vm946_vm9, %v1521_v52  ;;  %v4289_v52 = vld [vmem:[%s6033_s5 + $0x28] sm:$0xff] }
 0x909   : > { %1672 = vmatpush.bf16.msra.mxu1 %v1663_v15  ;;  %1791 = vmatpush.bf16.msra.mxu3 %v4289_v52 }
 0x90d   : > { %1550 = vrot.lane.b32.xlu2 %v1549_v48, %s5106_s2  ;;  %1792 = vmatpush.bf16.msra.mxu3 %v4288_v53 }
 0x915   : > { %1801 = vrot.lane.b32.xlu2 %v4289_v52, %s5106_s2 }
 0x91d   : > { %1799 = vrot.lane.b32.xlu2 %v4288_v53, %s5106_s2 }
 0x956   : > { %v1512_v56 = vpop.xlane.xlu1 %1511 }
 0x957   : > { %4538 = vrcp.f32 %v1512_v56 }
 0x95d   : > { %v4539_v0 = vpop.eup %4538 }
 0x95e   : > { %v1520_v63 = vmul.f32 %v4539_v0, %v4531_v30  ;;  %v828_v0 = vld [vmem:[%s815_s17] sm:$0xf]  ;;  %s3810_s17 = scalar_lea.hbm %s6116_s7, %s4281_s28 }
 0x95f   : > { %s3814_s19 = sshll.u32 %s3810_s17, 4  ;;  %s3815_s19 = int_to_ptr.hbm [resolvable:$true] %s3814_s19 }
 0x960   : > { %v1506_v54 = vpop.xlane.xlu2 %1505  ;;  %v1524_v58 = vpack.c.bf16 %v1520_v63, %v1520_v63 }
 0x961   : > { %4540 = vrcp.f32 %v1506_v54 }
 0x967   : > { %v4541_v62 = vpop.eup %4540 }
 0x968   : > { %v1509_v57 = vpop.xlane.xlu2 %1508  ;;  %v1518_v2 = vmul.f32 %v4541_v62, %v4533_v36 }
 0x969   : > { %4542 = vrcp.f32 %v1509_v57 }
 0x96a   : > { %v1522_v10 = vpack.c.bf16 %v1518_v2, %v1518_v2 }
 0x96e   : > { %v1597_v1 = vpop.permute.xlu1 %1596 }
 0x96f   : > { %v4543_v47 = vpop.eup %4542  ;;  %v1602_v3 = vsel %vm1088_vm10, %v1597_v1, 0  ;;  %v5644_v1 = vpack.c.bf16 %v828_v0, %v828_v0 }
 0x970   : > { %v1519_v5 = vmul.f32 %v4543_v47, %v4535_v39  ;;  %v1551_v6 = vpop.permute.xlu2 %1550  ;;  %1611 = vmatpush.bf16.msrb.mxu2 %v1602_v3 }
 0x971   : > { %v1556_v7 = vsel %vm1088_vm10, %v1551_v6, 0 }
 0x972   : > { %v1523_v9 = vpack.c.bf16 %v1519_v5, %v1519_v5  ;;  %1565 = vmatpush.bf16.msrb.mxu0 %v1556_v7 }
 0x973   : > { %4112 = vmatmul.msk.bf16.vlgmr.msrb.gmra.mxu2 %vm946_vm9, %v1524_v58  ;;  %v4476_v58 = vld [vmem:[#allocation8 + $0x2] ss:$0 sm:$0xff] }
 0x974   : > { %4111 = vmatmul.msk.bf16.vlgmr.msrb.gmra.mxu1 %vm946_vm9, %v1523_v9  ;;  %1691 = vmatpush.bf16.msra.mxu2 %v1682_v20 }
 0x975   : > { %4110 = vmatmul.msk.bf16.vlgmr.msrb.gmra.mxu0 %vm946_vm9, %v1522_v10  ;;  %1805 = vrot.lane.b32.xlu2 %v4476_v58, %s5106_s2 }
 0x976   : > { %1653 = vmatpush.bf16.msra.mxu0 %v1644_v18 }
 0x978   : > { %v1802_v59 = vpop.permute.xlu2 %1801 }
 0x97a   : > { %1817 = vmatpush.bf16.msrb.mxu0 %v1802_v59 }
 0x980   : > { %v1800_v63 = vpop.permute.xlu2 %1799 }
 0x981   : > { %1818 = vmatpush.bf16.msrb.mxu0 %v1800_v63 }
 0x98b   : > { %v1544_v11 = vpop.f32.mrf.mxu3 }
 0x98c   : > { %v1617_v12 = vpack.c.bf16 %v1544_v11, %v1544_v11 }
 0x98e   : > { %4113 = vmatmul.msk.bf16.vlgmr.msrb.gmra.mxu3 %vm946_vm9, %v1617_v12 }
 0x993   : > { %v1546_v13 = vpop.f32.mrf.mxu3 }
 0x9f1   : > { %v1590_v21 = vpop.f32.mrf.mxu1 }
 0x9f2   : > { %v1619_v23 = vpack.c.bf16 %v1590_v21, %v1590_v21  ;;  %v1567_v24 = vpop.f32.mrf.mxu0 }
 0x9f3   : > { %v1618_v25 = vpack.c.bf16 %v1567_v24, %v1567_v24 }
 0x9f4   : > { %4115 = vmatmul.msk.bf16.vlgmr.msra.gmra.mxu1 %vm946_vm9, %v1619_v23 }
 0x9f5   : > { %4114 = vmatmul.msk.bf16.vlgmr.msra.gmra.mxu0 %vm946_vm9, %v1618_v25 }
 0x9f6   : > { %v1613_v26 = vpop.f32.mrf.mxu2 }
 0x9f7   : > { %v1620_v27 = vpack.c.bf16 %v1613_v26, %v1613_v26 }
 0x9f9   : > { %v1592_v28 = vpop.f32.mrf.mxu1  ;;  %4116 = vmatmul.msk.bf16.vlgmr.msra.gmra.mxu2 %vm946_vm9, %v1620_v27  ;;  %v4475_v27 = vld [vmem:[#allocation19 + $0x2] ss:$0 sm:$0xff] }
 0x9fa   : > { %v1569_v29 = vpop.f32.mrf.mxu0 }
 0x9fe   : > { %v1615_v30 = vpop.f32.mrf.mxu2 }
 0xa05   : > { %4130 = vmatmul.msk.bf16.vlgmr.msrb.gmra.mxu0 %vm831_vm0, %v5644_v1 }
 0xa11   : > { %v1636_v31 = vpop.f32.mrf.mxu3 }
 0xa12   : > { %v1697_v36 = vsel %vm831_vm0, %v1636_v31, 0.0 }
 0xa19   : > { %v1638_v32 = vpop.f32.mrf.mxu3 }
 0xa1a   : > { %v1806_v32 = vpop.permute.xlu2 %1805 }
 0xa71   : > { %v1674_v33 = vpop.f32.mrf.mxu1 }
 0xa72   : > { %v1655_v34 = vpop.f32.mrf.mxu0  ;;  %v1700_v40 = vsel %vm831_vm0, %v1674_v33, 0.0 }
 0xa73   : > { %v1698_v35 = vsel %vm831_vm0, %v1655_v34, 0.0 }
 0xa74   : > { %v1699_v37 = vadd.f32 %v1698_v35, %v1697_v36 }
 0xa76   : > { %v1701_v42 = vadd.f32 %v1700_v40, %v1699_v37 }
 0xa79   : > { %v1676_v38 = vpop.f32.mrf.mxu1 }
 0xa7a   : > { %v1657_v39 = vpop.f32.mrf.mxu0 }
 0xa7c   : > { %v1693_v41 = vpop.f32.mrf.mxu2 }
 0xa7d   : > { %v1702_v44 = vsel %vm831_vm0, %v1693_v41, 0.0 }
 0xa7e   : > { %v1703_v45 = vadd.f32 %v1702_v44, %v1701_v42 }
 0xa80   : > { %v1707_v46 = vadd.f32 %v4473_v43, %v1703_v45 }
 0xa82   : > { %v5624_v49 = vadd.f32 %v1707_v46, %v5524_v55  ;;  %v1820_v33 = vpop.f32.mrf.mxu0 }
 0xa83   : > { %v1821_v34 = vadd.f32 %v1820_v33, %v1806_v32 }
 0xa84   : > { %v1695_v50 = vpop.f32.mrf.mxu2  ;;  %v1713_v51 = vsel %vm831_vm0, %v5624_v49, 0.0 }
 0xa85   : > { %1714 = vadd.xlane.f32.xlu0 %v1713_v51  ;;  %v5650_v35 = vpack.c.bf16 %v1821_v34, %v1821_v34 }
 0xa87   : > { %1841 = vrot.lane.b32.xlu2 %v5650_v35, %s5104_s27  ;;  %v1851_v36 = vsel %vm946_vm9, %v5650_v35, 0 }
 0xa88   : > { %1860 = vmatpush.bf16.xpose.msrb.mxu1 %v1851_v36 }
 0xa8a   : > { %v1822_v37 = vpop.f32.mrf.mxu0 }
 0xa8b   : > { %v1972_v37 = vunpack.c.l.b16 %v5650_v35 }
 0xa99   : > { %1843 = vrot.lane.b32.xlu0 %v5650_v35, %s5105_s22 }
 0xae1   : > { %v1842_v42 = vpop.permute.xlu2 %1841 }
 0xae2   : > { %v1870_v43 = vsel %vm946_vm9, %v1842_v42, 0 }
 0xae3   : > { %1879 = vmatpush.bf16.xpose.msrb.mxu2 %v1870_v43 }
 0xaf8   : > { %v1715_v55 = vpop.xlane.xlu0 %1714 }
 0xaf9   : > { %v1716_v48 = vmul.f32 %v1715_v55, %v5445_v8 }
 0xafb   : > { %v1717_v54 = vsub.f32 %v5624_v49, %v1716_v48 }
 0xafd   : > { %v1718_v56 = vmul.f32 %v1717_v54, %v1717_v54  ;;  %v1738_v25 = vmul.f32 %v4474_v19, %v1717_v54 }
 0xaff   : > { %v1719_v57 = vsel %vm831_vm0, %v1718_v56, 0.0  ;;  %v1996_v56 = vunpack.c.l.b16 %v1842_v42 }
 0xb00   : > { %1720 = vadd.xlane.f32.xlu1 %v1719_v57 }
 0xb01   : > { %v1997_v57 = vpack.c.b16 %v1996_v56, %v1996_v56 }
 0xb0b   : > { %v5665_v44 = vpop.permute.xlu0 %1843 }
 0xb0c   : > { %v1889_v45 = vsel %vm946_vm9, %v5665_v44, 0  ;;  %v2019_v32 = vunpack.c.l.b16 %v5665_v44 }
 0xb0d   : > { %1898 = vmatpush.bf16.xpose.msrb.mxu3 %v1889_v45 }
 0xb0e   : > { %v2020_v34 = vpack.c.b16 %v2019_v32, %v2019_v32  ;;  %v4477_v32 = vld [vmem:[#allocation11 + $0x2] ss:$0 sm:$0xff] }
 0xb73   : > { %v1721_v61 = vpop.xlane.xlu1 %1720 }
 0xb74   : > { %v1722_v62 = vmul.f32 %v1721_v61, %v5456_v22 }
 0xb76   : > { %4544 = vrsqrt.f32 %v1722_v62  ;;  %vm1730_vm2 = vcmp.eq.f32.partialorder %v1722_v62, inf  ;;  %v1733_v10 = vand.u32 2147483648, %v1722_v62  ;;  %vm1732_vm3 = vcmp.eq.f32.partialorder %v1722_v62, 0.0 }
 0xb7c   : > { %v4545_v47 = vpop.eup %4544 }
 0xb7d   : > { %v1724_v2 = vmul.f32 %v4545_v47, %v1722_v62 }
 0xb7f   : > { %v1725_v3 = vmul.f32 %v4545_v47, %v1724_v2 }
 0xb81   : > { %v1726_v5 = vmul.f32 0.5, %v1725_v3 }
 0xb83   : > { %v1727_v6 = vsub.f32 1.5, %v1726_v5 }
 0xb85   : > { %v1728_v7 = vmul.f32 %v4545_v47, %v1727_v6 }
 0xb87   : > { %v1729_v9 = vmul.f32 %v1728_v7, %v1722_v62 }
 0xb89   : > { %v1731_v11 = vsel %vm1730_vm2, %v1722_v62, %v1729_v9 }
 0xb8a   : > { %v1734_v12 = vsel %vm1732_vm3, %v1733_v10, %v1731_v11  ;;  %vm2282_vm3 = vcmask 523264  }
 0xb8b   : > { %v1739_v13 = vadd.f32 1e-06, %v1734_v12 }
 0xb8d   : > { %4546 = vrcp.f32 %v1739_v13  ;;  %v1751_v18 = vand.u32 2147483648, %v1739_v13  ;;  %v1749_v21 = vand.u32 2147483647, %v1739_v13  ;;  %vm1745_vm5 = vweird.f32 %v1739_v13 }
 0xb8f   : > { %v1752_v24 = vor.u32 1.1754944e-38, %v1751_v18  ;;  %vm1750_vm7 = vcmp.eq.f32.partialorder %v1749_v21, 8.507059e+37 }
 0xb93   : > { %v4547_v14 = vpop.eup %4546 }
 0xb94   : > { %v1741_v15 = vmul.f32 %v4547_v14, %v1739_v13  ;;  %vm1746_vm4 = vweird.f32 %v4547_v14 }
 0xb95   : > { %vm1747_vm6 = vmor %vm1745_vm5, %vm1746_vm4 }
 0xb96   : > { %v1742_v17 = vsub.f32 1.0, %v1741_v15 }
 0xb98   : > { %v1743_v20 = vmul.f32 %v4547_v14, %v1742_v17 }
 0xb9a   : > { %v1744_v23 = vadd.f32 %v4547_v14, %v1743_v20 }
 0xb9c   : > { %v1748_v26 = vsel %vm1747_vm6, %v4547_v14, %v1744_v23 }
 0xb9d   : > { %v1753_v28 = vsel %vm1750_vm7, %v1752_v24, %v1748_v26 }
 0xb9e   : > { %v1754_v29 = vmul.f32 %v1753_v28, %v1738_v25 }
 0xba0   : > { %v1758_v30 = vadd.f32 %v4475_v27, %v1754_v29 }
 0xba2   : > { %v1766_v31 = vpack.c.bf16 %v1758_v30, %v1758_v30 }
 0xba4   : > { %4129 = vmatmul.msk.bf16.vlgmr.msra.gmra.mxu3 %vm831_vm0, %v1766_v31 }
 0xc27   : > { %v1794_v38 = vpop.f32.mrf.mxu3 }
 0xc28   : > { %v1795_v39 = vadd.f32 %v4476_v58, %v1794_v38  ;;  %v1973_v38 = vpack.c.b16 %v1972_v37, %v1972_v37 }
 0xc2a   : > { %v1824_v40 = vpack.c.bf16 %v1795_v39, %v1795_v39 }
 0xc2c   : > { %1836 = vrot.lane.b32.xlu1 %v1824_v40, %s5105_s22  ;;  %1834 = vrot.lane.b32.xlu2 %v1824_v40, %s5104_s27 }
 0xc2d   : > { %4131 = vmatmul.msk.bf16.vlgmr.msrb.gmra.mxu1 %vm946_vm9, %v1824_v40 }
 0xc2f   : > { %v1796_v41 = vpop.f32.mrf.mxu3 }
 0xc34   : > { %1845 = vrot.lane.b32.xlu2 %v5650_v35, %s5103_s1 }
 0xc3c   : > { %1838 = vrot.lane.b32.xlu2 %v1824_v40, %s5103_s1 }
 0xc86   : > { %v1835_v46 = vpop.permute.xlu2 %1834 }
 0xc87   : > { %4132 = vmatmul.msk.bf16.vlgmr.msrb.gmra.mxu2 %vm946_vm9, %v1835_v46 }
 0xc8e   : > { %v1846_v50 = vpop.permute.xlu2 %1845 }
 0xc8f   : > { %v1908_v51 = vsel %vm946_vm9, %v1846_v50, 0  ;;  %v2042_v59 = vunpack.c.l.b16 %v1846_v50 }
 0xc90   : > { %1917 = vmatpush.bf16.xpose.msra.mxu0 %v1908_v51 }
 0xc91   : > { %v2043_v0 = vpack.c.b16 %v2042_v59, %v2042_v59 }
 0xc96   : > { %v1839_v52 = vpop.permute.xlu2 %1838 }
 0xc97   : > { %4134 = vmatmul.msk.bf16.vlgmr.msra.gmra.mxu0 %vm946_vm9, %v1839_v52 }
 0xc9e   : > { %v1837_v53 = vpop.permute.xlu1 %1836 }
 0xc9f   : > { %4133 = vmatmul.msk.bf16.vlgmr.msrb.gmra.mxu3 %vm946_vm9, %v1837_v53 }
 0xcaa   : > { %v1862_v55 = vpop.f32.mrf.mxu1 }
 0xcab   : > { %v1924_v48 = vsel %vm1923_vm8, %v1862_v55, -inf }
 0xcac   : > { %1925 = vmax.xlane.f32.xlu1 %v1924_v48 }
 0xcb2   : > { %v1864_v54 = vpop.f32.mrf.mxu1 }
 0xcc5   : > { %1998 = vrot.lane.b32.xlu1 %v1997_v57, %s5106_s2 }
 0xccd   : > { %2044 = vrot.lane.b32.xlu1 %v2043_v0, %s5106_s2 }
 0xd0a   : > { %v1881_v61 = vpop.f32.mrf.mxu2 }
 0xd0b   : > { %v1927_v62 = vsel %vm1923_vm8, %v1881_v61, -inf }
 0xd0c   : > { %1928 = vmax.xlane.f32.xlu0 %v1927_v62 }
 0xd12   : > { %v1883_v63 = vpop.f32.mrf.mxu2 }
 0xd13   : > { %v1830_v63 = vld [vmem:[#allocation10 + $0x2c] sm:$0xf] }
 0xd14   : > { %v1919_v47 = vpop.f32.mrf.mxu0 }
 0xd15   : > { %v1933_v2 = vsel %vm1923_vm8, %v1919_v47, -inf }
 0xd16   : > { %1934 = vmax.xlane.f32.xlu0 %v1933_v2  ;;  %v1829_v2 = vld [vmem:[#allocation10 + $0x28] sm:$0xf] }
 0xd1c   : > { %v1921_v3 = vpop.f32.mrf.mxu0 }
 0xd1d   : > { %v2111_v3 = vsel %vm1088_vm10, %v1829_v2, 0 }
 0xd1f   : > { %v1926_v5 = vpop.xlane.xlu1 %1925 }
 0xd20   : > { %v1936_v6 = vsub.f32 %v1862_v55, %v1926_v5  ;;  %v1827_v5 = vld [vmem:[#allocation10 + $0x20] sm:$0xf] }
 0xd22   : > { %v1940_v58 = vmul.f32 1.442695, %v1936_v6  ;;  %v1900_v7 = vpop.f32.mrf.mxu3  ;;  %v2073_v6 = vsel %vm1088_vm10, %v1827_v5, 0 }
 0xd23   : > { %v1930_v9 = vsel %vm1923_vm8, %v1900_v7, -inf }
 0xd24   : > { %4548 = vpow2.f32 %v1940_v58  ;;  %1931 = vmax.xlane.f32.xlu2 %v1930_v9 }
 0xd2a   : > { %v4549_v10 = vpop.eup %4548  ;;  %v1902_v11 = vpop.f32.mrf.mxu3 }
 0xd2b   : > { %v1948_v12 = vsel %vm1923_vm8, %v4549_v10, 0.0 }
 0xd2c   : > { %1949 = vadd.xlane.f32.xlu0 %v1948_v12 }
 0xd37   : > { %v1999_v13 = vpop.permute.xlu1 %1998 }
 0xd38   : > { %v2004_v14 = vsel %vm1979_vm11, %v1999_v13, 0 }
 0xd39   : > { %2013 = vmatpush.bf16.msra.mxu2 %v2004_v14 }
 0xd3f   : > { %v2045_v15 = vpop.permute.xlu1 %2044 }
 0xd40   : > { %v2050_v17 = vsel %vm1979_vm11, %v2045_v15, 0 }
 0xd41   : > { %2059 = vmatpush.bf16.msrb.mxu0 %v2050_v17 }
 0xd7f   : > { %v1929_v18 = vpop.xlane.xlu0 %1928 }
 0xd80   : > { %v1937_v19 = vsub.f32 %v1881_v61, %v1929_v18  ;;  %v1828_v61 = vld [vmem:[#allocation10 + $0x24] sm:$0xf] }
 0xd81   : > { %v2092_v62 = vsel %vm1088_vm10, %v1828_v61, 0 }
 0xd82   : > { %v1942_v20 = vmul.f32 1.442695, %v1937_v19  ;;  %2101 = vmatpush.bf16.msrb.mxu2 %v2092_v62 }
 0xd84   : > { %4550 = vpow2.f32 %v1942_v20 }
 0xd89   : > { %v1935_v21 = vpop.xlane.xlu0 %1934 }
 0xd8a   : > { %v4551_v23 = vpop.eup %4550  ;;  %v1939_v24 = vsub.f32 %v1919_v47, %v1935_v21  ;;  %v2130_v47 = vsel %vm1088_vm10, %v1830_v63, 0 }
 0xd8b   : > { %v1951_v25 = vsel %vm1923_vm8, %v4551_v23, 0.0  ;;  %2139 = vmatpush.bf16.msra.mxu0 %v2130_v47 }
 0xd8c   : > { %v1946_v26 = vmul.f32 1.442695, %v1939_v24  ;;  %1952 = vadd.xlane.f32.xlu2 %v1951_v25 }
 0xd8e   : > { %4552 = vpow2.f32 %v1946_v26 }
 0xd94   : > { %v4553_v27 = vpop.eup %4552 }
 0xd95   : > { %v1957_v28 = vsel %vm1923_vm8, %v4553_v27, 0.0 }
 0xd96   : > { %1958 = vadd.xlane.f32.xlu0 %v1957_v28 }
 0xd97   : > { %v1932_v29 = vpop.xlane.xlu2 %1931 }
 0xd98   : > { %v1938_v30 = vsub.f32 %v1900_v7, %v1932_v29 }
 0xd9a   : > { %v1944_v31 = vmul.f32 1.442695, %v1938_v30 }
 0xd9c   : > { %4554 = vpow2.f32 %v1944_v31 }
 0xd9f   : > { %v1950_v40 = vpop.xlane.xlu0 %1949 }
 0xda2   : > { %v4555_v33 = vpop.eup %4554 }
 0xda3   : > { %v1954_v36 = vsel %vm1923_vm8, %v4555_v33, 0.0 }
 0xda4   : > { %2021 = vrot.lane.b32.xlu2 %v2020_v34, %s5106_s2  ;;  %1955 = vadd.xlane.f32.xlu0 %v1954_v36 }
 0xdb8   : > { %1974 = vrot.lane.b32.xlu0 %v1973_v38, %s5106_s2 }
 0xdff   : > { %v1953_v39 = vpop.xlane.xlu2 %1952 }
 0xe00   : > { %4556 = vrcp.f32 %v1953_v39 }
 0xe06   : > { %v4557_v41 = vpop.eup %4556 }
 0xe07   : > { %v1965_v42 = vmul.f32 %v4557_v41, %v4551_v23  ;;  %v2022_v43 = vpop.permute.xlu2 %2021 }
 0xe08   : > { %v2027_v44 = vsel %vm1979_vm11, %v2022_v43, 0 }
 0xe09   : > { %v1969_v45 = vpack.c.bf16 %v1965_v42, %v1965_v42  ;;  %2036 = vmatpush.bf16.msra.mxu3 %v2027_v44  ;;  %v1959_v46 = vpop.xlane.xlu0 %1958 }
 0xe0a   : > { %4558 = vrcp.f32 %v1959_v46  ;;  %v4291_v46 = vld [vmem:[#allocation13 + $0x8] sm:$0xff] }
 0xe0b   : > { %4136 = vmatmul.msk.bf16.vlgmr.msra.gmra.mxu2 %vm1923_vm8, %v1969_v45 }
 0xe0d   : > { %2120 = vmatpush.bf16.msrb.mxu3 %v2111_v3 }
 0xe10   : > { %v4559_v50 = vpop.eup %4558 }
 0xe11   : > { %v1967_v51 = vmul.f32 %v4559_v50, %v4553_v27  ;;  %v4290_v50 = vld [vmem:[#allocation13] sm:$0xff] }
 0xe13   : > { %v1971_v35 = vpack.c.bf16 %v1967_v51, %v1967_v51 }
 0xe15   : > { %4138 = vmatmul.msk.bf16.vlgmr.msrb.gmra.mxu0 %vm1923_vm8, %v1971_v35 }
 0xe17   : > { %v1956_v52 = vpop.xlane.xlu0 %1955 }
 0xe18   : > { %4560 = vrcp.f32 %v1956_v52 }
 0xe19   : > { %4562 = vrcp.f32 %v1950_v40 }
 0xe1e   : > { %v4561_v53 = vpop.eup %4560 }
 0xe1f   : > { %v1966_v55 = vmul.f32 %v4561_v53, %v4555_v33  ;;  %v4563_v54 = vpop.eup %4562 }
 0xe20   : > { %v1964_v56 = vmul.f32 %v4563_v54, %v4549_v10  ;;  %v4295_v54 = vld [vmem:[%s6114_s12 + $0x18] sm:$0xff] }
 0xe21   : > { %v1970_v48 = vpack.c.bf16 %v1966_v55, %v1966_v55  ;;  %2290 = vmatpush.bf16.msra.mxu2 %v4295_v54 }
 0xe22   : > { %v1968_v0 = vpack.c.bf16 %v1964_v56, %v1964_v56 }
 0xe23   : > { %4137 = vmatmul.msk.bf16.vlgmr.msra.gmra.mxu3 %vm1923_vm8, %v1970_v48 }
 0xe2a   : > { %v1975_v57 = vpop.permute.xlu0 %1974 }
 0xe2b   : > { %v1981_v59 = vsel %vm1979_vm11, %v1975_v57, 0  ;;  %v4294_v57 = vld [vmem:[%s6114_s12 + $0x10] sm:$0xff] }
 0xe2c   : > { %1990 = vmatpush.bf16.msra.mxu1 %v1981_v59  ;;  %2291 = vmatpush.bf16.msra.mxu2 %v4294_v57 }
 0xe2f   : > { %4135 = vmatmul.msk.bf16.vlgmr.msra.gmra.mxu1 %vm1923_vm8, %v1968_v0 }
 0xe30   : > { %2082 = vmatpush.bf16.msrb.mxu1 %v2073_v6  ;;  %v4478_v6 = vld [vmem:[#allocation17 + $0x3] ss:$0 sm:$0xff] }
 0xe34   : > { %2237 = vmatpush.bf16.msra.mxu1 %v4291_v46 }
 0xe38   : > { %2238 = vmatpush.bf16.msra.mxu1 %v4290_v50 }
 0xe8e   : > { %v2015_v58 = vpop.f32.mrf.mxu2 }
 0xe8f   : > { %v2066_v7 = vpack.c.bf16 %v2015_v58, %v2015_v58 }
 0xe91   : > { %4140 = vmatmul.msk.bf16.vlgmr.msrb.gmra.mxu2 %vm946_vm9, %v2066_v7 }
 0xe92   : > { %v2061_v9 = vpop.f32.mrf.mxu0 }
 0xe93   : > { %v2068_v10 = vpack.c.bf16 %v2061_v9, %v2061_v9 }
 0xe95   : > { %4142 = vmatmul.msk.bf16.vlgmr.msra.gmra.mxu0 %vm946_vm9, %v2068_v10 }
 0xe96   : > { %v2017_v11 = vpop.f32.mrf.mxu2 }
 0xe9a   : > { %v2063_v12 = vpop.f32.mrf.mxu0 }
 0xea6   : > { %v2038_v13 = vpop.f32.mrf.mxu3 }
 0xea7   : > { %v2067_v14 = vpack.c.bf16 %v2038_v13, %v2038_v13  ;;  %v4479_v13 = vld [vmem:[#allocation19 + $0x3] ss:$0 sm:$0xff] }
 0xea9   : > { %4141 = vmatmul.msk.bf16.vlgmr.msrb.gmra.mxu3 %vm946_vm9, %v2067_v14 }
 0xeac   : > { %v1992_v15 = vpop.f32.mrf.mxu1 }
 0xead   : > { %v2065_v17 = vpack.c.bf16 %v1992_v15, %v1992_v15 }
 0xeae   : > { %v2040_v18 = vpop.f32.mrf.mxu3 }
 0xeaf   : > { %4139 = vmatmul.msk.bf16.vlgmr.msrb.gmra.mxu1 %vm946_vm9, %v2065_v17 }
 0xeb4   : > { %v1994_v19 = vpop.f32.mrf.mxu1 }
 0xeb5   : > { %v4293_v19 = vld [vmem:[%s6114_s12 + $0x8] sm:$0xff] }
 0xeb6   : > { %2292 = vmatpush.bf16.msra.mxu2 %v4293_v19 }
 0xf12   : > { %v2141_v20 = vpop.f32.mrf.mxu0 }
 0xf13   : > { %v2150_v33 = vsel %vm831_vm0, %v2141_v20, 0.0  ;;  %v4292_v20 = vld [vmem:[%s6114_s12] sm:$0xff] }
 0xf14   : > { %v2103_v21 = vpop.f32.mrf.mxu2  ;;  %2293 = vmatpush.bf16.msra.mxu2 %v4292_v20 }
 0xf15   : > { %v2146_v27 = vsel %vm831_vm0, %v2103_v21, 0.0  ;;  %v4480_v21 = vld [vmem:[#allocation14] ss:$0 sm:$0xff] }
 0xf1a   : > { %v2143_v23 = vpop.f32.mrf.mxu0 }
 0xf1c   : > { %v2105_v24 = vpop.f32.mrf.mxu2 }
 0xf2c   : > { %v2084_v25 = vpop.f32.mrf.mxu1  ;;  %v2122_v26 = vpop.f32.mrf.mxu3 }
 0xf2d   : > { %v2145_v28 = vsel %vm831_vm0, %v2084_v25, 0.0  ;;  %v2148_v30 = vsel %vm831_vm0, %v2122_v26, 0.0 }
 0xf2e   : > { %v2147_v29 = vadd.f32 %v2146_v27, %v2145_v28  ;;  %v4481_v28 = vld [vmem:[#allocation16] ss:$0 sm:$0xff] }
 0xf30   : > { %v2149_v31 = vadd.f32 %v2148_v30, %v2147_v29 }
 0xf32   : > { %v2151_v34 = vadd.f32 %v2150_v33, %v2149_v31 }
 0xf34   : > { %v2155_v36 = vadd.f32 %v4477_v32, %v2151_v34  ;;  %v2086_v37 = vpop.f32.mrf.mxu1  ;;  %v2124_v38 = vpop.f32.mrf.mxu3 }
 0xf36   : > { %v5708_v39 = vadd.f32 %v2155_v36, %v5624_v49 }
 0xf38   : > { %v2161_v40 = vsel %vm831_vm0, %v5708_v39, 0.0 }
 0xf39   : > { %2162 = vadd.xlane.f32.xlu2 %v2161_v40 }
 0xfac   : > { %v2163_v41 = vpop.xlane.xlu2 %2162 }
 0xfad   : > { %v2164_v42 = vmul.f32 %v2163_v41, %v5445_v8  ;;  %v4297_v41 = vld [vmem:[%s6033_s5 + $0x38] sm:$0xff] }
 0xfae   : > { %2382 = vmatpush.bf16.msra.mxu3 %v4297_v41 }
 0xfaf   : > { %v2165_v43 = vsub.f32 %v5708_v39, %v2164_v42 }
 0xfb1   : > { %v2166_v44 = vmul.f32 %v2165_v43, %v2165_v43  ;;  %v2186_v11 = vmul.f32 %v4478_v6, %v2165_v43 }
 0xfb3   : > { %v2167_v45 = vsel %vm831_vm0, %v2166_v44, 0.0 }
 0xfb4   : > { %2168 = vadd.xlane.f32.xlu1 %v2167_v45 }
0x1027   : > { %v2169_v51 = vpop.xlane.xlu1 %2168 }
0x1028   : > { %v2170_v49 = vmul.f32 %v2169_v51, %v5456_v22 }
0x102a   : > { %4564 = vrsqrt.f32 %v2170_v49  ;;  %vm2178_vm12 = vcmp.eq.f32.partialorder %v2170_v49, inf  ;;  %v2181_v0 = vand.u32 2147483648, %v2170_v49  ;;  %vm2180_vm13 = vcmp.eq.f32.partialorder %v2170_v49, 0.0 }
0x1030   : > { %v4565_v35 = vpop.eup %4564 }
0x1031   : > { %v2172_v52 = vmul.f32 %v4565_v35, %v2170_v49 }
0x1033   : > { %v2173_v53 = vmul.f32 %v4565_v35, %v2172_v52 }
0x1035   : > { %v2174_v55 = vmul.f32 0.5, %v2173_v53 }
0x1037   : > { %v2175_v48 = vsub.f32 1.5, %v2174_v55 }
0x1039   : > { %v2176_v56 = vmul.f32 %v4565_v35, %v2175_v48 }
0x103b   : > { %v2177_v59 = vmul.f32 %v2176_v56, %v2170_v49 }
0x103d   : > { %v2179_v61 = vsel %vm2178_vm12, %v2170_v49, %v2177_v59 }
0x103e   : > { %v2182_v62 = vsel %vm2180_vm13, %v2181_v0, %v2179_v61  ;;  %v4482_v0 = vld [vmem:[#allocation17 + $0x4] ss:$0 sm:$0xff] }
0x103f   : > { %v2187_v63 = vadd.f32 1e-06, %v2182_v62 }
0x1041   : > { %4566 = vrcp.f32 %v2187_v63  ;;  %v2199_v5 = vand.u32 2147483648, %v2187_v63  ;;  %v2197_v7 = vand.u32 2147483647, %v2187_v63  ;;  %vm2193_vm15 = vweird.f32 %v2187_v63 }
0x1043   : > { %v2200_v10 = vor.u32 1.1754944e-38, %v2199_v5  ;;  %vm2198_vm2 = vcmp.eq.f32.partialorder %v2197_v7, 8.507059e+37  ;;  %v4483_v5 = vld [vmem:[#allocation19 + $0x4] ss:$0 sm:$0xff] }
0x1047   : > { %v4567_v47 = vpop.eup %4566 }
0x1048   : > { %v2189_v2 = vmul.f32 %v4567_v47, %v2187_v63  ;;  %vm2194_vm14 = vweird.f32 %v4567_v47 }
0x1049   : > { %vm2195_vm1 = vmor %vm2193_vm15, %vm2194_vm14 }
0x104a   : > { %v2190_v3 = vsub.f32 1.0, %v2189_v2 }
0x104c   : > { %v2191_v58 = vmul.f32 %v4567_v47, %v2190_v3 }
0x104e   : > { %v2192_v9 = vadd.f32 %v4567_v47, %v2191_v58 }
0x1050   : > { %v2196_v12 = vsel %vm2195_vm1, %v4567_v47, %v2192_v9 }
0x1051   : > { %v2201_v14 = vsel %vm2198_vm2, %v2200_v10, %v2196_v12  ;;  %v4484_v10 = vld [vmem:[#allocation8 + $0x3] ss:$0 sm:$0xff] }
0x1052   : > { %v2202_v15 = vmul.f32 %v2201_v14, %v2186_v11 }
0x1054   : > { %v2206_v17 = vadd.f32 %v4479_v13, %v2202_v15 }
0x1056   : > { %v2207_v18 = vpack.c.bf16 %v2206_v17, %v2206_v17 }
0x1058   : > { %4151 = vmatmul.msk.bf16.vlgmr.msra.gmra.mxu1 %vm831_vm0, %v2207_v18 }
0x10d5   : > { %v2240_v23 = vpop.f32.mrf.mxu1 }
0x10d6   : > { %v2241_v24 = vadd.f32 %v4480_v21, %v2240_v23 }
0x10d8   : > { %v2244_v25 = vmax.f32 %v2241_v24, 0.0 }
0x10da   : > { %v2245_v26 = vpack.c.bf16 %v2244_v25, %v2244_v25 }
0x10dc   : > { %4168 = vmatmul.msk.bf16.vlgmr.msra.gmra.mxu2 %vm2282_vm3, %v2245_v26 }
0x10dd   : > { %v2242_v27 = vpop.f32.mrf.mxu1 }
0x115f   : > { %v2295_v29 = vpop.f32.mrf.mxu2 }
0x1160   : > { %v2296_v30 = vadd.f32 %v4481_v28, %v2295_v29 }
0x1162   : > { %v5731_v31 = vadd.f32 %v2296_v30, %v5708_v39  ;;  %v4296_v39 = vld [vmem:[%s6033_s5 + $0x30] sm:$0xff] }
0x1163   : > { %2383 = vmatpush.bf16.msra.mxu3 %v4296_v39 }
0x1164   : > { %v2304_v32 = vsel %vm831_vm0, %v5731_v31, 0.0 }
0x1165   : > { %2305 = vadd.xlane.f32.xlu0 %v2304_v32 }
0x1167   : > { %v2297_v33 = vpop.f32.mrf.mxu2 }
0x11d8   : > { %v2306_v34 = vpop.xlane.xlu0 %2305 }
0x11d9   : > { %v2307_v36 = vmul.f32 %v2306_v34, %v5445_v8 }
0x11db   : > { %v2308_v37 = vsub.f32 %v5731_v31, %v2307_v36 }
0x11dd   : > { %v2309_v38 = vmul.f32 %v2308_v37, %v2308_v37  ;;  %v2329_v2 = vmul.f32 %v4482_v0, %v2308_v37 }
0x11df   : > { %v2310_v40 = vsel %vm831_vm0, %v2309_v38, 0.0 }
0x11e0   : > { %2311 = vadd.xlane.f32.xlu2 %v2310_v40 }
0x1253   : > { %v2312_v42 = vpop.xlane.xlu2 %2311 }
0x1254   : > { %v2313_v43 = vmul.f32 %v2312_v42, %v5456_v22 }
0x1256   : > { %4568 = vrsqrt.f32 %v2313_v43  ;;  %vm2321_vm4 = vcmp.eq.f32.partialorder %v2313_v43, inf  ;;  %v2324_v52 = vand.u32 2147483648, %v2313_v43  ;;  %vm2323_vm5 = vcmp.eq.f32.partialorder %v2313_v43, 0.0 }
0x125c   : > { %v4569_v44 = vpop.eup %4568 }
0x125d   : > { %v2315_v45 = vmul.f32 %v4569_v44, %v2313_v43 }
0x125f   : > { %v2316_v46 = vmul.f32 %v4569_v44, %v2315_v45 }
0x1261   : > { %v2317_v50 = vmul.f32 0.5, %v2316_v46 }
0x1263   : > { %v2318_v51 = vsub.f32 1.5, %v2317_v50 }
0x1265   : > { %v2319_v49 = vmul.f32 %v4569_v44, %v2318_v51 }
0x1267   : > { %v2320_v35 = vmul.f32 %v2319_v49, %v2313_v43 }
0x1269   : > { %v2322_v53 = vsel %vm2321_vm4, %v2313_v43, %v2320_v35 }
0x126a   : > { %v2325_v55 = vsel %vm2323_vm5, %v2324_v52, %v2322_v53 }
0x126b   : > { %v2330_v48 = vadd.f32 1e-06, %v2325_v55 }
0x126d   : > { %4570 = vrcp.f32 %v2330_v48  ;;  %v2342_v59 = vand.u32 2147483648, %v2330_v48  ;;  %v2340_v62 = vand.u32 2147483647, %v2330_v48  ;;  %vm2336_vm7 = vweird.f32 %v2330_v48 }
0x126f   : > { %v2343_v47 = vor.u32 1.1754944e-38, %v2342_v59  ;;  %vm2341_vm13 = vcmp.eq.f32.partialorder %v2340_v62, 8.507059e+37 }
0x1273   : > { %v4571_v54 = vpop.eup %4570 }
0x1274   : > { %v2332_v56 = vmul.f32 %v4571_v54, %v2330_v48  ;;  %vm2337_vm6 = vweird.f32 %v4571_v54 }
0x1275   : > { %vm2338_vm12 = vmor %vm2336_vm7, %vm2337_vm6 }
0x1276   : > { %v2333_v57 = vsub.f32 1.0, %v2332_v56 }
0x1278   : > { %v2334_v61 = vmul.f32 %v4571_v54, %v2333_v57 }
0x127a   : > { %v2335_v63 = vadd.f32 %v4571_v54, %v2334_v61 }
0x127c   : > { %v2339_v3 = vsel %vm2338_vm12, %v4571_v54, %v2335_v63 }
0x127d   : > { %v2344_v6 = vsel %vm2341_vm13, %v2343_v47, %v2339_v3 }
0x127e   : > { %v2345_v58 = vmul.f32 %v2344_v6, %v2329_v2 }
0x1280   : > { %v2349_v7 = vadd.f32 %v4483_v5, %v2345_v58 }
0x1282   : > { %v2357_v9 = vpack.c.bf16 %v2349_v7, %v2349_v7 }
0x1284   : > { %4181 = vmatmul.msk.bf16.vlgmr.msra.gmra.mxu3 %vm831_vm0, %v2357_v9 }
0x1307   : > { %v2385_v11 = vpop.f32.mrf.mxu3 }
0x1308   : > { %v2386_v12 = vadd.f32 %v4484_v10, %v2385_v11 }
0x130a   : > { %v2389_v13 = vpack.c.bf16 %v2386_v12, %v2386_v12 }
0x130c   : > { %2398 = vrot.lane.b32.xlu0 %v2389_v13, %s5104_s27  ;;  %2402 = vrot.lane.b32.xlu2 %v2389_v13, %s5103_s1  ;;  %v2404_v14 = vunpack.c.l.b16 %v2389_v13 }
0x130d   : > { %2400 = vrot.lane.b32.xlu1 %v2389_v13, %s5105_s22 }
0x130e   : > { %v5749_v17 = vpack.c.b16 %v2404_v14, %v2404_v14 }
0x130f   : > { %v2387_v15 = vpop.f32.mrf.mxu3 }
0x1314   : > { %2406 = vrot.lane.b32.xlu0 %v5749_v17, %s5106_s2 }
0x1366   : > { %v2403_v18 = vpop.permute.xlu2 %2402 }
0x1367   : > { %v2473_v19 = vunpack.c.l.b16 %v2403_v18 }
0x1369   : > { %v5753_v20 = vpack.c.b16 %v2473_v19, %v2473_v19 }
0x136b   : > { %2475 = vrot.lane.b32.xlu2 %v5753_v20, %s5106_s2 }
0x137e   : > { %v2399_v21 = vpop.permute.xlu0 %2398 }
0x137f   : > { %v2401_v23 = vpop.permute.xlu1 %2400  ;;  %v2427_v26 = vunpack.c.l.b16 %v2399_v21 }
0x1380   : > { %v2450_v24 = vunpack.c.l.b16 %v2401_v23 }
0x1381   : > { %v2428_v29 = vpack.c.b16 %v2427_v26, %v2427_v26 }
0x1382   : > { %v2451_v25 = vpack.c.b16 %v2450_v24, %v2450_v24 }
0x1384   : > { %2452 = vrot.lane.b32.xlu1 %v2451_v25, %s5106_s2 }
0x1386   : > { %v2407_v27 = vpop.permute.xlu0 %2406 }
0x1387   : > { %v2412_v28 = vsel %vm946_vm9, %v2407_v27, 0 }
0x1388   : > { %2421 = vmatpush.bf16.xpose.msrb.mxu0 %v2412_v28 }
0x138c   : > { %2429 = vrot.lane.b32.xlu1 %v2428_v29, %s5106_s2 }
0x138f   : > { %4182 = vmatmul.msk.bf16.vlgmr.msrb.gmra.mxu0 %vm946_vm9, %v2389_v13 }
0x13c5   : > { %v2476_v30 = vpop.permute.xlu2 %2475 }
0x13c6   : > { %v2481_v32 = vsel %vm946_vm9, %v2476_v30, 0 }
0x13c7   : > { %2490 = vmatpush.bf16.xpose.msrb.mxu3 %v2481_v32 }
0x13ce   : > { %4185 = vmatmul.msk.bf16.vlgmr.msrb.gmra.mxu3 %vm946_vm9, %v2403_v18 }
0x13f6   : > { %v2453_v33 = vpop.permute.xlu1 %2452 }
0x13f7   : > { %v2458_v34 = vsel %vm946_vm9, %v2453_v33, 0 }
0x13f8   : > { %2467 = vmatpush.bf16.xpose.msrb.mxu2 %v2458_v34 }
0x13fe   : > { %v2430_v36 = vpop.permute.xlu1 %2429 }
0x13ff   : > { %v2435_v37 = vsel %vm946_vm9, %v2430_v36, 0  ;;  %4184 = vmatmul.msk.bf16.vlgmr.msrb.gmra.mxu2 %vm946_vm9, %v2401_v23 }
0x1400   : > { %2444 = vmatpush.bf16.xpose.msrb.mxu1 %v2435_v37 }
0x1407   : > { %4183 = vmatmul.msk.bf16.vlgmr.msrb.gmra.mxu1 %vm946_vm9, %v2399_v21 }
0x140c   : > { %v2423_v38 = vpop.f32.mrf.mxu0 }
0x140d   : > { %v2424_v40 = vadd.f32 %v2423_v38, %v5483_v16 }
0x140f   : > { %v2496_v41 = vsel %vm946_vm9, %v2424_v40, -inf }
0x1410   : > { %2497 = vmax.xlane.f32.xlu1 %v2496_v41  ;;  %v2393_v41 = vld [vmem:[#allocation10 + $0x38] sm:$0xf] }
0x1414   : > { %v2425_v39 = vpop.f32.mrf.mxu0 }
0x1415   : > { %v2674_v39 = vsel %vm1088_vm10, %v2393_v41, 0 }
0x1451   : > { %v2492_v42 = vpop.f32.mrf.mxu3 }
0x1452   : > { %v2493_v43 = vadd.f32 %v2492_v42, %v5483_v16  ;;  %v2392_v42 = vld [vmem:[#allocation10 + $0x34] sm:$0xf] }
0x1454   : > { %v2505_v44 = vsel %vm946_vm9, %v2493_v43, -inf }
0x1455   : > { %2506 = vmax.xlane.f32.xlu0 %v2505_v44  ;;  %v2394_v44 = vld [vmem:[#allocation10 + $0x3c] sm:$0xf] }
0x1459   : > { %v2494_v45 = vpop.f32.mrf.mxu3 }
0x145a   : > { %v2693_v45 = vsel %vm1088_vm10, %v2394_v44, 0 }
0x1482   : > { %v2469_v46 = vpop.f32.mrf.mxu2 }
0x1483   : > { %v2470_v50 = vadd.f32 %v2469_v46, %v5483_v16  ;;  %v2498_v51 = vpop.xlane.xlu1 %2497  ;;  %v2391_v46 = vld [vmem:[#allocation10 + $0x30] sm:$0xf] }
0x1484   : > { %v2446_v49 = vpop.f32.mrf.mxu1  ;;  %v2508_v35 = vsub.f32 %v2424_v40, %v2498_v51 }
0x1485   : > { %v2502_v52 = vsel %vm946_vm9, %v2470_v50, -inf  ;;  %v2447_v55 = vadd.f32 %v2446_v49, %v5483_v16 }
0x1486   : > { %v2512_v53 = vmul.f32 1.442695, %v2508_v35  ;;  %2503 = vmax.xlane.f32.xlu2 %v2502_v52 }
0x1487   : > { %v2499_v56 = vsel %vm946_vm9, %v2447_v55, -inf }
0x1488   : > { %4572 = vpow2.f32 %v2512_v53 }
0x148a   : > { %v2471_v48 = vpop.f32.mrf.mxu2 }
0x148c   : > { %v2448_v54 = vpop.f32.mrf.mxu1 }
0x148e   : > { %v4573_v57 = vpop.eup %4572  ;;  %2500 = vmax.xlane.f32.xlu2 %v2499_v56 }
0x148f   : > { %v2520_v59 = vsel %vm946_vm9, %v4573_v57, 0.0 }
0x1490   : > { %2521 = vadd.xlane.f32.xlu0 %v2520_v59 }
0x14a6   : > { %2586 = vrot.lane.b32.xlu2 %v2451_v25, %s5107_s14 }
0x14ae   : > { %2565 = vrot.lane.b32.xlu2 %v2428_v29, %s5107_s14 }
0x14c8   : > { %v2507_v63 = vpop.xlane.xlu0 %2506 }
0x14c9   : > { %v2511_v3 = vsub.f32 %v2493_v43, %v2507_v63  ;;  %v2655_v43 = vsel %vm1088_vm10, %v2392_v42, 0 }
0x14cb   : > { %v2518_v58 = vmul.f32 1.442695, %v2511_v3 }
0x14f9   : > { %v2504_v0 = vpop.xlane.xlu2 %2503 }
0x14fa   : > { %v2510_v61 = vsub.f32 %v2470_v50, %v2504_v0  ;;  %v2636_v50 = vsel %vm1088_vm10, %v2391_v46, 0  ;;  %v4486_v46 = vld [vmem:[#allocation17 + $0x5] ss:$0 sm:$0xff] }
0x14fc   : > { %v2516_v62 = vmul.f32 1.442695, %v2510_v61 }
0x14fe   : > { %4574 = vpow2.f32 %v2516_v62 }
0x1501   : > { %v2501_v47 = vpop.xlane.xlu2 %2500 }
0x1502   : > { %v2509_v16 = vsub.f32 %v2447_v55, %v2501_v47 }
0x1503   : > { %v2522_v18 = vpop.xlane.xlu0 %2521 }
0x1504   : > { %v4575_v2 = vpop.eup %4574  ;;  %v2514_v5 = vmul.f32 1.442695, %v2509_v16 }
0x1505   : > { %v2526_v6 = vsel %vm946_vm9, %v4575_v2, 0.0 }
0x1506   : > { %4576 = vpow2.f32 %v2514_v5  ;;  %2527 = vadd.xlane.f32.xlu0 %v2526_v6 }
0x1507   : > { %4578 = vpow2.f32 %v2518_v58 }
0x1509   : > { %v2587_v7 = vpop.permute.xlu2 %2586 }
0x150a   : > { %v2592_v9 = vsel %vm1088_vm10, %v2587_v7, 0 }
0x150b   : > { %2601 = vmatpush.bf16.msra.mxu2 %v2592_v9 }
0x150c   : > { %v4577_v10 = vpop.eup %4576 }
0x150d   : > { %v2523_v11 = vsel %vm946_vm9, %v4577_v10, 0.0  ;;  %v4579_v13 = vpop.eup %4578 }
0x150e   : > { %2524 = vadd.xlane.f32.xlu1 %v2523_v11  ;;  %v2529_v15 = vsel %vm946_vm9, %v4579_v13, 0.0 }
0x150f   : > { %2683 = vmatpush.bf16.msrb.mxu2 %v2674_v39 }
0x1511   : > { %v2566_v12 = vpop.permute.xlu2 %2565 }
0x1512   : > { %v2571_v14 = vsel %vm1088_vm10, %v2566_v12, 0 }
0x1513   : > { %2580 = vmatpush.bf16.msra.mxu1 %v2571_v14 }
0x1516   : > { %2530 = vadd.xlane.f32.xlu1 %v2529_v15 }
0x1517   : > { %2664 = vmatpush.bf16.msrb.mxu1 %v2655_v43 }
0x151a   : > { %2607 = vrot.lane.b32.xlu0 %v5753_v20, %s5107_s14 }
0x152f   : > { %2544 = vrot.lane.b32.xlu1 %v5749_v17, %s5107_s14 }
0x1579   : > { %v2528_v19 = vpop.xlane.xlu0 %2527 }
0x157a   : > { %4580 = vrcp.f32 %v2528_v19  ;;  %v4299_v19 = vld [vmem:[%s6033_s5 + $0x48] sm:$0xff] }
0x157b   : > { %2811 = vrot.lane.b32.xlu1 %v4299_v19, %s5106_s2 }
0x1580   : > { %v4581_v21 = vpop.eup %4580 }
0x1581   : > { %v2538_v23 = vmul.f32 %v4581_v21, %v4575_v2  ;;  %v2525_v24 = vpop.xlane.xlu1 %2524  ;;  %v4298_v21 = vld [vmem:[%s6033_s5 + $0x40] sm:$0xff] }
0x1582   : > { %4582 = vrcp.f32 %v2525_v24 }
0x1583   : > { %v2542_v25 = vpack.c.bf16 %v2538_v23, %v2538_v23  ;;  %2809 = vrot.lane.b32.xlu1 %v4298_v21, %s5106_s2 }
0x1585   : > { %4188 = vmatmul.msk.bf16.vlgmr.msra.gmra.mxu2 %vm946_vm9, %v2542_v25 }
0x1588   : > { %v4583_v26 = vpop.eup %4582 }
0x1589   : > { %v2537_v27 = vmul.f32 %v4583_v26, %v4577_v10  ;;  %v2531_v28 = vpop.xlane.xlu1 %2530  ;;  %v4485_v10 = vld [vmem:[#allocation11 + $0x3] ss:$0 sm:$0xff] }
0x158a   : > { %4584 = vrcp.f32 %v2531_v28 }
0x158b   : > { %v2541_v29 = vpack.c.bf16 %v2537_v27, %v2537_v27  ;;  %4586 = vrcp.f32 %v2522_v18 }
0x158c   : > { %v2608_v30 = vpop.permute.xlu0 %2607 }
0x158d   : > { %v2613_v20 = vsel %vm1088_vm10, %v2608_v30, 0  ;;  %4187 = vmatmul.msk.bf16.vlgmr.msra.gmra.mxu1 %vm946_vm9, %v2541_v29 }
0x158e   : > { %2622 = vmatpush.bf16.msra.mxu3 %v2613_v20 }
0x1590   : > { %v4585_v17 = vpop.eup %4584 }
0x1591   : > { %v2539_v32 = vmul.f32 %v4585_v17, %v4579_v13  ;;  %v4587_v34 = vpop.eup %4586 }
0x1592   : > { %v2536_v36 = vmul.f32 %v4587_v34, %v4573_v57  ;;  %2702 = vmatpush.bf16.msrb.mxu3 %v2693_v45 }
0x1593   : > { %v2543_v33 = vpack.c.bf16 %v2539_v32, %v2539_v32 }
0x1594   : > { %v2540_v40 = vpack.c.bf16 %v2536_v36, %v2536_v36  ;;  %v4488_v36 = vld [vmem:[#allocation8 + $0x4] ss:$0 sm:$0xff] }
0x1595   : > { %4189 = vmatmul.msk.bf16.vlgmr.msra.gmra.mxu3 %vm946_vm9, %v2543_v33  ;;  %2815 = vrot.lane.b32.xlu1 %v4488_v36, %s5106_s2 }
0x15a1   : > { %v2545_v37 = vpop.permute.xlu1 %2544 }
0x15a2   : > { %v2550_v38 = vsel %vm1088_vm10, %v2545_v37, 0 }
0x15a3   : > { %2559 = vmatpush.bf16.msra.mxu0 %v2550_v38 }
0x15a6   : > { %4186 = vmatmul.msk.bf16.vlgmr.msra.gmra.mxu0 %vm946_vm9, %v2540_v40 }
0x15a7   : > { %2645 = vmatpush.bf16.msrb.mxu0 %v2636_v50 }
0x15ab   : > { %2802 = vmatpush.bf16.msra.mxu0 %v4299_v19 }
0x15af   : > { %2803 = vmatpush.bf16.msra.mxu0 %v4298_v21 }
0x15ed   : > { %v2812_v27 = vpop.permute.xlu1 %2811 }
0x15ee   : > { %2824 = vmatpush.bf16.msra.mxu1 %v2812_v27 }
0x15f5   : > { %v2810_v28 = vpop.permute.xlu1 %2809 }
0x15f6   : > { %2825 = vmatpush.bf16.msra.mxu1 %v2810_v28 }
0x1608   : > { %v2603_v51 = vpop.f32.mrf.mxu2 }
0x1609   : > { %v2630_v49 = vpack.c.bf16 %v2603_v51, %v2603_v51 }
0x160a   : > { %v2582_v35 = vpop.f32.mrf.mxu1 }
0x160b   : > { %v2629_v52 = vpack.c.bf16 %v2582_v35, %v2582_v35  ;;  %4192 = vmatmul.msk.bf16.vlgmr.msrb.gmra.mxu2 %vm946_vm9, %v2630_v49 }
0x160d   : > { %4191 = vmatmul.msk.bf16.vlgmr.msrb.gmra.mxu1 %vm946_vm9, %v2629_v52 }
0x1610   : > { %v2605_v53 = vpop.f32.mrf.mxu2 }
0x1612   : > { %v2584_v55 = vpop.f32.mrf.mxu1 }
0x1613   : > { %v4487_v55 = vld [vmem:[#allocation19 + $0x5] ss:$0 sm:$0xff] }
0x1618   : > { %v2624_v48 = vpop.f32.mrf.mxu3 }
0x1619   : > { %v2631_v54 = vpack.c.bf16 %v2624_v48, %v2624_v48 }
0x161b   : > { %4193 = vmatmul.msk.bf16.vlgmr.msrb.gmra.mxu3 %vm946_vm9, %v2631_v54 }
0x161d   : > { %4207 = vmatmul.msk.bf16.vlgmr.msra.gmra.mxu1 %vm831_vm0, %v5541_v4 }
0x1620   : > { %v2626_v56 = vpop.f32.mrf.mxu3 }
0x1623   : > { %v2561_v57 = vpop.f32.mrf.mxu0 }
0x1624   : > { %v2628_v59 = vpack.c.bf16 %v2561_v57, %v2561_v57 }
0x1626   : > { %4190 = vmatmul.msk.bf16.vlgmr.msrb.gmra.mxu0 %vm946_vm9, %v2628_v59 }
0x162b   : > { %v2563_v0 = vpop.f32.mrf.mxu0 }
0x162c   : > { %v2816_v0 = vpop.permute.xlu1 %2815 }
0x168a   : > { %v2666_v61 = vpop.f32.mrf.mxu1 }
0x168b   : > { %v2709_v3 = vsel %vm831_vm0, %v2666_v61, 0.0 }
0x168e   : > { %v2685_v62 = vpop.f32.mrf.mxu2 }
0x168f   : > { %v2711_v58 = vsel %vm831_vm0, %v2685_v62, 0.0 }
0x1692   : > { %v2668_v63 = vpop.f32.mrf.mxu1 }
0x1696   : > { %v2687_v47 = vpop.f32.mrf.mxu2 }
0x169a   : > { %v2827_v59 = vpop.f32.mrf.mxu1 }
0x169b   : > { %v2828_v62 = vadd.f32 %v2827_v59, %v2816_v0 }
0x169d   : > { %v2832_v63 = vpack.c.bf16 %v2828_v62, %v2828_v62 }
0x169e   : > { %v2704_v16 = vpop.f32.mrf.mxu3 }
0x169f   : > { %v2713_v11 = vsel %vm831_vm0, %v2704_v16, 0.0  ;;  %2848 = vrot.lane.b32.xlu1 %v2832_v63, %s5104_s27  ;;  %v2858_v47 = vsel %vm946_vm9, %v2832_v63, 0 }
0x16a0   : > { %2867 = vmatpush.bf16.xpose.msra.mxu2 %v2858_v47 }
0x16a2   : > { %v2829_v61 = vpop.f32.mrf.mxu1 }
0x16a3   : > { %v2647_v2 = vpop.f32.mrf.mxu0 }
0x16a4   : > { %v2708_v5 = vsel %vm831_vm0, %v2647_v2, 0.0 }
0x16a5   : > { %v2710_v6 = vadd.f32 %v2709_v3, %v2708_v5 }
0x16a6   : > { %v2706_v7 = vpop.f32.mrf.mxu3 }
0x16a7   : > { %v2712_v9 = vadd.f32 %v2711_v58, %v2710_v6 }
0x16a9   : > { %v2714_v12 = vadd.f32 %v2713_v11, %v2712_v9 }
0x16ab   : > { %v2649_v13 = vpop.f32.mrf.mxu0  ;;  %v2718_v14 = vadd.f32 %v4485_v10, %v2714_v12 }
0x16ad   : > { %v5806_v15 = vadd.f32 %v2718_v14, %v5731_v31 }
0x16af   : > { %v2724_v18 = vsel %vm831_vm0, %v5806_v15, 0.0 }
0x16b0   : > { %2725 = vadd.xlane.f32.xlu2 %v2724_v18 }
0x16c8   : > { %2850 = vrot.lane.b32.xlu2 %v2832_v63, %s5105_s22 }
0x1711   : > { %v2849_v7 = vpop.permute.xlu1 %2848 }
0x1712   : > { %v2877_v9 = vsel %vm946_vm9, %v2849_v7, 0 }
0x1713   : > { %2886 = vmatpush.bf16.xpose.msra.mxu3 %v2877_v9 }
0x1723   : > { %v2726_v31 = vpop.xlane.xlu2 %2725 }
0x1724   : > { %v2727_v23 = vmul.f32 %v2726_v31, %v5445_v8 }
0x1726   : > { %v2728_v24 = vsub.f32 %v5806_v15, %v2727_v23 }
0x1728   : > { %v2729_v25 = vmul.f32 %v2728_v24, %v2728_v24  ;;  %v2749_v52 = vmul.f32 %v4486_v46, %v2728_v24 }
0x172a   : > { %v2730_v26 = vsel %vm831_vm0, %v2729_v25, 0.0 }
0x172b   : > { %2731 = vadd.xlane.f32.xlu0 %v2730_v26  ;;  %v5834_v6 = vpop.permute.xlu2 %2850 }
0x172c   : > { %v2896_v58 = vsel %vm946_vm9, %v5834_v6, 0 }
0x172d   : > { %2905 = vmatpush.bf16.xpose.msrb.mxu0 %v2896_v58 }
0x173f   : > { %2852 = vrot.lane.b32.xlu0 %v2832_v63, %s5103_s1 }
0x179e   : > { %v2732_v29 = vpop.xlane.xlu0 %2731 }
0x179f   : > { %v2733_v30 = vmul.f32 %v2732_v29, %v5456_v22 }
0x17a1   : > { %4588 = vrsqrt.f32 %v2733_v30  ;;  %vm2741_vm14 = vcmp.eq.f32.partialorder %v2733_v30, inf  ;;  %v2744_v40 = vand.u32 2147483648, %v2733_v30  ;;  %vm2743_vm15 = vcmp.eq.f32.partialorder %v2733_v30, 0.0 }
0x17a7   : > { %v4589_v20 = vpop.eup %4588 }
0x17a8   : > { %v2735_v17 = vmul.f32 %v4589_v20, %v2733_v30 }
0x17aa   : > { %v2736_v32 = vmul.f32 %v4589_v20, %v2735_v17 }
0x17ac   : > { %v2737_v33 = vmul.f32 0.5, %v2736_v32 }
0x17ae   : > { %v2738_v34 = vsub.f32 1.5, %v2737_v33 }
0x17b0   : > { %v2739_v37 = vmul.f32 %v4589_v20, %v2738_v34 }
0x17b1   : > { %v2853_v10 = vpop.permute.xlu0 %2852 }
0x17b2   : > { %v2740_v38 = vmul.f32 %v2739_v37, %v2733_v30  ;;  %v2915_v11 = vsel %vm946_vm9, %v2853_v10, 0 }
0x17b3   : > { %2924 = vmatpush.bf16.xpose.msrb.mxu1 %v2915_v11  ;;  %v2834_v11 = vld [vmem:[#allocation10 + $0x40] sm:$0xf] }
0x17b4   : > { %v2742_v41 = vsel %vm2741_vm14, %v2733_v30, %v2740_v38 }
0x17b5   : > { %v2745_v39 = vsel %vm2743_vm15, %v2744_v40, %v2742_v41  ;;  %v2978_v41 = vunpack.c.l.b16 %v2832_v63 }
0x17b6   : > { %v2750_v42 = vadd.f32 1e-06, %v2745_v39 }
0x17b7   : > { %v2979_v39 = vpack.c.b16 %v2978_v41, %v2978_v41 }
0x17b8   : > { %4590 = vrcp.f32 %v2750_v42  ;;  %v2762_v45 = vand.u32 2147483648, %v2750_v42  ;;  %v2760_v51 = vand.u32 2147483647, %v2750_v42  ;;  %vm2756_vm2 = vweird.f32 %v2750_v42 }
0x17ba   : > { %v2763_v35 = vor.u32 1.1754944e-38, %v2762_v45  ;;  %vm2761_vm5 = vcmp.eq.f32.partialorder %v2760_v51, 8.507059e+37 }
0x17be   : > { %v4591_v43 = vpop.eup %4590 }
0x17bf   : > { %v2752_v4 = vmul.f32 %v4591_v43, %v2750_v42  ;;  %vm2757_vm1 = vweird.f32 %v4591_v43  ;;  %v3001_v42 = vunpack.c.l.b16 %v2849_v7  ;;  %v3024_v7 = vunpack.c.l.b16 %v5834_v6 }
0x17c0   : > { %vm2758_vm4 = vmor %vm2756_vm2, %vm2757_vm1 }
0x17c1   : > { %v2753_v44 = vsub.f32 1.0, %v2752_v4  ;;  %v3002_v4 = vpack.c.b16 %v3001_v42, %v3001_v42  ;;  %v3025_v9 = vpack.c.b16 %v3024_v7, %v3024_v7 }
0x17c3   : > { %v2754_v50 = vmul.f32 %v4591_v43, %v2753_v44 }
0x17c5   : > { %v2755_v49 = vadd.f32 %v4591_v43, %v2754_v50 }
0x17c7   : > { %v2759_v53 = vsel %vm2758_vm4, %v4591_v43, %v2755_v49  ;;  %v3047_v43 = vunpack.c.l.b16 %v2853_v10 }
0x17c8   : > { %v2764_v48 = vsel %vm2761_vm5, %v2763_v35, %v2759_v53 }
0x17c9   : > { %v2765_v54 = vmul.f32 %v2764_v48, %v2749_v52  ;;  %v3048_v44 = vpack.c.b16 %v3047_v43, %v3047_v43 }
0x17cb   : > { %v2769_v56 = vadd.f32 %v4487_v55, %v2765_v54 }
0x17cd   : > { %v2777_v57 = vpack.c.bf16 %v2769_v56, %v2769_v56 }
0x17cf   : > { %4206 = vmatmul.msk.bf16.vlgmr.msra.gmra.mxu0 %vm831_vm0, %v2777_v57 }
0x184c   : > { %v2805_v16 = vpop.f32.mrf.mxu0 }
0x184d   : > { %v2806_v2 = vadd.f32 %v4488_v36, %v2805_v16 }
0x184f   : > { %v2831_v3 = vpack.c.bf16 %v2806_v2, %v2806_v2 }
0x1851   : > { %2841 = vrot.lane.b32.xlu1 %v2831_v3, %s5104_s27  ;;  %4208 = vmatmul.msk.bf16.vlgmr.msra.gmra.mxu2 %vm946_vm9, %v2831_v3 }
0x1854   : > { %v2807_v5 = vpop.f32.mrf.mxu0 }
0x1859   : > { %2843 = vrot.lane.b32.xlu1 %v2831_v3, %s5105_s22 }
0x1861   : > { %2845 = vrot.lane.b32.xlu1 %v2831_v3, %s5103_s1 }
0x18c3   : > { %v2842_v12 = vpop.permute.xlu1 %2841 }
0x18c4   : > { %4209 = vmatmul.msk.bf16.vlgmr.msra.gmra.mxu3 %vm946_vm9, %v2842_v12  ;;  %v3078_v12 = vsel %vm1088_vm10, %v2834_v11, 0 }
0x18cb   : > { %v2844_v13 = vpop.permute.xlu1 %2843 }
0x18cc   : > { %4210 = vmatmul.msk.bf16.vlgmr.msrb.gmra.mxu0 %vm946_vm9, %v2844_v13 }
0x18d3   : > { %v2846_v14 = vpop.permute.xlu1 %2845 }
0x18d4   : > { %v2869_v18 = vpop.f32.mrf.mxu2  ;;  %4211 = vmatmul.msk.bf16.vlgmr.msrb.gmra.mxu1 %vm946_vm9, %v2846_v14 }
0x18d5   : > { %v2870_v19 = vadd.f32 %v2869_v18, %v5582_v60 }
0x18d7   : > { %v2930_v21 = vsel %vm946_vm9, %v2870_v19, -inf }
0x18d8   : > { %2931 = vmax.xlane.f32.xlu0 %v2930_v21 }
0x18dc   : > { %v2871_v31 = vpop.f32.mrf.mxu2 }
0x1947   : > { %v2888_v23 = vpop.f32.mrf.mxu3 }
0x1948   : > { %v2889_v24 = vadd.f32 %v2888_v23, %v5582_v60 }
0x1949   : > { %v2907_v25 = vpop.f32.mrf.mxu0 }
0x194a   : > { %v2908_v26 = vadd.f32 %v2907_v25, %v5582_v60  ;;  %v2933_v27 = vsel %vm946_vm9, %v2889_v24, -inf }
0x194b   : > { %v2932_v28 = vpop.xlane.xlu0 %2931  ;;  %2934 = vmax.xlane.f32.xlu1 %v2933_v27 }
0x194c   : > { %v2942_v29 = vsub.f32 %v2870_v19, %v2932_v28  ;;  %v2936_v30 = vsel %vm946_vm9, %v2908_v26, -inf }
0x194d   : > { %2937 = vmax.xlane.f32.xlu2 %v2936_v30 }
0x194e   : > { %v2946_v20 = vmul.f32 1.442695, %v2942_v29 }
0x194f   : > { %v2890_v17 = vpop.f32.mrf.mxu3 }
0x1950   : > { %4592 = vpow2.f32 %v2946_v20  ;;  %v2837_v17 = vld [vmem:[#allocation10 + $0x4c] sm:$0xf] }
0x1951   : > { %v2909_v32 = vpop.f32.mrf.mxu0  ;;  %v2926_v33 = vpop.f32.mrf.mxu1 }
0x1952   : > { %v2927_v34 = vadd.f32 %v2926_v33, %v5582_v60  ;;  %v3135_v32 = vsel %vm1088_vm10, %v2837_v17, 0  ;;  %v2836_v33 = vld [vmem:[#allocation10 + $0x48] sm:$0xf] }
0x1954   : > { %v2939_v36 = vsel %vm946_vm9, %v2927_v34, -inf }
0x1955   : > { %2940 = vmax.xlane.f32.xlu0 %v2939_v36  ;;  %v2835_v36 = vld [vmem:[#allocation10 + $0x44] sm:$0xf] }
0x1956   : > { %v4593_v37 = vpop.eup %4592 }
0x1957   : > { %v2954_v38 = vsel %vm946_vm9, %v4593_v37, 0.0 }
0x1958   : > { %2955 = vadd.xlane.f32.xlu1 %v2954_v38 }
0x1959   : > { %v2928_v40 = vpop.f32.mrf.mxu1 }
0x1969   : > { %2980 = vrot.lane.b32.xlu0 %v2979_v39, %s5106_s2 }
0x1971   : > { %3049 = vrot.lane.b32.xlu0 %v3048_v44, %s5106_s2  ;;  %3003 = vrot.lane.b32.xlu1 %v3002_v4, %s5106_s2 }
0x19be   : > { %v2935_v50 = vpop.xlane.xlu1 %2934 }
0x19bf   : > { %v2943_v52 = vsub.f32 %v2889_v24, %v2935_v50 }
0x19c0   : > { %v2938_v60 = vpop.xlane.xlu2 %2937 }
0x19c1   : > { %v2944_v45 = vsub.f32 %v2908_v26, %v2938_v60  ;;  %v2948_v54 = vmul.f32 1.442695, %v2943_v52 }
0x19c3   : > { %v2950_v46 = vmul.f32 1.442695, %v2944_v45 }
0x19c5   : > { %4594 = vpow2.f32 %v2950_v46 }
0x19c8   : > { %v2941_v51 = vpop.xlane.xlu0 %2940 }
0x19c9   : > { %v2945_v49 = vsub.f32 %v2927_v34, %v2941_v51  ;;  %v3116_v34 = vsel %vm1088_vm10, %v2836_v33, 0 }
0x19cb   : > { %v4595_v35 = vpop.eup %4594  ;;  %v2952_v53 = vmul.f32 1.442695, %v2945_v49  ;;  %v2956_v48 = vpop.xlane.xlu1 %2955 }
0x19cc   : > { %v2960_v55 = vsel %vm946_vm9, %v4595_v35, 0.0 }
0x19cd   : > { %4596 = vpow2.f32 %v2952_v53  ;;  %2961 = vadd.xlane.f32.xlu2 %v2960_v55 }
0x19ce   : > { %4598 = vrcp.f32 %v2956_v48 }
0x19cf   : > { %4600 = vpow2.f32 %v2948_v54 }
0x19d3   : > { %v4597_v56 = vpop.eup %4596 }
0x19d4   : > { %v2963_v57 = vsel %vm946_vm9, %v4597_v56, 0.0  ;;  %v4599_v59 = vpop.eup %4598 }
0x19d5   : > { %2964 = vadd.xlane.f32.xlu2 %v2963_v57  ;;  %v4601_v0 = vpop.eup %4600  ;;  %v2970_v61 = vmul.f32 %v4599_v59, %v4593_v37  ;;  %v3097_v37 = vsel %vm1088_vm10, %v2835_v36, 0  ;;  %v4489_v57 = vld [vmem:[#allocation11 + $0x4] ss:$0 sm:$0xff] }
0x19d6   : > { %v2957_v47 = vsel %vm946_vm9, %v4601_v0, 0.0 }
0x19d7   : > { %v2974_v16 = vpack.c.bf16 %v2970_v61, %v2970_v61 }
0x19db   : > { %v2981_v62 = vpop.permute.xlu0 %2980 }
0x19dc   : > { %v2986_v63 = vsel %vm1088_vm10, %v2981_v62, 0 }
0x19dd   : > { %2995 = vmatpush.bf16.msrb.mxu2 %v2986_v63  ;;  %2958 = vadd.xlane.f32.xlu2 %v2957_v47 }
0x19e0   : > { %4212 = vmatmul.msk.bf16.vlgmr.msrb.gmra.mxu2 %vm946_vm9, %v2974_v16  ;;  %v4301_v16 = vld [vmem:[%s6033_s5 + $0x58] sm:$0xff] }
0x19e1   : > { %3087 = vmatpush.bf16.msra.mxu2 %v3078_v12 }
0x19e3   : > { %v3050_v2 = vpop.permute.xlu0 %3049  ;;  %v3004_v3 = vpop.permute.xlu1 %3003 }
0x19e4   : > { %v3055_v5 = vsel %vm1088_vm10, %v3050_v2, 0  ;;  %v3009_v58 = vsel %vm1088_vm10, %v3004_v3, 0  ;;  %v4300_v2 = vld [vmem:[%s6033_s5 + $0x50] sm:$0xff] }
0x19e5   : > { %3018 = vmatpush.bf16.msrb.mxu3 %v3009_v58  ;;  %3064 = vmatpush.bf16.msra.mxu1 %v3055_v5 }
0x19e6   : > { %3244 = vmatpush.bf16.msrb.mxu2 %v4301_v16 }
0x19e9   : > { %3144 = vmatpush.bf16.msrb.mxu1 %v3135_v32  ;;  %3106 = vmatpush.bf16.msra.mxu3 %v3097_v37 }
0x19ea   : > { %3245 = vmatpush.bf16.msrb.mxu2 %v4300_v2 }
0x19f5   : > { %3026 = vrot.lane.b32.xlu2 %v3025_v9, %s5106_s2 }
0x19fd   : > { %3253 = vrot.lane.b32.xlu2 %v4301_v16, %s5106_s2 }
0x1a05   : > { %3251 = vrot.lane.b32.xlu2 %v4300_v2, %s5106_s2 }
0x1a40   : > { %v2962_v10 = vpop.xlane.xlu2 %2961 }
0x1a48   : > { %v2965_v13 = vpop.xlane.xlu2 %2964 }
0x1a49   : > { %4602 = vrcp.f32 %v2965_v13 }
0x1a4a   : > { %4604 = vrcp.f32 %v2962_v10 }
0x1a4f   : > { %v4603_v14 = vpop.eup %4602 }
0x1a50   : > { %v2973_v18 = vmul.f32 %v4603_v14, %v4597_v56  ;;  %v2959_v19 = vpop.xlane.xlu2 %2958  ;;  %v4605_v31 = vpop.eup %4604 }
0x1a51   : > { %4606 = vrcp.f32 %v2959_v19  ;;  %v2972_v23 = vmul.f32 %v4605_v31, %v4595_v35  ;;  %v4492_v31 = vld [vmem:[#allocation8 + $0x5] ss:$0 sm:$0xff] }
0x1a52   : > { %v2977_v21 = vpack.c.bf16 %v2973_v18, %v2973_v18  ;;  %3257 = vrot.lane.b32.xlu2 %v4492_v31, %s5106_s2 }
0x1a53   : > { %v2976_v28 = vpack.c.bf16 %v2972_v23, %v2972_v23 }
0x1a54   : > { %4215 = vmatmul.msk.bf16.vlgmr.msra.gmra.mxu1 %vm946_vm9, %v2977_v21 }
0x1a57   : > { %v4607_v6 = vpop.eup %4606 }
0x1a58   : > { %v2971_v24 = vmul.f32 %v4607_v6, %v4601_v0  ;;  %v3027_v25 = vpop.permute.xlu2 %3026 }
0x1a59   : > { %v3032_v26 = vsel %vm1088_vm10, %v3027_v25, 0 }
0x1a5a   : > { %v2975_v27 = vpack.c.bf16 %v2971_v24, %v2971_v24  ;;  %3041 = vmatpush.bf16.msra.mxu0 %v3032_v26 }
0x1a5c   : > { %4213 = vmatmul.msk.bf16.vlgmr.msrb.gmra.mxu3 %vm946_vm9, %v2975_v27 }
0x1a5d   : > { %4214 = vmatmul.msk.bf16.vlgmr.msra.gmra.mxu0 %vm946_vm9, %v2976_v28 }
0x1a5e   : > { %3125 = vmatpush.bf16.msrb.mxu0 %v3116_v34 }
0x1a60   : > { %v3254_v9 = vpop.permute.xlu2 %3253 }
0x1a61   : > { %3266 = vmatpush.bf16.msrb.mxu3 %v3254_v9 }
0x1a63   : > { %v2997_v29 = vpop.f32.mrf.mxu2 }
0x1a64   : > { %v3070_v30 = vpack.c.bf16 %v2997_v29, %v2997_v29 }
0x1a66   : > { %4216 = vmatmul.msk.bf16.vlgmr.msra.gmra.mxu2 %vm946_vm9, %v3070_v30 }
0x1a68   : > { %v3252_v10 = vpop.permute.xlu2 %3251 }
0x1a69   : > { %3267 = vmatpush.bf16.msrb.mxu3 %v3252_v10 }
0x1a6b   : > { %v2999_v20 = vpop.f32.mrf.mxu2 }
0x1a6c   : > { %v4490_v20 = vld [vmem:[#allocation17 + $0x6] ss:$0 sm:$0xff] }
0x1ad1   : > { %v3066_v38 = vpop.f32.mrf.mxu1 }
0x1ad2   : > { %v3073_v40 = vpack.c.bf16 %v3066_v38, %v3066_v38  ;;  %v4491_v38 = vld [vmem:[#allocation19 + $0x6] ss:$0 sm:$0xff] }
0x1ad4   : > { %4219 = vmatmul.msk.bf16.vlgmr.msrb.gmra.mxu1 %vm946_vm9, %v3073_v40 }
0x1ad9   : > { %v3068_v41 = vpop.f32.mrf.mxu1 }
0x1ada   : > { %v3043_v39 = vpop.f32.mrf.mxu0 }
0x1adb   : > { %v3072_v42 = vpack.c.bf16 %v3043_v39, %v3043_v39 }
0x1add   : > { %4218 = vmatmul.msk.bf16.vlgmr.msrb.gmra.mxu0 %vm946_vm9, %v3072_v42 }
0x1adf   : > { %v3020_v43 = vpop.f32.mrf.mxu3 }
0x1ae0   : > { %v3071_v4 = vpack.c.bf16 %v3020_v43, %v3020_v43  ;;  %v3258_v43 = vpop.permute.xlu2 %3257 }
0x1ae2   : > { %v3045_v44 = vpop.f32.mrf.mxu0  ;;  %4217 = vmatmul.msk.bf16.vlgmr.msra.gmra.mxu3 %vm946_vm9, %v3071_v4 }
0x1ae7   : > { %v3022_v60 = vpop.f32.mrf.mxu3 }
0x1ae9   : > { %v3089_v45 = vpop.f32.mrf.mxu2 }
0x1aea   : > { %v3150_v53 = vsel %vm831_vm0, %v3089_v45, 0.0 }
0x1af1   : > { %v3091_v46 = vpop.f32.mrf.mxu2 }
0x1af2   : > { %4233 = vmatmul.msk.bf16.vlgmr.msrb.gmra.mxu3 %vm831_vm0, %v5644_v1 }
0x1b51   : > { %v3146_v50 = vpop.f32.mrf.mxu1 }
0x1b52   : > { %v3155_v59 = vsel %vm831_vm0, %v3146_v50, 0.0 }
0x1b59   : > { %v3148_v51 = vpop.f32.mrf.mxu1 }
0x1b5a   : > { %v3127_v49 = vpop.f32.mrf.mxu0 }
0x1b5b   : > { %v3153_v54 = vsel %vm831_vm0, %v3127_v49, 0.0 }
0x1b62   : > { %v3129_v35 = vpop.f32.mrf.mxu0 }
0x1b65   : > { %v3108_v52 = vpop.f32.mrf.mxu3 }
0x1b66   : > { %v3151_v55 = vsel %vm831_vm0, %v3108_v52, 0.0 }
0x1b67   : > { %v3152_v48 = vadd.f32 %v3151_v55, %v3150_v53 }
0x1b69   : > { %v3154_v56 = vadd.f32 %v3153_v54, %v3152_v48 }
0x1b6b   : > { %v3156_v0 = vadd.f32 %v3155_v59, %v3154_v56 }
0x1b6d   : > { %v3110_v61 = vpop.f32.mrf.mxu3  ;;  %v3160_v62 = vadd.f32 %v4489_v57, %v3156_v0 }
0x1b6f   : > { %v5881_v63 = vadd.f32 %v3160_v62, %v5806_v15 }
0x1b71   : > { %v3166_v47 = vsel %vm831_vm0, %v5881_v63, 0.0 }
0x1b72   : > { %3167 = vadd.xlane.f32.xlu1 %v3166_v47 }
0x1b75   : > { %v3269_v4 = vpop.f32.mrf.mxu3 }
0x1b76   : > { %v3270_v44 = vadd.f32 %v3269_v4, %v3258_v43 }
0x1b78   : > { %v5901_v60 = vpack.c.bf16 %v3270_v44, %v3270_v44 }
0x1b7a   : > { %3292 = vrot.lane.b32.xlu2 %v5901_v60, %s5105_s22  ;;  %v3300_v45 = vsel %vm946_vm9, %v5901_v60, 0  ;;  %v3420_v43 = vunpack.c.l.b16 %v5901_v60 }
0x1b7b   : > { %3309 = vmatpush.bf16.xpose.msra.mxu0 %v3300_v45 }
0x1b7c   : > { %v3421_v4 = vpack.c.b16 %v3420_v43, %v3420_v43 }
0x1b7d   : > { %v3271_v46 = vpop.f32.mrf.mxu3 }
0x1b8b   : > { %3294 = vrot.lane.b32.xlu1 %v5901_v60, %s5103_s1 }
0x1bd4   : > { %v3293_v52 = vpop.permute.xlu2 %3292 }
0x1bd5   : > { %v3338_v53 = vsel %vm946_vm9, %v3293_v52, 0 }
0x1bd6   : > { %3347 = vmatpush.bf16.xpose.msra.mxu2 %v3338_v53 }
0x1be5   : > { %v3168_v15 = vpop.xlane.xlu1 %3167 }
0x1be6   : > { %v3169_v3 = vmul.f32 %v3168_v15, %v5445_v8 }
0x1be8   : > { %v3170_v5 = vsub.f32 %v5881_v63, %v3169_v3 }
0x1bea   : > { %v3171_v58 = vmul.f32 %v3170_v5, %v3170_v5  ;;  %v3191_v36 = vmul.f32 %v4490_v20, %v3170_v5 }
0x1bec   : > { %v3172_v7 = vsel %vm831_vm0, %v3171_v58, 0.0 }
0x1bed   : > { %3173 = vadd.xlane.f32.xlu0 %v3172_v7 }
0x1bfd   : > { %v5916_v55 = vpop.permute.xlu1 %3294 }
0x1bfe   : > { %v3357_v48 = vsel %vm946_vm9, %v5916_v55, 0 }
0x1bff   : > { %3366 = vmatpush.bf16.xpose.msra.mxu3 %v3357_v48 }
0x1c60   : > { %v3174_v11 = vpop.xlane.xlu0 %3173 }
0x1c61   : > { %v3175_v12 = vmul.f32 %v3174_v11, %v5456_v22 }
0x1c63   : > { %4608 = vrsqrt.f32 %v3175_v12  ;;  %vm3183_vm6 = vcmp.eq.f32.partialorder %v3175_v12, inf  ;;  %v3186_v24 = vand.u32 2147483648, %v3175_v12  ;;  %vm3185_vm7 = vcmp.eq.f32.partialorder %v3175_v12, 0.0 }
0x1c69   : > { %v4609_v13 = vpop.eup %4608 }
0x1c6a   : > { %v3177_v14 = vmul.f32 %v4609_v13, %v3175_v12 }
0x1c6c   : > { %v3178_v18 = vmul.f32 %v4609_v13, %v3177_v14 }
0x1c6e   : > { %v3179_v19 = vmul.f32 0.5, %v3178_v18 }
0x1c70   : > { %v3180_v21 = vsub.f32 1.5, %v3179_v19  ;;  %v3466_v19 = vunpack.c.l.b16 %v3293_v52 }
0x1c72   : > { %v3181_v6 = vmul.f32 %v4609_v13, %v3180_v21  ;;  %v3467_v21 = vpack.c.b16 %v3466_v19, %v3466_v19 }
0x1c74   : > { %v3182_v23 = vmul.f32 %v3181_v6, %v3175_v12 }
0x1c76   : > { %v3184_v25 = vsel %vm3183_vm6, %v3175_v12, %v3182_v23 }
0x1c77   : > { %v3187_v26 = vsel %vm3185_vm7, %v3186_v24, %v3184_v25 }
0x1c78   : > { %v3192_v1 = vadd.f32 1e-06, %v3187_v26 }
0x1c7a   : > { %4610 = vrcp.f32 %v3192_v1  ;;  %v3204_v30 = vand.u32 2147483648, %v3192_v1  ;;  %v3202_v32 = vand.u32 2147483647, %v3192_v1  ;;  %vm3198_vm13 = vweird.f32 %v3192_v1 }
0x1c7c   : > { %v3205_v34 = vor.u32 1.1754944e-38, %v3204_v30  ;;  %vm3203_vm15 = vcmp.eq.f32.partialorder %v3202_v32, 8.507059e+37 }
0x1c80   : > { %v4611_v27 = vpop.eup %4610 }
0x1c81   : > { %v3194_v28 = vmul.f32 %v4611_v27, %v3192_v1  ;;  %vm3199_vm12 = vweird.f32 %v4611_v27 }
0x1c82   : > { %vm3200_vm14 = vmor %vm3198_vm13, %vm3199_vm12 }
0x1c83   : > { %v3195_v29 = vsub.f32 1.0, %v3194_v28 }
0x1c85   : > { %v3196_v17 = vmul.f32 %v4611_v27, %v3195_v29 }
0x1c87   : > { %v3197_v33 = vadd.f32 %v4611_v27, %v3196_v17 }
0x1c89   : > { %v3201_v37 = vsel %vm3200_vm14, %v4611_v27, %v3197_v33 }
0x1c8a   : > { %v3206_v40 = vsel %vm3203_vm15, %v3205_v34, %v3201_v37 }
0x1c8b   : > { %v3207_v41 = vmul.f32 %v3206_v40, %v3191_v36  ;;  %v3489_v40 = vunpack.c.l.b16 %v5916_v55 }
0x1c8d   : > { %v3211_v39 = vadd.f32 %v4491_v38, %v3207_v41 }
0x1c8f   : > { %v3219_v42 = vpack.c.bf16 %v3211_v39, %v3211_v39  ;;  %v3490_v39 = vpack.c.b16 %v3489_v40, %v3489_v40 }
0x1c91   : > { %4232 = vmatmul.msk.bf16.vlgmr.msrb.gmra.mxu2 %vm831_vm0, %v3219_v42 }
0x1d14   : > { %v3247_v50 = vpop.f32.mrf.mxu2 }
0x1d15   : > { %v3248_v51 = vadd.f32 %v4492_v31, %v3247_v50 }
0x1d17   : > { %v3273_v49 = vpack.c.bf16 %v3248_v51, %v3248_v51 }
0x1d19   : > { %3285 = vrot.lane.b32.xlu0 %v3273_v49, %s5105_s22  ;;  %3287 = vrot.lane.b32.xlu2 %v3273_v49, %s5103_s1  ;;  %s5010_s1 = sshra.s32 %s3815_s19, 4  ;;  %s5011_s1 = int_to_ptr.hbm [resolvable:$true] %s5010_s1 }
0x1d1a   : > { %4234 = vmatmul.msk.bf16.vlgmr.msra.gmra.mxu0 %vm946_vm9, %v3273_v49  ;;  %p5017_p9 = scmp.lt.s32.totalorder %s5011_s1, %s6116_s7 }
0x1d1c   : > { %v3249_v35 = vpop.f32.mrf.mxu2 }
0x1d21   : > { %3290 = vrot.lane.b32.xlu2 %v5901_v60, %s5104_s27 }
0x1d29   : > { %3283 = vrot.lane.b32.xlu2 %v3273_v49, %s5104_s27  ;;  %s5012_s27 = scalar_lea.hbm %s5011_s1, 8 }
0x1d2a   : > { %p5013_p13 = scmp.ne.s32.totalorder %s5011_s1, %s5012_s27  ;;  %p5018_p0 = scmp.lt.s32.totalorder %s5016_s29, %s5012_s27 }
0x1d2c   : > { %p5014_p3 = pnand %p5013_p13, %p5293_p4  ;;  %p5019_p2 = por %p5018_p0, %p5017_p9 }
0x1d2e   : > { %p5015_p7 = pneg %p5014_p3 }
0x1d30   : > { %p5020_p1 = pnand %p5019_p2, %p5015_p7 }
0x1d73   : > { %v3288_v54 = vpop.permute.xlu2 %3287 }
0x1d74   : > { %4237 = vmatmul.msk.bf16.vlgmr.msra.gmra.mxu3 %vm946_vm9, %v3288_v54 }
0x1d7b   : > { %v3291_v56 = vpop.permute.xlu2 %3290 }
0x1d7c   : > { %v3319_v57 = vsel %vm946_vm9, %v3291_v56, 0  ;;  %v3443_v31 = vunpack.c.l.b16 %v3291_v56 }
0x1d7d   : > { %3328 = vmatpush.bf16.xpose.msra.mxu1 %v3319_v57 }
0x1d7e   : > { %v3444_v6 = vpack.c.b16 %v3443_v31, %v3443_v31 }
0x1d83   : > { %v3284_v59 = vpop.permute.xlu2 %3283 }
0x1d84   : > { %4235 = vmatmul.msk.bf16.vlgmr.msra.gmra.mxu1 %vm946_vm9, %v3284_v59 }
0x1d8b   : > { %v3286_v0 = vpop.permute.xlu0 %3285 }
0x1d8c   : > { %4236 = vmatmul.msk.bf16.vlgmr.msra.gmra.mxu2 %vm946_vm9, %v3286_v0 }
0x1d97   : > { %v3311_v61 = vpop.f32.mrf.mxu0 }
0x1d98   : > { %v3372_v62 = vsel %vm1923_vm8, %v3311_v61, -inf }
0x1d99   : > { %3373 = vmax.xlane.f32.xlu2 %v3372_v62 }
0x1d9f   : > { %v3313_v47 = vpop.f32.mrf.mxu0 }
0x1df7   : > { %v3368_v16 = vpop.f32.mrf.mxu3 }
0x1df8   : > { %v3381_v2 = vsel %vm1923_vm8, %v3368_v16, -inf }
0x1df9   : > { %3382 = vmax.xlane.f32.xlu1 %v3381_v2 }
0x1dff   : > { %v3370_v15 = vpop.f32.mrf.mxu3 }
0x1e00   : > { %v3277_v15 = vld [vmem:[#allocation10 + $0x54] sm:$0xf] }
0x1e01   : > { %v3330_v3 = vpop.f32.mrf.mxu1 }
0x1e02   : > { %v3375_v18 = vsel %vm1923_vm8, %v3330_v3, -inf }
0x1e09   : > { %v3332_v5 = vpop.f32.mrf.mxu1 }
0x1e0a   : > { %v3276_v5 = vld [vmem:[#allocation10 + $0x50] sm:$0xf] }
0x1e0c   : > { %v3374_v58 = vpop.xlane.xlu2 %3373 }
0x1e0d   : > { %v3384_v7 = vsub.f32 %v3311_v61, %v3374_v58  ;;  %v3520_v58 = vsel %vm1088_vm10, %v3276_v5, 0 }
0x1e0f   : > { %v3388_v9 = vmul.f32 1.442695, %v3384_v7  ;;  %v3349_v10 = vpop.f32.mrf.mxu2  ;;  %v3279_v7 = vld [vmem:[#allocation10 + $0x5c] sm:$0xf] }
0x1e10   : > { %v3378_v11 = vsel %vm1923_vm8, %v3349_v10, -inf }
0x1e11   : > { %4612 = vpow2.f32 %v3388_v9  ;;  %3379 = vmax.xlane.f32.xlu0 %v3378_v11  ;;  %v3577_v9 = vsel %vm1088_vm10, %v3279_v7, 0 }
0x1e17   : > { %v5927_v12 = vpop.eup %4612  ;;  %v3351_v13 = vpop.f32.mrf.mxu2 }
0x1e18   : > { %v3396_v14 = vsel %vm1923_vm8, %v5927_v12, 0.0 }
0x1e19   : > { %3397 = vadd.xlane.f32.xlu1 %v3396_v14  ;;  %3376 = vmax.xlane.f32.xlu0 %v3375_v18 }
0x1e2d   : > { %3468 = vrot.lane.b32.xlu0 %v3467_v21, %s5106_s2 }
0x1e35   : > { %3445 = vrot.lane.b32.xlu0 %v3444_v6, %s5106_s2 }
0x1e6c   : > { %v3383_v26 = vpop.xlane.xlu1 %3382 }
0x1e6d   : > { %v3387_v29 = vsub.f32 %v3368_v16, %v3383_v26  ;;  %v3278_v16 = vld [vmem:[#allocation10 + $0x58] sm:$0xf] }
0x1e6e   : > { %v3558_v2 = vsel %vm1088_vm10, %v3278_v16, 0 }
0x1e6f   : > { %v3394_v17 = vmul.f32 1.442695, %v3387_v29 }
0x1e84   : > { %v3380_v23 = vpop.xlane.xlu0 %3379 }
0x1e85   : > { %v3386_v24 = vsub.f32 %v3349_v10, %v3380_v23 }
0x1e87   : > { %v3392_v25 = vmul.f32 1.442695, %v3386_v24 }
0x1e89   : > { %4614 = vpow2.f32 %v3392_v25 }
0x1e8c   : > { %v3377_v1 = vpop.xlane.xlu0 %3376  ;;  %v3398_v44 = vpop.xlane.xlu1 %3397 }
0x1e8d   : > { %v3385_v27 = vsub.f32 %v3330_v3, %v3377_v1  ;;  %v3539_v3 = vsel %vm1088_vm10, %v3277_v15, 0 }
0x1e8f   : > { %v4615_v28 = vpop.eup %4614  ;;  %v3390_v30 = vmul.f32 1.442695, %v3385_v27 }
0x1e90   : > { %v3402_v20 = vsel %vm1923_vm8, %v4615_v28, 0.0 }
0x1e91   : > { %4616 = vpow2.f32 %v3390_v30  ;;  %3403 = vadd.xlane.f32.xlu1 %v3402_v20 }
0x1e92   : > { %4618 = vpow2.f32 %v3394_v17 }
0x1e97   : > { %v4617_v32 = vpop.eup %4616 }
0x1e98   : > { %v3399_v33 = vsel %vm1923_vm8, %v4617_v32, 0.0  ;;  %v4619_v34 = vpop.eup %4618 }
0x1e99   : > { %3400 = vadd.xlane.f32.xlu2 %v3399_v33  ;;  %v3405_v38 = vsel %vm1923_vm8, %v4619_v34, 0.0 }
0x1e9f   : > { %v3469_v36 = vpop.permute.xlu0 %3468 }
0x1ea0   : > { %v3474_v37 = vsel %vm1979_vm11, %v3469_v36, 0  ;;  %v4493_v36 = vld [vmem:[#allocation11 + $0x5] ss:$0 sm:$0xff] }
0x1ea1   : > { %3483 = vmatpush.bf16.msrb.mxu2 %v3474_v37  ;;  %3406 = vadd.xlane.f32.xlu2 %v3405_v38 }
0x1ea5   : > { %3567 = vmatpush.bf16.msra.mxu2 %v3558_v2 }
0x1ea7   : > { %v3446_v41 = vpop.permute.xlu0 %3445 }
0x1ea8   : > { %v3451_v42 = vsel %vm1979_vm11, %v3446_v41, 0 }
0x1ea9   : > { %3460 = vmatpush.bf16.msrb.mxu1 %v3451_v42 }
0x1eaa   : > { %3491 = vrot.lane.b32.xlu1 %v3490_v39, %s5106_s2 }
0x1ead   : > { %3548 = vmatpush.bf16.msra.mxu1 %v3539_v3  ;;  %v4494_v3 = vld [vmem:[#allocation17 + $0x7] ss:$0 sm:$0xff] }
0x1eb9   : > { %3422 = vrot.lane.b32.xlu2 %v3421_v4, %s5106_s2 }
0x1f04   : > { %v3404_v45 = vpop.xlane.xlu1 %3403 }
0x1f05   : > { %4620 = vrcp.f32 %v3404_v45 }
0x1f0b   : > { %v4621_v46 = vpop.eup %4620 }
0x1f0c   : > { %v3414_v50 = vmul.f32 %v4621_v46, %v4615_v28  ;;  %v3401_v51 = vpop.xlane.xlu2 %3400 }
0x1f0d   : > { %4622 = vrcp.f32 %v3401_v51  ;;  %v4302_v51 = vld [vmem:[#allocation13 + $0x10] sm:$0xff] }
0x1f0e   : > { %v3418_v49 = vpack.c.bf16 %v3414_v50, %v3414_v50  ;;  %4624 = vrcp.f32 %v3398_v44  ;;  %v4303_v50 = vld [vmem:[#allocation13 + $0x18] sm:$0xff] }
0x1f10   : > { %4240 = vmatmul.msk.bf16.vlgmr.msrb.gmra.mxu2 %vm1923_vm8, %v3418_v49 }
0x1f13   : > { %v4623_v35 = vpop.eup %4622 }
0x1f14   : > { %v3413_v52 = vmul.f32 %v4623_v35, %v4617_v32  ;;  %v3407_v53 = vpop.xlane.xlu2 %3406  ;;  %v4625_v60 = vpop.eup %4624 }
0x1f15   : > { %4626 = vrcp.f32 %v3407_v53  ;;  %v3412_v54 = vmul.f32 %v4625_v60, %v5927_v12 }
0x1f16   : > { %v3417_v55 = vpack.c.bf16 %v3413_v52, %v3413_v52 }
0x1f17   : > { %v3416_v47 = vpack.c.bf16 %v3412_v54, %v3412_v54 }
0x1f18   : > { %4239 = vmatmul.msk.bf16.vlgmr.msrb.gmra.mxu1 %vm1923_vm8, %v3417_v55 }
0x1f1b   : > { %v4627_v48 = vpop.eup %4626 }
0x1f1c   : > { %v3415_v56 = vmul.f32 %v4627_v48, %v4619_v34  ;;  %v3492_v57 = vpop.permute.xlu1 %3491  ;;  %v3423_v59 = vpop.permute.xlu2 %3422  ;;  %v4307_v48 = vld [vmem:[%s6114_s12 + $0x38] sm:$0xff] }
0x1f1d   : > { %v3497_v0 = vsel %vm1979_vm11, %v3492_v57, 0  ;;  %v3428_v61 = vsel %vm1979_vm11, %v3423_v59, 0  ;;  %3740 = vmatpush.bf16.msrb.mxu1 %v4307_v48 }
0x1f1e   : > { %v3419_v62 = vpack.c.bf16 %v3415_v56, %v3415_v56  ;;  %3437 = vmatpush.bf16.msrb.mxu0 %v3428_v61  ;;  %3506 = vmatpush.bf16.msrb.mxu3 %v3497_v0  ;;  %v4306_v56 = vld [vmem:[%s6114_s12 + $0x30] sm:$0xff] }
0x1f21   : > { %4238 = vmatmul.msk.bf16.vlgmr.msrb.gmra.mxu0 %vm1923_vm8, %v3416_v47  ;;  %4241 = vmatmul.msk.bf16.vlgmr.msrb.gmra.mxu3 %vm1923_vm8, %v3419_v62 }
0x1f22   : > { %3529 = vmatpush.bf16.msra.mxu0 %v3520_v58  ;;  %3586 = vmatpush.bf16.msra.mxu3 %v3577_v9 }
0x1f23   : > { %3741 = vmatpush.bf16.msrb.mxu1 %v4306_v56 }
0x1f26   : > { %3686 = vmatpush.bf16.msrb.mxu0 %v4303_v50 }
0x1f2a   : > { %3687 = vmatpush.bf16.msrb.mxu0 %v4302_v51 }
0x1f93   : > { %v3485_v10 = vpop.f32.mrf.mxu2 }
0x1f94   : > { %v3514_v11 = vpack.c.bf16 %v3485_v10, %v3485_v10 }
0x1f95   : > { %v3462_v12 = vpop.f32.mrf.mxu1 }
0x1f96   : > { %v3513_v13 = vpack.c.bf16 %v3462_v12, %v3462_v12  ;;  %4244 = vmatmul.msk.bf16.vlgmr.msra.gmra.mxu2 %vm946_vm9, %v3514_v11  ;;  %v4495_v12 = vld [vmem:[#allocation19 + $0x7] ss:$0 sm:$0xff] }
0x1f98   : > { %4243 = vmatmul.msk.bf16.vlgmr.msra.gmra.mxu1 %vm946_vm9, %v3513_v13 }
0x1f9b   : > { %v3487_v14 = vpop.f32.mrf.mxu2 }
0x1f9d   : > { %v3464_v18 = vpop.f32.mrf.mxu1 }
0x1f9e   : > { %v3439_v19 = vpop.f32.mrf.mxu0 }
0x1f9f   : > { %v3512_v21 = vpack.c.bf16 %v3439_v19, %v3439_v19 }
0x1fa1   : > { %4242 = vmatmul.msk.bf16.vlgmr.msra.gmra.mxu0 %vm946_vm9, %v3512_v21  ;;  %v4305_v21 = vld [vmem:[%s6114_s12 + $0x28] sm:$0xff] }
0x1fa2   : > { %3742 = vmatpush.bf16.msrb.mxu1 %v4305_v21 }
0x1fa4   : > { %v3508_v31 = vpop.f32.mrf.mxu3 }
0x1fa5   : > { %v3515_v6 = vpack.c.bf16 %v3508_v31, %v3508_v31  ;;  %v4304_v31 = vld [vmem:[%s6114_s12 + $0x20] sm:$0xff] }
0x1fa6   : > { %v3441_v23 = vpop.f32.mrf.mxu0  ;;  %3743 = vmatpush.bf16.msrb.mxu1 %v4304_v31 }
0x1fa7   : > { %4245 = vmatmul.msk.bf16.vlgmr.msra.gmra.mxu3 %vm946_vm9, %v3515_v6  ;;  %v4496_v6 = vld [vmem:[#allocation14 + $0x1] ss:$0 sm:$0xff] }
0x1fac   : > { %v3510_v24 = vpop.f32.mrf.mxu3 }
0x2015   : > { %v3550_v25 = vpop.f32.mrf.mxu1 }
0x2016   : > { %v3593_v30 = vsel %vm831_vm0, %v3550_v25, 0.0 }
0x2019   : > { %v3569_v26 = vpop.f32.mrf.mxu2 }
0x201a   : > { %v3595_v32 = vsel %vm831_vm0, %v3569_v26, 0.0 }
0x201d   : > { %v3552_v1 = vpop.f32.mrf.mxu1 }
0x201e   : > { %v3531_v27 = vpop.f32.mrf.mxu0 }
0x201f   : > { %v3592_v29 = vsel %vm831_vm0, %v3531_v27, 0.0  ;;  %v4497_v27 = vld [vmem:[#allocation16 + $0x1] ss:$0 sm:$0xff] }
0x2020   : > { %v3594_v20 = vadd.f32 %v3593_v30, %v3592_v29 }
0x2021   : > { %v3571_v28 = vpop.f32.mrf.mxu2 }
0x2022   : > { %v3596_v34 = vadd.f32 %v3595_v32, %v3594_v20 }
0x2026   : > { %v3533_v17 = vpop.f32.mrf.mxu0 }
0x202a   : > { %v3588_v33 = vpop.f32.mrf.mxu3 }
0x202b   : > { %v3597_v37 = vsel %vm831_vm0, %v3588_v33, 0.0 }
0x202c   : > { %v3598_v38 = vadd.f32 %v3597_v37, %v3596_v34 }
0x202e   : > { %v3602_v40 = vadd.f32 %v4493_v36, %v3598_v38 }
0x2030   : > { %v5963_v41 = vadd.f32 %v3602_v40, %v5881_v63 }
0x2032   : > { %v3590_v39 = vpop.f32.mrf.mxu3  ;;  %v3608_v42 = vsel %vm831_vm0, %v5963_v41, 0.0 }
0x2033   : > { %3609 = vadd.xlane.f32.xlu0 %v3608_v42 }
0x20a6   : > { %v3610_v43 = vpop.xlane.xlu0 %3609 }
0x20a7   : > { %v3611_v4 = vmul.f32 %v3610_v43, %v5445_v8 }
0x20a9   : > { %v3612_v44 = vsub.f32 %v5963_v41, %v3611_v4 }
0x20ab   : > { %v3613_v45 = vmul.f32 %v3612_v44, %v3612_v44  ;;  %v3633_v10 = vmul.f32 %v4494_v3, %v3612_v44 }
0x20ad   : > { %v3614_v46 = vsel %vm831_vm0, %v3613_v45, 0.0 }
0x20ae   : > { %3615 = vadd.xlane.f32.xlu1 %v3614_v46 }
0x2121   : > { %v3616_v49 = vpop.xlane.xlu1 %3615 }
0x2122   : > { %v3617_v63 = vmul.f32 %v3616_v49, %v5456_v22 }
0x2124   : > { %4628 = vrsqrt.f32 %v3617_v63  ;;  %vm3625_vm9 = vcmp.eq.f32.partialorder %v3617_v63, inf  ;;  %v3628_v59 = vand.u32 2147483648, %v3617_v63  ;;  %vm3627_vm10 = vcmp.eq.f32.partialorder %v3617_v63, 0.0 }
0x212a   : > { %v4629_v35 = vpop.eup %4628 }
0x212b   : > { %v3619_v52 = vmul.f32 %v4629_v35, %v3617_v63 }
0x212d   : > { %v3620_v53 = vmul.f32 %v4629_v35, %v3619_v52  ;;  %v4498_v52 = vld [vmem:[%s6115_s6] ss:$0 sm:$0xff] }
0x212f   : > { %v3621_v55 = vmul.f32 0.5, %v3620_v53 }
0x2131   : > { %v3622_v60 = vsub.f32 1.5, %v3621_v55 }
0x2133   : > { %v3623_v54 = vmul.f32 %v4629_v35, %v3622_v60 }
0x2135   : > { %v3624_v57 = vmul.f32 %v3623_v54, %v3617_v63 }
0x2137   : > { %v3626_v0 = vsel %vm3625_vm9, %v3617_v63, %v3624_v57  ;;  %v4499_v57 = vld [vmem:[#allocation20] ss:$0 sm:$0xff] }
0x2138   : > { %v3629_v61 = vsel %vm3627_vm10, %v3628_v59, %v3626_v0 }
0x2139   : > { %v3634_v62 = vadd.f32 1e-06, %v3629_v61 }
0x213b   : > { %4630 = vrcp.f32 %v3634_v62  ;;  %v3646_v15 = vand.u32 2147483648, %v3634_v62  ;;  %v3644_v58 = vand.u32 2147483647, %v3634_v62  ;;  %vm3640_vm11 = vweird.f32 %v3634_v62 }
0x213d   : > { %v3647_v9 = vor.u32 1.1754944e-38, %v3646_v15  ;;  %vm3645_vm2 = vcmp.eq.f32.partialorder %v3644_v58, 8.507059e+37 }
0x2141   : > { %v4631_v47 = vpop.eup %4630 }
0x2142   : > { %v3636_v16 = vmul.f32 %v4631_v47, %v3634_v62  ;;  %vm3641_vm8 = vweird.f32 %v4631_v47 }
0x2143   : > { %vm3642_vm1 = vmor %vm3640_vm11, %vm3641_vm8 }
0x2144   : > { %v3637_v2 = vsub.f32 1.0, %v3636_v16 }
0x2146   : > { %v3638_v5 = vmul.f32 %v4631_v47, %v3637_v2 }
0x2148   : > { %v3639_v7 = vadd.f32 %v4631_v47, %v3638_v5 }
0x214a   : > { %v3643_v11 = vsel %vm3642_vm1, %v4631_v47, %v3639_v7 }
0x214b   : > { %v3648_v13 = vsel %vm3645_vm2, %v3647_v9, %v3643_v11 }
0x214c   : > { %v3649_v14 = vmul.f32 %v3648_v13, %v3633_v10 }
0x214e   : > { %v3653_v18 = vadd.f32 %v4495_v12, %v3649_v14 }
0x2150   : > { %v3654_v19 = vpack.c.bf16 %v3653_v18, %v3653_v18 }
0x2152   : > { %4254 = vmatmul.msk.bf16.vlgmr.msrb.gmra.mxu0 %vm831_vm0, %v3654_v19 }
0x21cf   : > { %v3689_v23 = vpop.f32.mrf.mxu0 }
0x21d0   : > { %v3690_v24 = vadd.f32 %v4496_v6, %v3689_v23 }
0x21d2   : > { %v3693_v25 = vmax.f32 %v3690_v24, 0.0 }
0x21d4   : > { %v3694_v26 = vpack.c.bf16 %v3693_v25, %v3693_v25 }
0x21d6   : > { %4279 = vmatmul.msk.bf16.vlgmr.msrb.gmra.mxu1 %vm2282_vm3, %v3694_v26 }
0x21d7   : > { %v3691_v1 = vpop.f32.mrf.mxu0 }
0x2253   : > { %v3745_v28 = vpop.f32.mrf.mxu1 }
0x2254   : > { %v3746_v29 = vadd.f32 %v4497_v27, %v3745_v28 }
0x2256   : > { %v3749_v30 = vadd.f32 %v3746_v29, %v5963_v41 }
0x2258   : > { %v3752_v20 = vsel %vm831_vm0, %v3749_v30, 0.0 }
0x2259   : > { %3753 = vadd.xlane.f32.xlu2 %v3752_v20 }
0x225b   : > { %v3747_v17 = vpop.f32.mrf.mxu1 }
0x22cc   : > { %v3754_v32 = vpop.xlane.xlu2 %3753 }
0x22cd   : > { %v3755_v33 = vmul.f32 %v3754_v32, %v5445_v8 }
0x22cf   : > { %v3756_v34 = vsub.f32 %v3749_v30, %v3755_v33 }
0x22d1   : > { %v3757_v36 = vmul.f32 %v3756_v34, %v3756_v34  ;;  %v3777_v54 = vmul.f32 %v4498_v52, %v3756_v34 }
0x22d3   : > { %v3758_v37 = vsel %vm831_vm0, %v3757_v36, 0.0 }
0x22d4   : > { %3759 = vadd.xlane.f32.xlu0 %v3758_v37 }
0x2347   : > { %v3760_v38 = vpop.xlane.xlu0 %3759 }
0x2348   : > { %v3761_v40 = vmul.f32 %v3760_v38, %v5456_v22 }
0x234a   : > { %4632 = vrsqrt.f32 %v3761_v40  ;;  %vm3769_vm3 = vcmp.eq.f32.partialorder %v3761_v40, inf  ;;  %v3772_v46 = vand.u32 2147483648, %v3761_v40  ;;  %vm3771_vm4 = vcmp.eq.f32.partialorder %v3761_v40, 0.0 }
0x2350   : > { %v4633_v39 = vpop.eup %4632 }
0x2351   : > { %v3763_v42 = vmul.f32 %v4633_v39, %v3761_v40 }
0x2353   : > { %v3764_v43 = vmul.f32 %v4633_v39, %v3763_v42 }
0x2355   : > { %v3765_v41 = vmul.f32 0.5, %v3764_v43 }
0x2357   : > { %v3766_v4 = vsub.f32 1.5, %v3765_v41 }
0x2359   : > { %v3767_v44 = vmul.f32 %v4633_v39, %v3766_v4 }
0x235b   : > { %v3768_v45 = vmul.f32 %v3767_v44, %v3761_v40 }
0x235d   : > { %v3770_v8 = vsel %vm3769_vm3, %v3761_v40, %v3768_v45 }
0x235e   : > { %v3773_v50 = vsel %vm3771_vm4, %v3772_v46, %v3770_v8 }
0x235f   : > { %v3778_v51 = vadd.f32 1e-06, %v3773_v50 }
0x2361   : > { %4634 = vrcp.f32 %v3778_v51  ;;  %v3790_v22 = vand.u32 2147483648, %v3778_v51  ;;  %v3788_v55 = vand.u32 2147483647, %v3778_v51  ;;  %vm3784_vm6 = vweird.f32 %v3778_v51 }
0x2363   : > { %v3791_v48 = vor.u32 1.1754944e-38, %v3790_v22  ;;  %vm3789_vm12 = vcmp.eq.f32.partialorder %v3788_v55, 8.507059e+37 }
0x2367   : > { %v4635_v49 = vpop.eup %4634 }
0x2368   : > { %v3780_v63 = vmul.f32 %v4635_v49, %v3778_v51  ;;  %vm3785_vm5 = vweird.f32 %v4635_v49 }
0x2369   : > { %vm3786_vm7 = vmor %vm3784_vm6, %vm3785_vm5 }
0x236a   : > { %v3781_v35 = vsub.f32 1.0, %v3780_v63 }
0x236c   : > { %v3782_v53 = vmul.f32 %v4635_v49, %v3781_v35 }
0x236e   : > { %v3783_v60 = vadd.f32 %v4635_v49, %v3782_v53 }
0x2370   : > { %v3787_v56 = vsel %vm3786_vm7, %v4635_v49, %v3783_v60 }
0x2371   : > { %v3792_v59 = vsel %vm3789_vm12, %v3791_v48, %v3787_v56 }
0x2372   : > { %v3793_v0 = vmul.f32 %v3792_v59, %v3777_v54 }
0x2374   : > { %v3797_v61 = vadd.f32 %v4499_v57, %v3793_v0 }
0x2376   : > { %3798 = vst.msk [vmem:[%s811_s24] sm:$0xff] %vm831_vm0, %v3797_v61 }
0x2377   : > { %5023 = shalt.err (!%p5020_p1)
}
0x2378   : > { %4350 = dma.vmem_to_hbm [thread:$0]  (%p5293_p4), %s3813_s8, 128, %s3815_s19, %s3800_s13  }
0x2379 PF: > { %s6118_s21 = sld [smem:[#allocation31_spill]] }
0x237a   : > { %s6120_s18 = sld [smem:[#allocation32_spill]] }
0x237f   : > { %s3826_s28 = sand.u32 1, %s6118_s21  }
0x2380   : > { %p6121_p12 = scmp.ge.s32.totalorder %s6120_s18, 2  ;;  %s3827_s11 = scalar_lea.sflag [#allocation4], %s3826_s28 }
0x2382   : > { %p4391_p8 = pnand %p6121_p12, %p5297_p5 }
0x2384   : > { %p4392_p10 = pneg %p4391_p8 }
0x2386   : > { %5069 = dma.done.wait (%p4392_p10), %s3827_s11, 128  }
0x2387   : > { %5071 = vsyncadd (%p4392_p10), %s3827_s11, 4294967168  ;;  %s6122_s27 = sld [smem:[#allocation33_spill]]  ;;  %s6124_s24 = smov %s5078_s25 }
0x2388   : > { %s6123_s0 = sld [smem:[#allocation34_spill]]  ;;  %s6125_s25 = smov %s5082_s26 }
0x238d   : > { %p38_p6 = scmp.ge.s32.totalorder %s6122_s27, 4  }
0x238e   : > { %s6126_s26 = smov %s6123_s0 }
0x238f   :  { %40 = sbr.rel (!%p38_p6) target bundleno = 27 (0x1b), region = 237 }
0x2394   :  { %3833 = vsyncpa [#allocation3], 1 }
0x2395   :  { %3835 = vsyncpa [#allocation3 + $0x1], 1 }
0x2396   :  { %3836 = vsyncpa [#allocation6], 1 }
0x2397   :  { %3838 = vsyncpa [#allocation6 + $0x1], 1 }
0x2398   :  { %3839 = vsyncpa [#allocation9], 1 }
0x2399   :  { %3840 = vsyncpa [#allocation12], 1 }
0x239a   :  { %3841 = vsyncpa [#allocation15], 1 }
0x239b   :  { %3842 = vsyncpa [#allocation18], 1 }
0x239c   :  { %3843 = vsyncpa [#allocation21], 1 }
0x239d   :  { %3844 = vsyncpa [#allocation4], 1 }
0x239e   :  { %3846 = vsyncpa [#allocation4 + $0x1], 1 }

</bundles_post_ra>
